<compile_context>
chip_gen: v6e
topology: v6e:2x2x1
jax: 0.10.0
libtpu: 0.0.40
codegen_flags: <defaults>
</compile_context>

<pallas_src>
import jax
import jax.numpy as jnp
from jax.experimental import pallas as pl
from jax.experimental.pallas import tpu as pltpu


CH = 128            # conv3 output-row chunk (rows of W3 per MXU pass)
NC = 1024 // CH     # 8 chunks -> matches the (8, 128) pooled-feature layout


# -----------------------------------------------------------------------------
# Phase 1 kernel: one grid step == (one batch element, one N-tile).
#   x tile              : (1, C, TN) f32   (points on the lane axis)
#   h1 = relu(W1t . x)          (64,  TN)  VPU broadcast-FMA (K = C is tiny)
#   h2 = relu(W2t @ h1)         (128, TN)  MXU, bf16 in / f32 acc
#   per 128-row chunk of W3t:   s = W3t_c @ h2  ->  lane-max  ->  running max
#   last tile: g = relu(max + b3)  (deferred bias+ReLU, exact by monotonicity)
# -----------------------------------------------------------------------------
def stn3d_conv_pool_kernel(x_ref,                     # (1, C, TN)    f32
                           w1_ref, b1_ref,            # (64, C) f32, (64, 1) f32
                           w2_ref, b2_ref,            # (128, 64) bf16, (128, 1) f32
                           w3_ref, b3_ref,            # (1024, 128) bf16, (8, 128) f32
                           g_ref):                    # out (1, 8, 128) f32
    nt = pl.program_id(1)

    @pl.when(nt == 0)
    def _():
        # b3 + ReLU are deferred past the max, so the identity is -inf, not 0.
        g_ref[...] = jnp.full_like(g_ref, -jnp.inf)

    x = x_ref[0]                                       # (C, TN) f32
    C = x.shape[0]
    w1 = w1_ref[...]                                   # (64, C) f32

    # conv1: depth-C contraction as VPU outer-product FMAs (keeps MXU free).
    acc1 = w1[:, 0:1] * x[0:1, :]                      # (64, TN)
    for c in range(1, C):
        acc1 = acc1 + w1[:, c:c + 1] * x[c:c + 1, :]
    h1 = jnp.maximum(acc1 + b1_ref[...], 0.0)          # (64, TN) f32

    # conv2 on the MXU: bf16 operands, f32 accumulation.
    h2 = jnp.maximum(
        jnp.dot(w2_ref[...], h1.astype(jnp.bfloat16),
                preferred_element_type=jnp.float32) + b2_ref[...], 0.0)   # (128, TN)
    h2b = h2.astype(jnp.bfloat16)

    # conv3 chunked over its 1024 output rows: each (CH, TN) chunk is reduced
    # to its lane-max right away, so the (1024, TN) f32 tensor never exists.
    for c in range(NC):
        s = jnp.dot(w3_ref[pl.ds(c * CH, CH), :], h2b,
                    preferred_element_type=jnp.float32)        # (CH, TN) f32
        m = jnp.max(s, axis=1)                                 # (CH,)
        g_ref[0, c, :] = jnp.maximum(g_ref[0, c, :], m)

    # Deferred conv3 bias + ReLU, applied once per batch element.
    @pl.when(nt == pl.num_programs(1) - 1)
    def _():
        g_ref[0] = jnp.maximum(g_ref[0] + b3_ref[...], 0.0)


# -----------------------------------------------------------------------------
# Phase 2 kernel: fc1..fc3 batched over the (sublane-padded) batch in one call.
#   f1 = relu(g  @ W4 + b4)   (Bp, 512)
#   f2 = relu(f1 @ W5 + b5)   (Bp, 256)
#   o  = f2 @ W6p + b6p       (Bp, 128)  (first 9 cols real; b6p has BN fold + iden)
# -----------------------------------------------------------------------------
def stn3d_head_kernel(g_ref,
                      w4_ref, b4_ref, w5_ref, b5_ref, w6_ref, b6_ref,
                      o_ref):
    g = g_ref[...]                                     # (Bp, 1024) f32
    f1 = jnp.maximum(
        jnp.dot(g.astype(jnp.bfloat16), w4_ref[...],
                preferred_element_type=jnp.float32) + b4_ref[...], 0.0)   # (Bp, 512)
    f2 = jnp.maximum(
        jnp.dot(f1.astype(jnp.bfloat16), w5_ref[...],
                preferred_element_type=jnp.float32) + b5_ref[...], 0.0)   # (Bp, 256)
    o_ref[...] = (jnp.dot(f2.astype(jnp.bfloat16), w6_ref[...],
                          preferred_element_type=jnp.float32)
                  + b6_ref[...])                                          # (Bp, 128)


def _vmem_limit_bytes():
    """~3/4 of physical VMEM per generation (48 MiB on v7x, 96 MiB on v5e/v6e)."""
    try:
        cap = int(pltpu.get_tpu_info().vmem_capacity_bytes)
    except Exception:
        cap = 64 * 1024 * 1024
    return max(32 * 1024 * 1024, min((cap * 3) // 4, 100 * 1024 * 1024))


def _choose_point_tile(n, cap):
    """Largest lane-aligned tile <= cap that divides N exactly; else N itself.

    Exact division means no padded points ever reach the max-pool, so no
    masking is needed even with the -inf/deferred-ReLU accumulator."""
    if n % 128 == 0 and n > cap:
        tn = (cap // 128) * 128
        while tn >= 128 and n % tn != 0:
            tn -= 128
        if tn >= 128:
            return tn
    return n


def _pooled_features(x_ncw, conv_params):
    """x_ncw: (B, C, N) f32  ->  pooled global feature (B, 1024) f32."""
    B, C, N = x_ncw.shape
    vmem_limit = _vmem_limit_bytes()
    tn_cap = 2048 if vmem_limit >= (64 * 1024 * 1024) else 1024
    tn = _choose_point_tile(N, tn_cap)
    n_tiles = N // tn

    param_specs = [pl.BlockSpec(p.shape, lambda b, t: (0, 0)) for p in conv_params]

    g = pl.pallas_call(
        stn3d_conv_pool_kernel,
        out_shape=jax.ShapeDtypeStruct((B, NC, CH), jnp.float32),
        grid_spec=pltpu.PrefetchScalarGridSpec(
            num_scalar_prefetch=0,
            grid=(B, n_tiles),
            in_specs=[pl.BlockSpec((1, C, tn), lambda b, t: (b, 0, t))]
                     + param_specs,
            out_specs=pl.BlockSpec((1, NC, CH), lambda b, t: (b, 0, 0)),
        ),
        compiler_params=pltpu.CompilerParams(
            dimension_semantics=("parallel", "arbitrary"),
            vmem_limit_bytes=vmem_limit),
    )(x_ncw, *conv_params)

    # (B, 8, 128) -> (B, 1024): contiguous flatten, channel order preserved.
    return g.reshape(B, 1024)


def _head(g, head_params):
    """g: (B, 1024) f32  ->  (B, 9) f32 (fc1..fc3, bias holds BN fold + iden)."""
    B = g.shape[0]
    Bp = ((B + 7) // 8) * 8            # sublane-align the batch for the matmuls
    if Bp != B:
        g = jnp.pad(g, ((0, Bp - B), (0, 0)))

    param_specs = [pl.BlockSpec(p.shape, lambda i: (0, 0)) for p in head_params]

    out = pl.pallas_call(
        stn3d_head_kernel,
        out_shape=jax.ShapeDtypeStruct((Bp, 128), jnp.float32),
        grid_spec=pltpu.PrefetchScalarGridSpec(
            num_scalar_prefetch=0,
            grid=(1,),
            in_specs=[pl.BlockSpec((Bp, 1024), lambda i: (0, 0))] + param_specs,
            out_specs=pl.BlockSpec((Bp, 128), lambda i: (0, 0)),
        ),
        compiler_params=pltpu.CompilerParams(
            dimension_semantics=("arbitrary",),
            vmem_limit_bytes=_vmem_limit_bytes()),
    )(g, *head_params)

    return out[:B, :9]


@jax.jit
def stn3d_forward(x_ncw, params):
    """x_ncw: (B, C, N) float32 (PyTorch Conv1d layout). Returns (B, 3, 3)."""
    conv_params, head_params = params
    g = _pooled_features(x_ncw, conv_params)
    o9 = _head(g, head_params)
    return o9.reshape(-1, 3, 3)


# -----------------------------------------------------------------------------
# Deterministic parameter construction (synthetic, no checkpoint).
# Conv1d(k=1) weight (out, in, 1) is stored transposed for phase 1 as
# (out, in).  Eval-mode BatchNorm (gamma, beta, running_mean, running_var,
# eps=1e-5) is folded into the preceding affine layer:
#   scale = gamma / sqrt(var + eps);  W' = W * scale;  b' = scale*(b-mean)+beta
# MXU-facing weights (conv2/3, fc1..3) are stored in bf16; conv1 stays f32
# (it runs on the VPU).  b3 is stored lane-dense as (8, 128).
# -----------------------------------------------------------------------------
def make_params(key, channel):
    dims = [(channel, 64), (64, 128), (128, 1024),
            (1024, 512), (512, 256), (256, 9)]
    has_bn = [True, True, True, True, True, False]   # conv1..3, fc1..2; not fc3

    ws, bs = [], []
    keys = jax.random.split(key, len(dims) * 6)
    ki = 0
    for (din, dout), bn in zip(dims, has_bn):
        w = 0.05 * jax.random.normal(keys[ki], (din, dout), jnp.float32); ki += 1
        b = 0.05 * jax.random.normal(keys[ki], (dout,), jnp.float32);     ki += 1
        if bn:
            gamma = 1.0 + 0.1 * jax.random.normal(keys[ki], (dout,), jnp.float32); ki += 1
            beta  = 0.1 * jax.random.normal(keys[ki], (dout,), jnp.float32);       ki += 1
            mean  = 0.1 * jax.random.normal(keys[ki], (dout,), jnp.float32);       ki += 1
            var   = jnp.abs(1.0 + 0.1 * jax.random.normal(keys[ki], (dout,),
                                                          jnp.float32));           ki += 1
            scale = gamma / jnp.sqrt(var + 1e-5)
            w = w * scale[None, :]
            b = scale * (b - mean) + beta
        else:
            ki += 4
        ws.append(w); bs.append(b)

    w1, w2, w3, w4, w5, w6 = ws
    b1, b2, b3, b4, b5, b6 = bs

    # fold the identity matrix add (x + iden) into the fc3 bias, then zero-pad
    # fc3's 9-wide output to 128 lanes for a lane-dense store in the kernel.
    iden = jnp.array([1, 0, 0, 0, 1, 0, 0, 0, 1], jnp.float32)
    b6 = b6 + iden
    w6p = jnp.zeros((256, 128), jnp.float32).at[:, :9].set(w6)
    b6p = jnp.zeros((128,), jnp.float32).at[:9].set(b6)

    conv_params = (
        w1.T,                                   # (64, C)     f32  (VPU FMA layer)
        b1.reshape(64, 1),
        w2.T.astype(jnp.bfloat16),              # (128, 64)   bf16
        b2.reshape(128, 1),
        w3.T.astype(jnp.bfloat16),              # (1024, 128) bf16
        b3.reshape(NC, CH),                     # (8, 128)    f32 (lane-dense, deferred)
    )
    head_params = (
        w4.astype(jnp.bfloat16), b4.reshape(1, 512),
        w5.astype(jnp.bfloat16), b5.reshape(1, 256),
        w6p.astype(jnp.bfloat16), b6p.reshape(1, 128),
    )
    return conv_params, head_params


def stn3d_reference(x_ncw, params):
    """Pure-JAX reference with the same folded params and the same precision
    (bf16 operands / f32 accumulation at the same points as the kernels).
    Note conv3's bias+ReLU commute with the max, so it is written in the
    original (pre-deferral) order."""
    conv_params, head_params = params
    w1t, b1, w2t, b2, w3t, b3 = conv_params
    w4, b4, w5, b5, w6p, b6p = head_params
    b3_flat = b3.reshape(-1)                                      # (1024,)

    x = jnp.transpose(x_ncw, (0, 2, 1)).astype(jnp.float32)      # (B, N, C)
    # conv1 in f32 elementwise (mirrors the kernel's VPU FMA path)
    h1 = jax.nn.relu(jnp.sum(x[..., None] * w1t.T[None, None, :, :], axis=2)
                     + b1[:, 0])                                  # (B, N, 64)
    h2 = jax.nn.relu(
        jnp.einsum('bno,po->bnp', h1.astype(jnp.bfloat16), w2t,
                   preferred_element_type=jnp.float32) + b2[:, 0])  # (B, N, 128)
    h3 = jax.nn.relu(
        jnp.einsum('bnp,qp->bnq', h2.astype(jnp.bfloat16), w3t,
                   preferred_element_type=jnp.float32) + b3_flat)   # (B, N, 1024)
    g = jnp.max(h3, axis=1)                                       # (B, 1024)

    f1 = jax.nn.relu(jnp.dot(g.astype(jnp.bfloat16), w4,
                             preferred_element_type=jnp.float32) + b4)
    f2 = jax.nn.relu(jnp.dot(f1.astype(jnp.bfloat16), w5,
                             preferred_element_type=jnp.float32) + b5)
    o = jnp.dot(f2.astype(jnp.bfloat16), w6p,
                preferred_element_type=jnp.float32) + b6p
    return o[:, :9].reshape(-1, 3, 3)


if __name__ == "__main__":
    B, C, N = 2, 3, 16          # small shapes: batch=2, channels=3, 16 points
    key = jax.random.PRNGKey(0)
    kx, kp = jax.random.split(key)
    x = jax.random.normal(kx, (B, C, N), jnp.float32)   # PyTorch NCW layout
    params = make_params(kp, C)

    out = stn3d_forward(x, params)
    out = jax.block_until_ready(out)

    ref = stn3d_reference(x, params)
    assert out.shape == (B, 3, 3)
    assert jnp.allclose(out, ref, atol=1e-3, rtol=1e-3), "mismatch vs reference"

    print("KERNEL_OK")
</pallas_src>

<mosaic_0001>
module attributes {stable_mosaic.version = 11 : i64} {
  func.func @stn3d_conv_pool_kernel(%arg0: i32, %arg1: i32, %arg2: memref<1x3x16xf32, #tpu.memory_space<vmem>>, %arg3: memref<64x3xf32, #tpu.memory_space<vmem>>, %arg4: memref<64x1xf32, #tpu.memory_space<vmem>>, %arg5: memref<128x64xbf16, #tpu.memory_space<vmem>>, %arg6: memref<128x1xf32, #tpu.memory_space<vmem>>, %arg7: memref<1024x128xbf16, #tpu.memory_space<vmem>>, %arg8: memref<8x128xf32, #tpu.memory_space<vmem>>, %arg9: memref<1x8x128xf32, #tpu.memory_space<vmem>>) attributes {dimension_semantics = [#tpu.dimension_semantics<parallel>, #tpu.dimension_semantics<arbitrary>], iteration_bounds = array<i64: 2, 1>, scalar_prefetch = 0 : i64, scratch_operands = 0 : i64, tpu.core_type = #tpu.core_type<tc>, window_params = [{transform_indices = @transform_0, window_bounds = array<i64: 1, 3, 16>}, {pipeline_mode = #tpu.pipeline_mode<synchronous>, transform_indices = @transform_1, window_bounds = array<i64: 64, 3>}, {pipeline_mode = #tpu.pipeline_mode<synchronous>, transform_indices = @transform_2, window_bounds = array<i64: 64, 1>}, {pipeline_mode = #tpu.pipeline_mode<synchronous>, transform_indices = @transform_3, window_bounds = array<i64: 128, 64>}, {pipeline_mode = #tpu.pipeline_mode<synchronous>, transform_indices = @transform_4, window_bounds = array<i64: 128, 1>}, {pipeline_mode = #tpu.pipeline_mode<synchronous>, transform_indices = @transform_5, window_bounds = array<i64: 1024, 128>}, {pipeline_mode = #tpu.pipeline_mode<synchronous>, transform_indices = @transform_6, window_bounds = array<i64: 8, 128>}, {transform_indices = @transform_7, window_bounds = array<i64: 1, 8, 128>}]} {
    %c0_i32 = arith.constant 0 : i32
    %0 = arith.cmpi eq, %arg1, %c0_i32 : i32
    %1 = arith.extui %0 : i1 to i32
    %c0_i32_0 = arith.constant 0 : i32
    %2 = arith.cmpi ne, %1, %c0_i32_0 : i32
    scf.if %2 {
      %cst_81 = arith.constant 0xFF800000 : f32
      %112 = vector.broadcast %cst_81 : f32 to vector<1x8x128xf32>
      %c0_82 = arith.constant 0 : index
      %c0_83 = arith.constant 0 : index
      %c0_84 = arith.constant 0 : index
      %113 = vector.load %arg9[%c0_82, %c0_83, %c0_84] : memref<1x8x128xf32, #tpu.memory_space<vmem>>, vector<1x8x128xf32>
      tpu.vector_store %arg9[%c0_82, %c0_83, %c0_84], %112 {strides = array<i32>} : memref<1x8x128xf32, #tpu.memory_space<vmem>>, vector<1x8x128xf32>,
    } else {
    }
    %c0 = arith.constant 0 : index
    %c0_1 = arith.constant 0 : index
    %c0_2 = arith.constant 0 : index
    %3 = vector.load %arg2[%c0, %c0_1, %c0_2] : memref<1x3x16xf32, #tpu.memory_space<vmem>>, vector<1x3x16xf32>
    %4 = vector.shape_cast %3 : vector<1x3x16xf32> to vector<3x16xf32>
    %c0_3 = arith.constant 0 : index
    %c0_4 = arith.constant 0 : index
    %5 = vector.load %arg3[%c0_3, %c0_4] : memref<64x3xf32, #tpu.memory_space<vmem>>, vector<64x3xf32>
    %6 = vector.extract_strided_slice %5 {offsets = [0, 0], sizes = [64, 1], strides = [1, 1]} : vector<64x3xf32> to vector<64x1xf32>
    %7 = vector.extract_strided_slice %4 {offsets = [0, 0], sizes = [1, 16], strides = [1, 1]} : vector<3x16xf32> to vector<1x16xf32>
    %8 = vector.broadcast %6 : vector<64x1xf32> to vector<64x16xf32>
    %9 = vector.broadcast %7 : vector<1x16xf32> to vector<64x16xf32>
    %10 = arith.mulf %8, %9 : vector<64x16xf32>
    %11 = vector.extract_strided_slice %5 {offsets = [0, 1], sizes = [64, 1], strides = [1, 1]} : vector<64x3xf32> to vector<64x1xf32>
    %12 = vector.extract_strided_slice %4 {offsets = [1, 0], sizes = [1, 16], strides = [1, 1]} : vector<3x16xf32> to vector<1x16xf32>
    %13 = vector.broadcast %11 : vector<64x1xf32> to vector<64x16xf32>
    %14 = vector.broadcast %12 : vector<1x16xf32> to vector<64x16xf32>
    %15 = arith.mulf %13, %14 : vector<64x16xf32>
    %16 = arith.addf %10, %15 : vector<64x16xf32>
    %17 = vector.extract_strided_slice %5 {offsets = [0, 2], sizes = [64, 1], strides = [1, 1]} : vector<64x3xf32> to vector<64x1xf32>
    %18 = vector.extract_strided_slice %4 {offsets = [2, 0], sizes = [1, 16], strides = [1, 1]} : vector<3x16xf32> to vector<1x16xf32>
    %19 = vector.broadcast %17 : vector<64x1xf32> to vector<64x16xf32>
    %20 = vector.broadcast %18 : vector<1x16xf32> to vector<64x16xf32>
    %21 = arith.mulf %19, %20 : vector<64x16xf32>
    %22 = arith.addf %16, %21 : vector<64x16xf32>
    %c0_5 = arith.constant 0 : index
    %c0_6 = arith.constant 0 : index
    %23 = vector.load %arg4[%c0_5, %c0_6] : memref<64x1xf32, #tpu.memory_space<vmem>>, vector<64x1xf32>
    %24 = vector.broadcast %23 : vector<64x1xf32> to vector<64x16xf32>
    %25 = arith.addf %22, %24 : vector<64x16xf32>
    %cst = arith.constant 0.000000e+00 : f32
    %26 = vector.broadcast %cst : f32 to vector<64x16xf32>
    %27 = arith.maximumf %25, %26 : vector<64x16xf32>
    %c0_7 = arith.constant 0 : index
    %c0_8 = arith.constant 0 : index
    %28 = vector.load %arg5[%c0_7, %c0_8] : memref<128x64xbf16, #tpu.memory_space<vmem>>, vector<128x64xbf16>
    %29 = arith.truncf %27 : vector<64x16xf32> to vector<64x16xbf16>
    %cst_9 = arith.constant dense<0.000000e+00> : vector<128x16xf32>
    %30 = tpu.matmul %28, %29, %cst_9 {dimension_numbers = #tpu.dot_dimension_numbers<[1], [0], [0], [1], [0, 0, 1, 1], [], []>} : vector<128x64xbf16>, vector<64x16xbf16>, vector<128x16xf32> -> vector<128x16xf32>
    %c0_10 = arith.constant 0 : index
    %c0_11 = arith.constant 0 : index
    %31 = vector.load %arg6[%c0_10, %c0_11] : memref<128x1xf32, #tpu.memory_space<vmem>>, vector<128x1xf32>
    %32 = vector.broadcast %31 : vector<128x1xf32> to vector<128x16xf32>
    %33 = arith.addf %30, %32 : vector<128x16xf32>
    %cst_12 = arith.constant 0.000000e+00 : f32
    %34 = vector.broadcast %cst_12 : f32 to vector<128x16xf32>
    %35 = arith.maximumf %33, %34 : vector<128x16xf32>
    %36 = arith.truncf %35 : vector<128x16xf32> to vector<128x16xbf16>
    %c0_13 = arith.constant 0 : index
    %c0_14 = arith.constant 0 : index
    %37 = vector.load %arg7[%c0_13, %c0_14] : memref<1024x128xbf16, #tpu.memory_space<vmem>>, vector<128x128xbf16>
    %cst_15 = arith.constant dense<0.000000e+00> : vector<128x16xf32>
    %38 = tpu.matmul %37, %36, %cst_15 {dimension_numbers = #tpu.dot_dimension_numbers<[1], [0], [0], [1], [0, 0, 1, 1], [], []>} : vector<128x128xbf16>, vector<128x16xbf16>, vector<128x16xf32> -> vector<128x16xf32>
    %cst_16 = arith.constant dense<0xFF800000> : vector<128xf32>
    %39 = vector.multi_reduction <maximumf>, %38, %cst_16 [1] : vector<128x16xf32> to vector<128xf32>
    %c0_17 = arith.constant 0 : index
    %c0_18 = arith.constant 0 : index
    %c0_19 = arith.constant 0 : index
    %40 = vector.load %arg9[%c0_17, %c0_18, %c0_19] : memref<1x8x128xf32, #tpu.memory_space<vmem>>, vector<1x1x128xf32>
    %41 = vector.shape_cast %40 : vector<1x1x128xf32> to vector<128xf32>
    %42 = arith.maximumf %41, %39 : vector<128xf32>
    %c0_20 = arith.constant 0 : index
    %c0_21 = arith.constant 0 : index
    %c0_22 = arith.constant 0 : index
    %43 = vector.load %arg9[%c0_20, %c0_21, %c0_22] : memref<1x8x128xf32, #tpu.memory_space<vmem>>, vector<1x1x128xf32>
    %44 = vector.shape_cast %43 : vector<1x1x128xf32> to vector<128xf32>
    %45 = vector.shape_cast %42 : vector<128xf32> to vector<1x1x128xf32>
    tpu.vector_store %arg9[%c0_20, %c0_21, %c0_22], %45 {strides = array<i32>} : memref<1x8x128xf32, #tpu.memory_space<vmem>>, vector<1x1x128xf32>,
    %c128 = arith.constant 128 : index
    %c0_23 = arith.constant 0 : index
    %46 = vector.load %arg7[%c128, %c0_23] : memref<1024x128xbf16, #tpu.memory_space<vmem>>, vector<128x128xbf16>
    %cst_24 = arith.constant dense<0.000000e+00> : vector<128x16xf32>
    %47 = tpu.matmul %46, %36, %cst_24 {dimension_numbers = #tpu.dot_dimension_numbers<[1], [0], [0], [1], [0, 0, 1, 1], [], []>} : vector<128x128xbf16>, vector<128x16xbf16>, vector<128x16xf32> -> vector<128x16xf32>
    %cst_25 = arith.constant dense<0xFF800000> : vector<128xf32>
    %48 = vector.multi_reduction <maximumf>, %47, %cst_25 [1] : vector<128x16xf32> to vector<128xf32>
    %c0_26 = arith.constant 0 : index
    %c1 = arith.constant 1 : index
    %c0_27 = arith.constant 0 : index
    %49 = vector.load %arg9[%c0_26, %c1, %c0_27] : memref<1x8x128xf32, #tpu.memory_space<vmem>>, vector<1x1x128xf32>
    %50 = vector.shape_cast %49 : vector<1x1x128xf32> to vector<128xf32>
    %51 = arith.maximumf %50, %48 : vector<128xf32>
    %c0_28 = arith.constant 0 : index
    %c1_29 = arith.constant 1 : index
    %c0_30 = arith.constant 0 : index
    %52 = vector.load %arg9[%c0_28, %c1_29, %c0_30] : memref<1x8x128xf32, #tpu.memory_space<vmem>>, vector<1x1x128xf32>
    %53 = vector.shape_cast %52 : vector<1x1x128xf32> to vector<128xf32>
    %54 = vector.shape_cast %51 : vector<128xf32> to vector<1x1x128xf32>
    tpu.vector_store %arg9[%c0_28, %c1_29, %c0_30], %54 {strides = array<i32>} : memref<1x8x128xf32, #tpu.memory_space<vmem>>, vector<1x1x128xf32>,
    %c256 = arith.constant 256 : index
    %c0_31 = arith.constant 0 : index
    %55 = vector.load %arg7[%c256, %c0_31] : memref<1024x128xbf16, #tpu.memory_space<vmem>>, vector<128x128xbf16>
    %cst_32 = arith.constant dense<0.000000e+00> : vector<128x16xf32>
    %56 = tpu.matmul %55, %36, %cst_32 {dimension_numbers = #tpu.dot_dimension_numbers<[1], [0], [0], [1], [0, 0, 1, 1], [], []>} : vector<128x128xbf16>, vector<128x16xbf16>, vector<128x16xf32> -> vector<128x16xf32>
    %cst_33 = arith.constant dense<0xFF800000> : vector<128xf32>
    %57 = vector.multi_reduction <maximumf>, %56, %cst_33 [1] : vector<128x16xf32> to vector<128xf32>
    %c0_34 = arith.constant 0 : index
    %c2 = arith.constant 2 : index
    %c0_35 = arith.constant 0 : index
    %58 = vector.load %arg9[%c0_34, %c2, %c0_35] : memref<1x8x128xf32, #tpu.memory_space<vmem>>, vector<1x1x128xf32>
    %59 = vector.shape_cast %58 : vector<1x1x128xf32> to vector<128xf32>
    %60 = arith.maximumf %59, %57 : vector<128xf32>
    %c0_36 = arith.constant 0 : index
    %c2_37 = arith.constant 2 : index
    %c0_38 = arith.constant 0 : index
    %61 = vector.load %arg9[%c0_36, %c2_37, %c0_38] : memref<1x8x128xf32, #tpu.memory_space<vmem>>, vector<1x1x128xf32>
    %62 = vector.shape_cast %61 : vector<1x1x128xf32> to vector<128xf32>
    %63 = vector.shape_cast %60 : vector<128xf32> to vector<1x1x128xf32>
    tpu.vector_store %arg9[%c0_36, %c2_37, %c0_38], %63 {strides = array<i32>} : memref<1x8x128xf32, #tpu.memory_space<vmem>>, vector<1x1x128xf32>,
    %c384 = arith.constant 384 : index
    %c0_39 = arith.constant 0 : index
    %64 = vector.load %arg7[%c384, %c0_39] : memref<1024x128xbf16, #tpu.memory_space<vmem>>, vector<128x128xbf16>
    %cst_40 = arith.constant dense<0.000000e+00> : vector<128x16xf32>
    %65 = tpu.matmul %64, %36, %cst_40 {dimension_numbers = #tpu.dot_dimension_numbers<[1], [0], [0], [1], [0, 0, 1, 1], [], []>} : vector<128x128xbf16>, vector<128x16xbf16>, vector<128x16xf32> -> vector<128x16xf32>
    %cst_41 = arith.constant dense<0xFF800000> : vector<128xf32>
    %66 = vector.multi_reduction <maximumf>, %65, %cst_41 [1] : vector<128x16xf32> to vector<128xf32>
    %c0_42 = arith.constant 0 : index
    %c3 = arith.constant 3 : index
    %c0_43 = arith.constant 0 : index
    %67 = vector.load %arg9[%c0_42, %c3, %c0_43] : memref<1x8x128xf32, #tpu.memory_space<vmem>>, vector<1x1x128xf32>
    %68 = vector.shape_cast %67 : vector<1x1x128xf32> to vector<128xf32>
    %69 = arith.maximumf %68, %66 : vector<128xf32>
    %c0_44 = arith.constant 0 : index
    %c3_45 = arith.constant 3 : index
    %c0_46 = arith.constant 0 : index
    %70 = vector.load %arg9[%c0_44, %c3_45, %c0_46] : memref<1x8x128xf32, #tpu.memory_space<vmem>>, vector<1x1x128xf32>
    %71 = vector.shape_cast %70 : vector<1x1x128xf32> to vector<128xf32>
    %72 = vector.shape_cast %69 : vector<128xf32> to vector<1x1x128xf32>
    tpu.vector_store %arg9[%c0_44, %c3_45, %c0_46], %72 {strides = array<i32>} : memref<1x8x128xf32, #tpu.memory_space<vmem>>, vector<1x1x128xf32>,
    %c512 = arith.constant 512 : index
    %c0_47 = arith.constant 0 : index
    %73 = vector.load %arg7[%c512, %c0_47] : memref<1024x128xbf16, #tpu.memory_space<vmem>>, vector<128x128xbf16>
    %cst_48 = arith.constant dense<0.000000e+00> : vector<128x16xf32>
    %74 = tpu.matmul %73, %36, %cst_48 {dimension_numbers = #tpu.dot_dimension_numbers<[1], [0], [0], [1], [0, 0, 1, 1], [], []>} : vector<128x128xbf16>, vector<128x16xbf16>, vector<128x16xf32> -> vector<128x16xf32>
    %cst_49 = arith.constant dense<0xFF800000> : vector<128xf32>
    %75 = vector.multi_reduction <maximumf>, %74, %cst_49 [1] : vector<128x16xf32> to vector<128xf32>
    %c0_50 = arith.constant 0 : index
    %c4 = arith.constant 4 : index
    %c0_51 = arith.constant 0 : index
    %76 = vector.load %arg9[%c0_50, %c4, %c0_51] : memref<1x8x128xf32, #tpu.memory_space<vmem>>, vector<1x1x128xf32>
    %77 = vector.shape_cast %76 : vector<1x1x128xf32> to vector<128xf32>
    %78 = arith.maximumf %77, %75 : vector<128xf32>
    %c0_52 = arith.constant 0 : index
    %c4_53 = arith.constant 4 : index
    %c0_54 = arith.constant 0 : index
    %79 = vector.load %arg9[%c0_52, %c4_53, %c0_54] : memref<1x8x128xf32, #tpu.memory_space<vmem>>, vector<1x1x128xf32>
    %80 = vector.shape_cast %79 : vector<1x1x128xf32> to vector<128xf32>
    %81 = vector.shape_cast %78 : vector<128xf32> to vector<1x1x128xf32>
    tpu.vector_store %arg9[%c0_52, %c4_53, %c0_54], %81 {strides = array<i32>} : memref<1x8x128xf32, #tpu.memory_space<vmem>>, vector<1x1x128xf32>,
    %c640 = arith.constant 640 : index
    %c0_55 = arith.constant 0 : index
    %82 = vector.load %arg7[%c640, %c0_55] : memref<1024x128xbf16, #tpu.memory_space<vmem>>, vector<128x128xbf16>
    %cst_56 = arith.constant dense<0.000000e+00> : vector<128x16xf32>
    %83 = tpu.matmul %82, %36, %cst_56 {dimension_numbers = #tpu.dot_dimension_numbers<[1], [0], [0], [1], [0, 0, 1, 1], [], []>} : vector<128x128xbf16>, vector<128x16xbf16>, vector<128x16xf32> -> vector<128x16xf32>
    %cst_57 = arith.constant dense<0xFF800000> : vector<128xf32>
    %84 = vector.multi_reduction <maximumf>, %83, %cst_57 [1] : vector<128x16xf32> to vector<128xf32>
    %c0_58 = arith.constant 0 : index
    %c5 = arith.constant 5 : index
    %c0_59 = arith.constant 0 : index
    %85 = vector.load %arg9[%c0_58, %c5, %c0_59] : memref<1x8x128xf32, #tpu.memory_space<vmem>>, vector<1x1x128xf32>
    %86 = vector.shape_cast %85 : vector<1x1x128xf32> to vector<128xf32>
    %87 = arith.maximumf %86, %84 : vector<128xf32>
    %c0_60 = arith.constant 0 : index
    %c5_61 = arith.constant 5 : index
    %c0_62 = arith.constant 0 : index
    %88 = vector.load %arg9[%c0_60, %c5_61, %c0_62] : memref<1x8x128xf32, #tpu.memory_space<vmem>>, vector<1x1x128xf32>
    %89 = vector.shape_cast %88 : vector<1x1x128xf32> to vector<128xf32>
    %90 = vector.shape_cast %87 : vector<128xf32> to vector<1x1x128xf32>
    tpu.vector_store %arg9[%c0_60, %c5_61, %c0_62], %90 {strides = array<i32>} : memref<1x8x128xf32, #tpu.memory_space<vmem>>, vector<1x1x128xf32>,
    %c768 = arith.constant 768 : index
    %c0_63 = arith.constant 0 : index
    %91 = vector.load %arg7[%c768, %c0_63] : memref<1024x128xbf16, #tpu.memory_space<vmem>>, vector<128x128xbf16>
    %cst_64 = arith.constant dense<0.000000e+00> : vector<128x16xf32>
    %92 = tpu.matmul %91, %36, %cst_64 {dimension_numbers = #tpu.dot_dimension_numbers<[1], [0], [0], [1], [0, 0, 1, 1], [], []>} : vector<128x128xbf16>, vector<128x16xbf16>, vector<128x16xf32> -> vector<128x16xf32>
    %cst_65 = arith.constant dense<0xFF800000> : vector<128xf32>
    %93 = vector.multi_reduction <maximumf>, %92, %cst_65 [1] : vector<128x16xf32> to vector<128xf32>
    %c0_66 = arith.constant 0 : index
    %c6 = arith.constant 6 : index
    %c0_67 = arith.constant 0 : index
    %94 = vector.load %arg9[%c0_66, %c6, %c0_67] : memref<1x8x128xf32, #tpu.memory_space<vmem>>, vector<1x1x128xf32>
    %95 = vector.shape_cast %94 : vector<1x1x128xf32> to vector<128xf32>
    %96 = arith.maximumf %95, %93 : vector<128xf32>
    %c0_68 = arith.constant 0 : index
    %c6_69 = arith.constant 6 : index
    %c0_70 = arith.constant 0 : index
    %97 = vector.load %arg9[%c0_68, %c6_69, %c0_70] : memref<1x8x128xf32, #tpu.memory_space<vmem>>, vector<1x1x128xf32>
    %98 = vector.shape_cast %97 : vector<1x1x128xf32> to vector<128xf32>
    %99 = vector.shape_cast %96 : vector<128xf32> to vector<1x1x128xf32>
    tpu.vector_store %arg9[%c0_68, %c6_69, %c0_70], %99 {strides = array<i32>} : memref<1x8x128xf32, #tpu.memory_space<vmem>>, vector<1x1x128xf32>,
    %c896 = arith.constant 896 : index
    %c0_71 = arith.constant 0 : index
    %100 = vector.load %arg7[%c896, %c0_71] : memref<1024x128xbf16, #tpu.memory_space<vmem>>, vector<128x128xbf16>
    %cst_72 = arith.constant dense<0.000000e+00> : vector<128x16xf32>
    %101 = tpu.matmul %100, %36, %cst_72 {dimension_numbers = #tpu.dot_dimension_numbers<[1], [0], [0], [1], [0, 0, 1, 1], [], []>} : vector<128x128xbf16>, vector<128x16xbf16>, vector<128x16xf32> -> vector<128x16xf32>
    %cst_73 = arith.constant dense<0xFF800000> : vector<128xf32>
    %102 = vector.multi_reduction <maximumf>, %101, %cst_73 [1] : vector<128x16xf32> to vector<128xf32>
    %c0_74 = arith.constant 0 : index
    %c7 = arith.constant 7 : index
    %c0_75 = arith.constant 0 : index
    %103 = vector.load %arg9[%c0_74, %c7, %c0_75] : memref<1x8x128xf32, #tpu.memory_space<vmem>>, vector<1x1x128xf32>
    %104 = vector.shape_cast %103 : vector<1x1x128xf32> to vector<128xf32>
    %105 = arith.maximumf %104, %102 : vector<128xf32>
    %c0_76 = arith.constant 0 : index
    %c7_77 = arith.constant 7 : index
    %c0_78 = arith.constant 0 : index
    %106 = vector.load %arg9[%c0_76, %c7_77, %c0_78] : memref<1x8x128xf32, #tpu.memory_space<vmem>>, vector<1x1x128xf32>
    %107 = vector.shape_cast %106 : vector<1x1x128xf32> to vector<128xf32>
    %108 = vector.shape_cast %105 : vector<128xf32> to vector<1x1x128xf32>
    tpu.vector_store %arg9[%c0_76, %c7_77, %c0_78], %108 {strides = array<i32>} : memref<1x8x128xf32, #tpu.memory_space<vmem>>, vector<1x1x128xf32>,
    %c0_i32_79 = arith.constant 0 : i32
    %109 = arith.cmpi eq, %arg1, %c0_i32_79 : i32
    %110 = arith.extui %109 : i1 to i32
    %c0_i32_80 = arith.constant 0 : i32
    %111 = arith.cmpi ne, %110, %c0_i32_80 : i32
    scf.if %111 {
      %c0_81 = arith.constant 0 : index
      %c0_82 = arith.constant 0 : index
      %c0_83 = arith.constant 0 : index
      %112 = vector.load %arg9[%c0_81, %c0_82, %c0_83] : memref<1x8x128xf32, #tpu.memory_space<vmem>>, vector<1x8x128xf32>
      %113 = vector.shape_cast %112 : vector<1x8x128xf32> to vector<8x128xf32>
      %c0_84 = arith.constant 0 : index
      %c0_85 = arith.constant 0 : index
      %114 = vector.load %arg8[%c0_84, %c0_85] : memref<8x128xf32, #tpu.memory_space<vmem>>, vector<8x128xf32>
      %115 = arith.addf %113, %114 : vector<8x128xf32>
      %cst_86 = arith.constant 0.000000e+00 : f32
      %116 = vector.broadcast %cst_86 : f32 to vector<8x128xf32>
      %117 = arith.maximumf %115, %116 : vector<8x128xf32>
      %c0_87 = arith.constant 0 : index
      %c0_88 = arith.constant 0 : index
      %c0_89 = arith.constant 0 : index
      %118 = vector.load %arg9[%c0_87, %c0_88, %c0_89] : memref<1x8x128xf32, #tpu.memory_space<vmem>>, vector<1x8x128xf32>
      %119 = vector.shape_cast %118 : vector<1x8x128xf32> to vector<8x128xf32>
      %120 = vector.shape_cast %117 : vector<8x128xf32> to vector<1x8x128xf32>
      tpu.vector_store %arg9[%c0_87, %c0_88, %c0_89], %120 {strides = array<i32>} : memref<1x8x128xf32, #tpu.memory_space<vmem>>, vector<1x8x128xf32>,
    } else {
    }
    return
  }
  func.func @transform_0(%arg0: i32, %arg1: i32) -> (i32, i32, i32) {
    %c0_i32 = arith.constant 0 : i32
    %c0_i32_0 = arith.constant 0 : i32
    return %arg0, %c0_i32, %arg1 : i32, i32, i32
  }
  func.func @transform_1(%arg0: i32, %arg1: i32) -> (i32, i32) {
    %c0_i32 = arith.constant 0 : i32
    %c0_i32_0 = arith.constant 0 : i32
    %c0_i32_1 = arith.constant 0 : i32
    return %c0_i32, %c0_i32_0 : i32, i32
  }
  func.func @transform_2(%arg0: i32, %arg1: i32) -> (i32, i32) {
    %c0_i32 = arith.constant 0 : i32
    %c0_i32_0 = arith.constant 0 : i32
    %c0_i32_1 = arith.constant 0 : i32
    return %c0_i32, %c0_i32_0 : i32, i32
  }
  func.func @transform_3(%arg0: i32, %arg1: i32) -> (i32, i32) {
    %c0_i32 = arith.constant 0 : i32
    %c0_i32_0 = arith.constant 0 : i32
    %c0_i32_1 = arith.constant 0 : i32
    return %c0_i32, %c0_i32_0 : i32, i32
  }
  func.func @transform_4(%arg0: i32, %arg1: i32) -> (i32, i32) {
    %c0_i32 = arith.constant 0 : i32
    %c0_i32_0 = arith.constant 0 : i32
    %c0_i32_1 = arith.constant 0 : i32
    return %c0_i32, %c0_i32_0 : i32, i32
  }
  func.func @transform_5(%arg0: i32, %arg1: i32) -> (i32, i32) {
    %c0_i32 = arith.constant 0 : i32
    %c0_i32_0 = arith.constant 0 : i32
    %c0_i32_1 = arith.constant 0 : i32
    return %c0_i32, %c0_i32_0 : i32, i32
  }
  func.func @transform_6(%arg0: i32, %arg1: i32) -> (i32, i32) {
    %c0_i32 = arith.constant 0 : i32
    %c0_i32_0 = arith.constant 0 : i32
    %c0_i32_1 = arith.constant 0 : i32
    return %c0_i32, %c0_i32_0 : i32, i32
  }
  func.func @transform_7(%arg0: i32, %arg1: i32) -> (i32, i32, i32) {
    %c0_i32 = arith.constant 0 : i32
    %c0_i32_0 = arith.constant 0 : i32
    %c0_i32_1 = arith.constant 0 : i32
    return %arg0, %c0_i32, %c0_i32_0 : i32, i32, i32
  }
}

module attributes {stable_mosaic.version = 11 : i64} {
  func.func @stn3d_head_kernel(%arg0: i32, %arg1: memref<8x1024xf32, #tpu.memory_space<vmem>>, %arg2: memref<1024x512xbf16, #tpu.memory_space<vmem>>, %arg3: memref<1x512xf32, #tpu.memory_space<vmem>>, %arg4: memref<512x256xbf16, #tpu.memory_space<vmem>>, %arg5: memref<1x256xf32, #tpu.memory_space<vmem>>, %arg6: memref<256x128xbf16, #tpu.memory_space<vmem>>, %arg7: memref<1x128xf32, #tpu.memory_space<vmem>>, %arg8: memref<8x128xf32, #tpu.memory_space<vmem>>) attributes {dimension_semantics = [#tpu.dimension_semantics<arbitrary>], iteration_bounds = array<i64: 1>, scalar_prefetch = 0 : i64, scratch_operands = 0 : i64, tpu.core_type = #tpu.core_type<tc>, window_params = [{pipeline_mode = #tpu.pipeline_mode<synchronous>, transform_indices = @transform_0, window_bounds = array<i64: 8, 1024>}, {pipeline_mode = #tpu.pipeline_mode<synchronous>, transform_indices = @transform_1, window_bounds = array<i64: 1024, 512>}, {pipeline_mode = #tpu.pipeline_mode<synchronous>, transform_indices = @transform_2, window_bounds = array<i64: 1, 512>}, {pipeline_mode = #tpu.pipeline_mode<synchronous>, transform_indices = @transform_3, window_bounds = array<i64: 512, 256>}, {pipeline_mode = #tpu.pipeline_mode<synchronous>, transform_indices = @transform_4, window_bounds = array<i64: 1, 256>}, {pipeline_mode = #tpu.pipeline_mode<synchronous>, transform_indices = @transform_5, window_bounds = array<i64: 256, 128>}, {pipeline_mode = #tpu.pipeline_mode<synchronous>, transform_indices = @transform_6, window_bounds = array<i64: 1, 128>}, {pipeline_mode = #tpu.pipeline_mode<synchronous>, transform_indices = @transform_7, window_bounds = array<i64: 8, 128>}]} {
    %c0 = arith.constant 0 : index
    %c0_0 = arith.constant 0 : index
    %0 = vector.load %arg1[%c0, %c0_0] : memref<8x1024xf32, #tpu.memory_space<vmem>>, vector<8x1024xf32>
    %1 = arith.truncf %0 : vector<8x1024xf32> to vector<8x1024xbf16>
    %c0_1 = arith.constant 0 : index
    %c0_2 = arith.constant 0 : index
    %2 = vector.load %arg2[%c0_1, %c0_2] : memref<1024x512xbf16, #tpu.memory_space<vmem>>, vector<1024x512xbf16>
    %cst = arith.constant dense<0.000000e+00> : vector<8x512xf32>
    %3 = tpu.matmul %1, %2, %cst {dimension_numbers = #tpu.dot_dimension_numbers<[1], [0], [0], [1], [0, 0, 1, 1], [], []>} : vector<8x1024xbf16>, vector<1024x512xbf16>, vector<8x512xf32> -> vector<8x512xf32>
    %c0_3 = arith.constant 0 : index
    %c0_4 = arith.constant 0 : index
    %4 = vector.load %arg3[%c0_3, %c0_4] : memref<1x512xf32, #tpu.memory_space<vmem>>, vector<1x512xf32>
    %5 = vector.broadcast %4 : vector<1x512xf32> to vector<8x512xf32>
    %6 = arith.addf %3, %5 : vector<8x512xf32>
    %cst_5 = arith.constant 0.000000e+00 : f32
    %7 = vector.broadcast %cst_5 : f32 to vector<8x512xf32>
    %8 = arith.maximumf %6, %7 : vector<8x512xf32>
    %9 = arith.truncf %8 : vector<8x512xf32> to vector<8x512xbf16>
    %c0_6 = arith.constant 0 : index
    %c0_7 = arith.constant 0 : index
    %10 = vector.load %arg4[%c0_6, %c0_7] : memref<512x256xbf16, #tpu.memory_space<vmem>>, vector<512x256xbf16>
    %cst_8 = arith.constant dense<0.000000e+00> : vector<8x256xf32>
    %11 = tpu.matmul %9, %10, %cst_8 {dimension_numbers = #tpu.dot_dimension_numbers<[1], [0], [0], [1], [0, 0, 1, 1], [], []>} : vector<8x512xbf16>, vector<512x256xbf16>, vector<8x256xf32> -> vector<8x256xf32>
    %c0_9 = arith.constant 0 : index
    %c0_10 = arith.constant 0 : index
    %12 = vector.load %arg5[%c0_9, %c0_10] : memref<1x256xf32, #tpu.memory_space<vmem>>, vector<1x256xf32>
    %13 = vector.broadcast %12 : vector<1x256xf32> to vector<8x256xf32>
    %14 = arith.addf %11, %13 : vector<8x256xf32>
    %cst_11 = arith.constant 0.000000e+00 : f32
    %15 = vector.broadcast %cst_11 : f32 to vector<8x256xf32>
    %16 = arith.maximumf %14, %15 : vector<8x256xf32>
    %17 = arith.truncf %16 : vector<8x256xf32> to vector<8x256xbf16>
    %c0_12 = arith.constant 0 : index
    %c0_13 = arith.constant 0 : index
    %18 = vector.load %arg6[%c0_12, %c0_13] : memref<256x128xbf16, #tpu.memory_space<vmem>>, vector<256x128xbf16>
    %cst_14 = arith.constant dense<0.000000e+00> : vector<8x128xf32>
    %19 = tpu.matmul %17, %18, %cst_14 {dimension_numbers = #tpu.dot_dimension_numbers<[1], [0], [0], [1], [0, 0, 1, 1], [], []>} : vector<8x256xbf16>, vector<256x128xbf16>, vector<8x128xf32> -> vector<8x128xf32>
    %c0_15 = arith.constant 0 : index
    %c0_16 = arith.constant 0 : index
    %20 = vector.load %arg7[%c0_15, %c0_16] : memref<1x128xf32, #tpu.memory_space<vmem>>, vector<1x128xf32>
    %21 = vector.broadcast %20 : vector<1x128xf32> to vector<8x128xf32>
    %22 = arith.addf %19, %21 : vector<8x128xf32>
    %c0_17 = arith.constant 0 : index
    %c0_18 = arith.constant 0 : index
    %23 = vector.load %arg8[%c0_17, %c0_18] : memref<8x128xf32, #tpu.memory_space<vmem>>, vector<8x128xf32>
    tpu.vector_store %arg8[%c0_17, %c0_18], %22 {strides = array<i32>} : memref<8x128xf32, #tpu.memory_space<vmem>>, vector<8x128xf32>,
    return
  }
  func.func @transform_0(%arg0: i32) -> (i32, i32) {
    %c0_i32 = arith.constant 0 : i32
    %c0_i32_0 = arith.constant 0 : i32
    %c0_i32_1 = arith.constant 0 : i32
    return %c0_i32, %c0_i32_0 : i32, i32
  }
  func.func @transform_1(%arg0: i32) -> (i32, i32) {
    %c0_i32 = arith.constant 0 : i32
    %c0_i32_0 = arith.constant 0 : i32
    %c0_i32_1 = arith.constant 0 : i32
    return %c0_i32, %c0_i32_0 : i32, i32
  }
  func.func @transform_2(%arg0: i32) -> (i32, i32) {
    %c0_i32 = arith.constant 0 : i32
    %c0_i32_0 = arith.constant 0 : i32
    %c0_i32_1 = arith.constant 0 : i32
    return %c0_i32, %c0_i32_0 : i32, i32
  }
  func.func @transform_3(%arg0: i32) -> (i32, i32) {
    %c0_i32 = arith.constant 0 : i32
    %c0_i32_0 = arith.constant 0 : i32
    %c0_i32_1 = arith.constant 0 : i32
    return %c0_i32, %c0_i32_0 : i32, i32
  }
  func.func @transform_4(%arg0: i32) -> (i32, i32) {
    %c0_i32 = arith.constant 0 : i32
    %c0_i32_0 = arith.constant 0 : i32
    %c0_i32_1 = arith.constant 0 : i32
    return %c0_i32, %c0_i32_0 : i32, i32
  }
  func.func @transform_5(%arg0: i32) -> (i32, i32) {
    %c0_i32 = arith.constant 0 : i32
    %c0_i32_0 = arith.constant 0 : i32
    %c0_i32_1 = arith.constant 0 : i32
    return %c0_i32, %c0_i32_0 : i32, i32
  }
  func.func @transform_6(%arg0: i32) -> (i32, i32) {
    %c0_i32 = arith.constant 0 : i32
    %c0_i32_0 = arith.constant 0 : i32
    %c0_i32_1 = arith.constant 0 : i32
    return %c0_i32, %c0_i32_0 : i32, i32
  }
  func.func @transform_7(%arg0: i32) -> (i32, i32) {
    %c0_i32 = arith.constant 0 : i32
    %c0_i32_0 = arith.constant 0 : i32
    %c0_i32_1 = arith.constant 0 : i32
    return %c0_i32, %c0_i32_0 : i32, i32
  }
}

</mosaic_0001>

<bundles_post_ra>
// kernel: stn3d_forward.2
= control target key start
LH: loop header
LB: loop body
LE: loop exit
PB: predicated region body
PF: predicated region fallthrough
CT: control target
= control target key end

     0   :  { %12 = vsyncpa [#allocation3], 0  ;;  %s4187_s24 = smov 0   ;;  %s4189_s25 = smov 0   ;;  %s5192_s0 = inlined_call_operand.vmem [shape: f32[2,3,16], index: 0, kind: input, shape index: {}]   ;;  %s5193_s1 = inlined_call_operand.vmem [shape: f32[64,3], index: 1, kind: input, shape index: {}]   ;;  %s5194_s2 = inlined_call_operand.vmem [shape: f32[64,1], index: 2, kind: input, shape index: {}]   ;;  %s5195_s3 = inlined_call_operand.vmem [shape: bf16[128,64], index: 3, kind: input, shape index: {}]   ;;  %s5196_s4 = inlined_call_operand.vmem [shape: f32[128,1], index: 4, kind: input, shape index: {}]   ;;  %s5197_s5 = inlined_call_operand.hbm [shape: bf16[1024,128], index: 5, kind: input, shape index: {}]   ;;  %s5198_s6 = inlined_call_operand.vmem [shape: f32[8,128], index: 6, kind: input, shape index: {}]   ;;  %s5199_s7 = inlined_call_operand.vmem [shape: f32[2,8,128], index: 7, kind: output, shape index: {}]  }
   0x1   :  { %s4191_s26 = smov 0  }
   0x2 LB: > { %s3431_s27 = sadd.s32 4294967295, %s4138_s26   ;;  %s30_s28 = sadd.s32 1, %s4134_s25  ;;  %s4138_s26 = sphi %s4191_s26, %s18_s26   ;;  %s4134_s25 = sphi %s4189_s25, %s5203_s25   ;;  %s4130_s24 = sphi %s4187_s24, %s5202_s24  }
   0x3   : > { %p32_p0 = scmp.ge.s32.totalorder %s30_s28, 2  ;;  %p3433_p1 = scmp.ge.s32.totalorder %s4138_s26, 1 }
   0x4   : > { %p215_p2 = scmp.lt.s32.totalorder %s4138_s26, 3  ;;  %p4212_p4 = scmp.eq.s32.totalorder %s3431_s27, 0 }
   0x5   : > { %s5205_s28 = smov (%p32_p0, %s30_s28), 0  ;;  %s4140_s8 = smov [#allocation2]  }
   0x6   : > { %p4208_p3 = pnand %p3433_p1, %p215_p2  ;;  %s239_s9 = sshll.u32 %s4140_s8, 4  ;;  %s240_s9 = int_to_ptr.vmem [resolvable:$true] %s239_s9 }
   0x7   : > { %s4097_s10 = scalar_lea.vmem %s240_s9, 8192  ;;  %p4105_p11 = scmp.lt.s32.totalorder %s240_s9, %s240_s9 }
   0x8   : > { %p3962_p5 = pneg %p4208_p3  ;;  %p4098_p8 = scmp.ne.s32.totalorder %s240_s9, %s4097_s10 }
   0x9   : > { %p4106_p12 = scmp.lt.s32.totalorder %s4097_s10, %s4097_s10 }
   0xa   : > { %p3963_p6 = pnand %p4212_p4, %p3962_p5 }
   0xb   : > { %p4107_p13 = por %p4106_p12, %p4105_p11 }
   0xc   : > { %p4088_p7 = pneg %p3963_p6 }
   0xe   : > { %p4100_p9 = pnand %p4098_p8, %p4088_p7 }
  0x10   : > { %p4101_p10 = pneg %p4100_p9 }
  0x12   : > { %p4108_p0 = pnand %p4107_p13, %p4101_p10 }
  0x14   : > { %4111 = shalt.err (!%p4108_p0)
}
  0x15   : > { %s4141_s11 = smov 64   ;;  %s4142_s12 = smov 4  }
  0x16   : > { %3965 = dma.hbm_to_vmem [thread:$0]  (!%p3963_p6), %s5197_s5, 8192, %s240_s9, [#allocation3], %s4141_s11, %s4141_s11, %s4142_s12  }
  0x17   : > { %268 = sbr.rel (%p4208_p3) target bundleno = 1115 (0x45b), region = 48 }
  0x1c   : > { %4125 = dma.done.wait (%p4212_p4), [#allocation3], 8192  }
  0x1d   : > { %4127 = vsyncadd (%p4212_p4), [#allocation3], 4294959104  ;;  %v4143_v0 = vmov 2   ;;  %v4144_v1 = vmov 1   ;;  %v325_v2 = vld [vmem:[%s5193_s1 + $0x30] sm:$0xff]  ;;  %v326_v3 = vld [vmem:[%s5193_s1 + $0x38] sm:$0xff]  ;;  %v367_v42 = vlaneseq }
  0x1e   : > { %4000 = vset.pattern.permute.xlu0 %v4143_v0  ;;  %3999 = vset.pattern.permute.xlu1 %v4144_v1  ;;  %v323_v4 = vld [vmem:[%s5193_s1 + $0x20] sm:$0xff]  ;;  %v322_v5 = vld [vmem:[%s5193_s1 + $0x18] sm:$0xff]  ;;  %v321_v6 = vld [vmem:[%s5193_s1 + $0x10] sm:$0xff]  ;;  %v4145_v8 = vmov 0   ;;  %vm703_vm0 = vcmask 523264   ;;  %p301_p1 = scmp.lt.s32.totalorder %s4130_s24, 1 }
  0x1f   : > { %456 = vperm.xlu0 %4000, %v325_v2   ;;  %404 = vperm.xlu1 %3999, %v325_v2   ;;  %v320_v7 = vld [vmem:[%s5193_s1 + $0x8] sm:$0xff]  ;;  %v489_v10 = vld [vmem:[%s5194_s2 + $0x30] sm:$0xff]  ;;  %v490_v11 = vld [vmem:[%s5194_s2 + $0x38] sm:$0xff]  ;;  %v4347_v44 = vshrl.u32 %v367_v42, 7  ;;  %vm1010_vm1 = vcmask 130048   ;;  %vm1087_vm2 = vcmask 130112  }
  0x20   : > { %v324_v9 = vld [vmem:[%s5193_s1 + $0x28] sm:$0xff]  ;;  %v319_v12 = vld [vmem:[%s5193_s1] sm:$0xff]  ;;  %v485_v13 = vld [vmem:[%s5194_s2 + $0x10] sm:$0xff]  ;;  %s5207_s24 = smov (!%p301_p1, %s4130_s24), 1  ;;  %vm1094_vm3 = vcmask 195712   ;;  %vm1101_vm4 = vcmask 261312  }
  0x21   : > { %v484_v14 = vld [vmem:[%s5194_s2 + $0x8] sm:$0xff]  ;;  %v582_v15 = vld [vmem:[%s5196_s4 + $0x78] sm:$0xff]  ;;  %v487_v17 = vld [vmem:[%s5194_s2 + $0x20] sm:$0xff]  ;;  %s3438_s27 = sshll.u32 %s5207_s24, 2  ;;  %v413_v47 = vsub.s32 1, %v4347_v44  ;;  %v369_v48 = vsub.s32 0, %v4347_v44 }
  0x22   : > { %v580_v16 = vld [vmem:[%s5196_s4 + $0x68] sm:$0xff]  ;;  %v578_v18 = vld [vmem:[%s5196_s4 + $0x58] sm:$0xff]  ;;  %v483_v26 = vld [vmem:[%s5194_s2] sm:$0xff]  ;;  %s307_s8 = scalar_lea.vmem %s5192_s0, %s3438_s27  ;;  %v465_v52 = vsub.s32 2, %v4347_v44  ;;  %s3439_s23 = sshll.u32 %s5207_s24, 3  ;;  %vm1108_vm5 = vcmask 326912  }
  0x23   : > { %408 = vperm.xlu1 %3999, %v326_v3   ;;  %448 = vperm.xlu0 %4000, %v323_v4   ;;  %v488_v19 = vld [vmem:[%s5194_s2 + $0x28] sm:$0xff]  ;;  %v574_v21 = vld [vmem:[%s5196_s4 + $0x38] sm:$0xff]  ;;  %v581_v27 = vld [vmem:[%s5196_s4 + $0x70] sm:$0xff]  ;;  %s4625_s30 = scalar_lea.vmem %s5199_s7, %s3439_s23  ;;  %vm1115_vm6 = vcmask 392512   ;;  %vm1122_vm7 = vcmask 458112   ;;  %vm1129_vm8 = vcmask 523712  }
  0x24   : > { %v576_v20 = vld [vmem:[%s5196_s4 + $0x48] sm:$0xff]  ;;  %v570_v23 = vld [vmem:[%s5196_s4 + $0x18] sm:$0xff]  ;;  %v4014_v28 = vld [vmem:[%s5195_s3] sm:$0xff]   ;;  %vm1136_vm9 = vcmask 589312   ;;  %vm1143_vm10 = vcmask 654912   ;;  %vm1150_vm11 = vcmask 720512  }
  0x25   : > { %v572_v22 = vld [vmem:[%s5196_s4 + $0x28] sm:$0xff]  ;;  %v486_v25 = vld [vmem:[%s5194_s2 + $0x18] sm:$0xff]  ;;  %v579_v29 = vld [vmem:[%s5196_s4 + $0x60] sm:$0xff]  ;;  %3670 = vmatprep.mubr.msk.bf16.mxu0 %vm703_vm0, %v4014_v28  ;;  %vm1157_vm12 = vcmask 786112   ;;  %vm1164_vm13 = vcmask 851712   ;;  %vm1171_vm14 = vcmask 917312  }
  0x26   : > { %v568_v24 = vld [vmem:[%s5196_s4 + $0x8] sm:$0xff]  ;;  %v577_v30 = vld [vmem:[%s5196_s4 + $0x50] sm:$0xff]  ;;  %v575_v31 = vld [vmem:[%s5196_s4 + $0x40] sm:$0xff]  ;;  %vm1178_vm15 = vcmask 982912  }
  0x27   : > { %4001 = vset.pattern.permute.xlu1 %v4143_v0  ;;  %444 = vperm.xlu0 %4000, %v322_v5   ;;  %v573_v32 = vld [vmem:[%s5196_s4 + $0x30] sm:$0xff]  ;;  %v571_v33 = vld [vmem:[%s5196_s4 + $0x20] sm:$0xff] }
  0x28   : > { %460 = vperm.xlu1 %4001, %v326_v3   ;;  %v569_v34 = vld [vmem:[%s5196_s4 + $0x10] sm:$0xff]  ;;  %v567_v35 = vld [vmem:[%s5196_s4] sm:$0xff] }
  0x29   : > { %v318_v49 = vld [vmem:[%s307_s8] sm:$0x7] }
  0x2a   : > { %v4356_v51 = vrot.slane %v318_v49, %v413_v47  ;;  %v4359_v53 = vrot.slane %v318_v49, %v369_v48  ;;  %v4363_v58 = vrot.slane %v318_v49, %v465_v52 }
  0x2b   : > { %4008 = vset.pattern.permute.xlu0 %v4144_v1 }
  0x2c   : > { %4002 = vset.pattern.permute.xlu1 %v4145_v8  ;;  %388 = vperm.xlu0 %4008, %v321_v6  }
  0x2d   : > { %349 = vperm.xlu1 %4002, %v323_v4  }
  0x30   : > { %384 = vperm.xlu0 %4008, %v320_v7  }
  0x31   : > { %4003 = vset.pattern.permute.xlu1 %v4144_v1 }
  0x32   : > { %396 = vperm.xlu1 %4003, %v323_v4  }
  0x34   : > { %4011 = vset.pattern.permute.xlu0 %v4145_v8 }
  0x35   : > { %359 = vperm.xlu0 %4011, %v325_v2  }
  0x36   : > { %400 = vperm.xlu1 %4003, %v324_v9  }
  0x39   : > { %364 = vperm.xlu0 %4011, %v326_v3  }
  0x3a   : > { %4004 = vset.pattern.permute.xlu1 %v4143_v0 }
  0x3b   : > { %452 = vperm.xlu1 %4004, %v324_v9  }
  0x3d   : > { %354 = vperm.xlu0 %4011, %v324_v9  }
  0x3f   : > { %4005 = vset.pattern.permute.xlu1 %v4145_v8 }
  0x40   : > { %523 = vperm.xlu1 %4005, %v489_v10  }
  0x41   : > { %528 = vperm.xlu0 %4011, %v490_v11  }
  0x44   : > { %339 = vperm.xlu1 %4005, %v321_v6  }
  0x45   : > { %329 = vperm.xlu0 %4011, %v319_v12  }
  0x48   : > { %344 = vperm.xlu1 %4005, %v322_v5  }
  0x49   : > { %503 = vperm.xlu0 %4011, %v485_v13  }
  0x4c   : > { %4006 = vset.pattern.permute.xlu1 %v4144_v1 }
  0x4d   : > { %392 = vperm.xlu1 %4006, %v322_v5   ;;  %498 = vperm.xlu0 %4011, %v484_v14  }
  0x51   : > { %4007 = vset.pattern.permute.xlu1 %v4143_v0  ;;  %660 = vperm.xlu0 %4011, %v582_v15  }
  0x52   : > { %440 = vperm.xlu1 %4007, %v321_v6  }
  0x55   : > { %650 = vperm.xlu0 %4011, %v580_v16  }
  0x56   : > { %4009 = vset.pattern.permute.xlu1 %v4145_v8 }
  0x57   : > { %513 = vperm.xlu1 %4009, %v487_v17  }
  0x59   : > { %640 = vperm.xlu0 %4011, %v578_v18  }
  0x5b   : > { %518 = vperm.xlu1 %4009, %v488_v19  }
  0x5d   : > { %630 = vperm.xlu0 %4011, %v576_v20  }
  0x5f   : > { %334 = vperm.xlu1 %4009, %v320_v7  }
  0x61   : > { %620 = vperm.xlu0 %4011, %v574_v21  }
  0x63   : > { %4010 = vset.pattern.permute.xlu1 %v4144_v1 }
  0x64   : > { %380 = vperm.xlu1 %4010, %v319_v12  }
  0x65   : > { %610 = vperm.xlu0 %4011, %v572_v22  }
  0x68   : > { %4012 = vset.pattern.permute.xlu1 %v4143_v0 }
  0x69   : > { %600 = vperm.xlu0 %4011, %v570_v23   ;;  %432 = vperm.xlu1 %4012, %v319_v12  }
  0x6d   : > { %590 = vperm.xlu0 %4011, %v568_v24   ;;  %436 = vperm.xlu1 %4012, %v320_v7  }
  0x71   : > { %4013 = vset.pattern.permute.xlu1 %v4145_v8 }
  0x72   : > { %508 = vperm.xlu1 %4013, %v486_v25  }
  0x76   : > { %493 = vperm.xlu1 %4013, %v483_v26  }
  0x7a   : > { %655 = vperm.xlu1 %4013, %v581_v27  }
  0x7e   : > { %645 = vperm.xlu1 %4013, %v579_v29  }
  0x82   : > { %635 = vperm.xlu1 %4013, %v577_v30  }
  0x86   : > { %625 = vperm.xlu1 %4013, %v575_v31  }
  0x8a   : > { %615 = vperm.xlu1 %4013, %v573_v32  }
  0x8e   : > { %605 = vperm.xlu1 %4013, %v571_v33  }
  0x92   : > { %595 = vperm.xlu1 %4013, %v569_v34  }
  0x96   : > { %585 = vperm.xlu1 %4013, %v567_v35  }
  0x9a   : > { %v405_v36 = vpop.permute.xlu1 %404  ;;  %v457_v37 = vpop.permute.xlu0 %456 }
  0x9b   : > { %v421_v57 = vmul.f32 %v4356_v51, %v405_v36  ;;  %v473_v62 = vmul.f32 %v4363_v58, %v457_v37 }
  0x9e   : > { %v409_v38 = vpop.permute.xlu1 %408  ;;  %v449_v39 = vpop.permute.xlu0 %448 }
  0x9f   : > { %v422_v60 = vmul.f32 %v4356_v51, %v409_v38  ;;  %v471_v20 = vmul.f32 %v4363_v58, %v449_v39 }
  0xa2   : > { %v4340_v40 = vpop.permute.xlu0 %444 }
  0xa3   : > { %v461_v41 = vpop.permute.xlu1 %460 }
  0xa4   : > { %v474_v3 = vmul.f32 %v4363_v58, %v461_v41 }
  0xa7   : > { %v389_v43 = vpop.permute.xlu0 %388 }
  0xa8   : > { %v350_v45 = vpop.permute.xlu1 %349  ;;  %v417_v36 = vmul.f32 %v4356_v51, %v389_v43 }
  0xa9   : > { %v375_v17 = vmul.f32 %v4359_v53, %v350_v45 }
  0xab   : > { %v4352_v46 = vpop.permute.xlu0 %384 }
  0xad   : > { %v397_v50 = vpop.permute.xlu1 %396 }
  0xae   : > { %v419_v16 = vmul.f32 %v4356_v51, %v397_v50  ;;  %v416_v50 = vmul.f32 %v4356_v51, %v4352_v46 }
  0xb0   : > { %v360_v54 = vpop.permute.xlu0 %359  ;;  %v427_v21 = vadd.f32 %v419_v16, %v375_v17  ;;  %v4020_v16 = vld [vmem:[%s5195_s3 + $0x30] sm:$0xff]   ;;  %v4021_v17 = vld [vmem:[%s5195_s3 + $0x38] sm:$0xff]  }
  0xb1   : > { %v401_v55 = vpop.permute.xlu1 %400  ;;  %v377_v56 = vmul.f32 %v4359_v53, %v360_v54 }
  0xb2   : > { %v420_v22 = vmul.f32 %v4356_v51, %v401_v55  ;;  %v479_v26 = vadd.f32 %v471_v20, %v427_v21 }
  0xb3   : > { %v429_v63 = vadd.f32 %v421_v57, %v377_v56  ;;  %v470_v57 = vmul.f32 %v4363_v58, %v4340_v40 }
  0xb4   : > { %v365_v59 = vpop.permute.xlu0 %364 }
  0xb5   : > { %v378_v61 = vmul.f32 %v4359_v53, %v365_v59  ;;  %v481_v4 = vadd.f32 %v473_v62, %v429_v63 }
  0xb6   : > { %v453_v0 = vpop.permute.xlu1 %452 }
  0xb7   : > { %v430_v1 = vadd.f32 %v422_v60, %v378_v61  ;;  %v472_v25 = vmul.f32 %v4363_v58, %v453_v0 }
  0xb8   : > { %v355_v2 = vpop.permute.xlu0 %354 }
  0xb9   : > { %v482_v6 = vadd.f32 %v474_v3, %v430_v1  ;;  %v376_v18 = vmul.f32 %v4359_v53, %v355_v2 }
  0xbb   : > { %v524_v5 = vpop.permute.xlu1 %523  ;;  %v428_v23 = vadd.f32 %v420_v22, %v376_v18  ;;  %v4022_v18 = vld [vmem:[#allocation2] sm:$0xff]  }
  0xbc   : > { %v537_v7 = vadd.f32 %v524_v5, %v481_v4  ;;  %v529_v8 = vpop.permute.xlu0 %528  ;;  %3702 = vmatprep.mubr.bf16.mxu1 %v4022_v18 }
  0xbd   : > { %v538_v9 = vadd.f32 %v529_v8, %v482_v6  ;;  %v480_v28 = vadd.f32 %v472_v25, %v428_v23 }
  0xbe   : > { %v545_v10 = vmax.f32 %v537_v7, 0.0 }
  0xbf   : > { %v546_v11 = vmax.f32 %v538_v9, 0.0  ;;  %v340_v12 = vpop.permute.xlu1 %339 }
  0xc0   : > { %v373_v37 = vmul.f32 %v4359_v53, %v340_v12  ;;  %v330_v38 = vpop.permute.xlu0 %329  ;;  %v4016_v12 = vld [vmem:[%s5195_s3 + $0x10] sm:$0xff]  }
  0xc1   : > { %v566_v13 = vpack.c.bf16 %v546_v11, %v545_v10  ;;  %v371_v61 = vmul.f32 %v4359_v53, %v330_v38 }
  0xc2   : > { %v425_v47 = vadd.f32 %v417_v36, %v373_v37 }
  0xc3   : > { %v345_v14 = vpop.permute.xlu1 %344  ;;  %3662 = vmatprep.subr.bf16.mxu0 %v566_v13 }
  0xc4   : > { %3663 = vmatpush3.bf16.msra.mxu0 %v566_v13  ;;  %v374_v48 = vmul.f32 %v4359_v53, %v345_v14  ;;  %v504_v43 = vpop.permute.xlu0 %503  ;;  %v4017_v13 = vld [vmem:[%s5195_s3 + $0x18] sm:$0xff]   ;;  %v4018_v14 = vld [vmem:[%s5195_s3 + $0x20] sm:$0xff]  }
  0xc8   : > { %v393_v15 = vpop.permute.xlu1 %392  ;;  %v499_v4 = vpop.permute.xlu0 %498 }
  0xc9   : > { %v418_v39 = vmul.f32 %v4356_v51, %v393_v15  ;;  %v4019_v15 = vld [vmem:[%s5195_s3 + $0x28] sm:$0xff]  }
  0xcb   : > { %v426_v52 = vadd.f32 %v418_v39, %v374_v48 }
  0xcd   : > { %v441_v19 = vpop.permute.xlu1 %440  ;;  %v478_v1 = vadd.f32 %v470_v57, %v426_v52 }
  0xce   : > { %v469_v41 = vmul.f32 %v4363_v58, %v441_v19  ;;  %v4023_v19 = vld [vmem:[#allocation2 + $0x40] sm:$0xff]  }
  0xd0   : > { %v477_v54 = vadd.f32 %v469_v41, %v425_v47 }
  0xd2   : > { %v514_v24 = vpop.permute.xlu1 %513  ;;  %v533_v62 = vadd.f32 %v504_v43, %v477_v54 }
  0xd3   : > { %v535_v27 = vadd.f32 %v514_v24, %v479_v26  ;;  %v661_v24 = vpop.permute.xlu0 %660 }
  0xd4   : > { %v541_v8 = vmax.f32 %v533_v62, 0.0 }
  0xd5   : > { %v543_v31 = vmax.f32 %v535_v27, 0.0 }
  0xd6   : > { %v519_v29 = vpop.permute.xlu1 %518 }
  0xd7   : > { %v536_v30 = vadd.f32 %v519_v29, %v480_v28  ;;  %v651_v29 = vpop.permute.xlu0 %650 }
  0xd9   : > { %v544_v32 = vmax.f32 %v536_v30, 0.0 }
  0xda   : > { %v335_v33 = vpop.permute.xlu1 %334 }
  0xdb   : > { %v565_v34 = vpack.c.bf16 %v544_v32, %v543_v31  ;;  %v372_v49 = vmul.f32 %v4359_v53, %v335_v33 }
  0xdd   : > { %3664 = vmatprep.subr.bf16.mxu0 %v565_v34  ;;  %v424_v59 = vadd.f32 %v416_v50, %v372_v49 }
  0xde   : > { %3665 = vmatpush3.bf16.msra.mxu0 %v565_v34  ;;  %v641_v34 = vpop.permute.xlu0 %640 }
  0xdf   : > { %v381_v35 = vpop.permute.xlu1 %380 }
  0xe0   : > { %v415_v60 = vmul.f32 %v4356_v51, %v381_v35 }
  0xe2   : > { %v423_v2 = vadd.f32 %v415_v60, %v371_v61  ;;  %v631_v39 = vpop.permute.xlu0 %630 }
  0xe4   : > { %v433_v45 = vpop.permute.xlu1 %432 }
  0xe5   : > { %v467_v63 = vmul.f32 %v4363_v58, %v433_v45 }
  0xe6   : > { %v621_v57 = vpop.permute.xlu0 %620 }
  0xe7   : > { %v475_v7 = vadd.f32 %v467_v63, %v423_v2 }
  0xe8   : > { %v437_v55 = vpop.permute.xlu1 %436 }
  0xe9   : > { %v468_v56 = vmul.f32 %v4363_v58, %v437_v55  ;;  %v4015_v58 = vld [vmem:[%s5195_s3 + $0x8] sm:$0xff]  }
  0xeb   : > { %v476_v0 = vadd.f32 %v468_v56, %v424_v59 }
  0xed   : > { %v509_v46 = vpop.permute.xlu1 %508  ;;  %v532_v5 = vadd.f32 %v499_v4, %v476_v0  ;;  %v611_v4 = vpop.permute.xlu0 %610 }
  0xee   : > { %v534_v3 = vadd.f32 %v509_v46, %v478_v1 }
  0xef   : > { %v540_v51 = vmax.f32 %v532_v5, 0.0 }
  0xf0   : > { %v542_v6 = vmax.f32 %v534_v3, 0.0 }
  0xf1   : > { %v494_v9 = vpop.permute.xlu1 %493 }
  0xf2   : > { %v531_v40 = vadd.f32 %v494_v9, %v475_v7  ;;  %v564_v10 = vpack.c.bf16 %v542_v6, %v541_v8 }
  0xf4   : > { %v539_v11 = vmax.f32 %v531_v40, 0.0  ;;  %3666 = vmatprep.subr.bf16.mxu0 %v564_v10 }
  0xf5   : > { %3667 = vmatpush3.bf16.msra.mxu0 %v564_v10  ;;  %v656_v26 = vpop.permute.xlu1 %655 }
  0xf6   : > { %v563_v53 = vpack.c.bf16 %v540_v51, %v539_v11 }
  0xf8   : > { %3668 = vmatprep.subr.bf16.mxu0 %v563_v53 }
  0xf9   : > { %3669 = vmatpush3.bf16.msra.mxu0 %v563_v53  ;;  %v646_v31 = vpop.permute.xlu1 %645  ;;  %v601_v53 = vpop.permute.xlu0 %600 }
  0xfc   : > { %3671 = vmatmul.mubr.msk.bf16.vlgmr.msra.gmra.mxu0 %vm703_vm0, %v4015_v58 }
  0xfd   : > { %3674 = vmatprep.mubr.msk.bf16.mxu0 %vm703_vm0, %v4016_v12  ;;  %v636_v36 = vpop.permute.xlu1 %635 }
 0x101   : > { %v626_v47 = vpop.permute.xlu1 %625 }
 0x104   : > { %3675 = vmatmul.mubr.msk.bf16.gmra.mxu0 %vm703_vm0, %v4017_v13 }
 0x105   : > { %3678 = vmatprep.mubr.msk.bf16.mxu0 %vm703_vm0, %v4018_v14  ;;  %v616_v63 = vpop.permute.xlu1 %615 }
 0x109   : > { %v606_v8 = vpop.permute.xlu1 %605 }
 0x10c   : > { %3679 = vmatmul.mubr.msk.bf16.gmra.mxu0 %vm703_vm0, %v4019_v15 }
 0x10d   : > { %3682 = vmatprep.mubr.msk.bf16.mxu0 %vm703_vm0, %v4020_v16  ;;  %v596_v13 = vpop.permute.xlu1 %595 }
 0x114   : > { %3683 = vmatmul.mubr.msk.bf16.gmra.mxu0 %vm703_vm0, %v4021_v17  ;;  %vm1185_vm0 = vcmask 1048512  }
 0x115   : > { %3734 = vmatprep.mubr.bf16.mxu0 %v4023_v19  ;;  %v591_v19 = vpop.permute.xlu0 %590 }
 0x1bc   : > { %v4417_v20 = vpop.f32.mrf.mxu0 }
 0x1bd   : > { %v771_v17 = vadd.f32 %v4417_v20, %v596_v13  ;;  %v4069_v13 = vld [vmem:[#allocation2 + $0x168] sm:$0xff]  }
 0x1be   : > { %v4419_v21 = vpop.f32.mrf.mxu0 }
 0x1c0   : > { %v4421_v22 = vpop.f32.mrf.mxu0 }
 0x1c1   : > { %v774_v14 = vadd.f32 %v4421_v22, %v601_v53  ;;  %v586_v22 = vpop.permute.xlu1 %585  ;;  %v4060_v53 = vld [vmem:[#allocation2 + $0x120] sm:$0xff]  }
 0x1c2   : > { %v4423_v23 = vpop.f32.mrf.mxu0 }
 0x1c4   : > { %v3676_v25 = vpop.f32.mrf.mxu0 }
 0x1c5   : > { %v787_v9 = vadd.f32 %v3676_v25, %v616_v63  ;;  %v766_v25 = vadd.f32 %v4423_v23, %v591_v19  ;;  %v4049_v63 = vld [vmem:[#allocation2 + $0xe8] sm:$0xff]   ;;  %v4064_v19 = vld [vmem:[#allocation2 + $0x180] sm:$0xff]  }
 0x1c6   : > { %v778_v27 = vpop.f32.mrf.mxu0 }
 0x1c7   : > { %v831_v58 = vmax.f32 %v787_v9, 0.0  ;;  %v779_v12 = vadd.f32 %v778_v27, %v606_v8  ;;  %v827_v27 = vmax.f32 %v771_v17, 0.0  ;;  %v4057_v8 = vld [vmem:[#allocation2 + $0x148] sm:$0xff]   ;;  %v4058_v9 = vld [vmem:[#allocation2 + $0x110] sm:$0xff]   ;;  %v4063_v17 = vld [vmem:[#allocation2 + $0x138] sm:$0xff]  }
 0x1c8   : > { %v3677_v28 = vpop.f32.mrf.mxu0 }
 0x1c9   : > { %v790_v5 = vadd.f32 %v3677_v28, %v621_v57  ;;  %v829_v18 = vmax.f32 %v779_v12, 0.0  ;;  %v763_v28 = vadd.f32 %v4419_v21, %v586_v22  ;;  %v4024_v21 = vld [vmem:[#allocation2 + $0x8] sm:$0xff]   ;;  %v4045_v57 = vld [vmem:[#allocation2 + $0xd8] sm:$0xff]  }
 0x1ca   : > { %v781_v30 = vpop.f32.mrf.mxu0  ;;  %v4061_v12 = vld [vmem:[#allocation2 + $0x128] sm:$0xff]  }
 0x1cb   : > { %v832_v10 = vmax.f32 %v790_v5, 0.0  ;;  %v782_v11 = vadd.f32 %v781_v30, %v611_v4  ;;  %v825_v23 = vmax.f32 %v763_v28, 0.0  ;;  %v4054_v4 = vld [vmem:[#allocation2 + $0x100] sm:$0xff]   ;;  %v4073_v22 = vld [vmem:[#allocation2 + $0x1c8] sm:$0xff]   ;;  %v4075_v28 = vld [vmem:[#allocation2 + $0x1d0] sm:$0xff]  }
 0x1cc   : > { %v3680_v32 = vpop.f32.mrf.mxu0  ;;  %v4055_v5 = vld [vmem:[#allocation2 + $0x140] sm:$0xff]  }
 0x1cd   : > { %v803_v59 = vadd.f32 %v3680_v32, %v636_v36  ;;  %v4448_v15 = vpack.c.bf16 %v832_v10, %v831_v58  ;;  %v830_v16 = vmax.f32 %v782_v11, 0.0  ;;  %v4026_v32 = vld [vmem:[#allocation2 + $0x10] sm:$0xff]   ;;  %v4030_v36 = vld [vmem:[#allocation2 + $0x20] sm:$0xff]   ;;  %v4059_v10 = vld [vmem:[#allocation2 + $0x118] sm:$0xff]  }
 0x1ce   : > { %v794_v33 = vpop.f32.mrf.mxu0  ;;  %v4067_v11 = vld [vmem:[#allocation2 + $0x158] sm:$0xff]   ;;  %v4068_v58 = vld [vmem:[#allocation2 + $0x160] sm:$0xff]  }
 0x1cf   : > { %v835_v2 = vmax.f32 %v803_v59, 0.0  ;;  %v795_v3 = vadd.f32 %v794_v33, %v626_v47  ;;  %v4028_v33 = vld [vmem:[#allocation2 + $0x50] sm:$0xff]   ;;  %v4036_v47 = vld [vmem:[#allocation2 + $0x38] sm:$0xff]   ;;  %v4046_v59 = vld [vmem:[#allocation2 + $0xa0] sm:$0xff]  }
 0x1d0   : > { %v3681_v35 = vpop.f32.mrf.mxu0 }
 0x1d1   : > { %v806_v54 = vadd.f32 %v3681_v35, %v641_v34  ;;  %v833_v40 = vmax.f32 %v795_v3, 0.0  ;;  %v4027_v34 = vld [vmem:[#allocation2 + $0x18] sm:$0xff]  }
 0x1d2   : > { %v797_v37 = vpop.f32.mrf.mxu0  ;;  %v4029_v35 = vld [vmem:[#allocation2 + $0x58] sm:$0xff]  }
 0x1d3   : > { %v836_v0 = vmax.f32 %v806_v54, 0.0  ;;  %v798_v1 = vadd.f32 %v797_v37, %v631_v39  ;;  %v4031_v37 = vld [vmem:[#allocation2 + $0x60] sm:$0xff]   ;;  %v4033_v39 = vld [vmem:[#allocation2 + $0x68] sm:$0xff]   ;;  %v4053_v3 = vld [vmem:[#allocation2 + $0xf8] sm:$0xff]  }
 0x1d4   : > { %v3684_v38 = vpop.f32.mrf.mxu0  ;;  %v4041_v54 = vld [vmem:[#allocation2 + $0xc8] sm:$0xff]  }
 0x1d5   : > { %v819_v45 = vadd.f32 %v3684_v38, %v656_v26  ;;  %v4435_v6 = vpack.c.bf16 %v836_v0, %v835_v2  ;;  %v834_v7 = vmax.f32 %v798_v1, 0.0  ;;  %v4456_v26 = vpack.c.bf16 %v830_v16, %v829_v18  ;;  %v4032_v38 = vld [vmem:[#allocation2 + $0x28] sm:$0xff]   ;;  %v4050_v0 = vld [vmem:[#allocation2 + $0xb0] sm:$0xff]   ;;  %v4052_v2 = vld [vmem:[#allocation2 + $0xb8] sm:$0xff]  }
 0x1d6   : > { %v810_v41 = vpop.f32.mrf.mxu0  ;;  %v4051_v1 = vld [vmem:[#allocation2 + $0xf0] sm:$0xff]   ;;  %v4071_v18 = vld [vmem:[#allocation2 + $0x178] sm:$0xff]  }
 0x1d7   : > { %v811_v49 = vadd.f32 %v810_v41, %v646_v31  ;;  %v839_v55 = vmax.f32 %v819_v45, 0.0  ;;  %v4441_v51 = vpack.c.bf16 %v834_v7, %v833_v40  ;;  %v4025_v31 = vld [vmem:[#allocation2 + $0x48] sm:$0xff]   ;;  %v4034_v41 = vld [vmem:[#allocation2 + $0x30] sm:$0xff]  }
 0x1d8   : > { %v3685_v48 = vpop.f32.mrf.mxu0  ;;  %v4035_v45 = vld [vmem:[#allocation2 + $0x70] sm:$0xff]   ;;  %v4056_v7 = vld [vmem:[#allocation2 + $0x108] sm:$0xff]  }
 0x1d9   : > { %v822_v50 = vadd.f32 %v3685_v48, %v661_v24  ;;  %v837_v60 = vmax.f32 %v811_v49, 0.0  ;;  %v828_v24 = vmax.f32 %v774_v14, 0.0  ;;  %v4037_v48 = vld [vmem:[#allocation2 + $0x78] sm:$0xff]   ;;  %v4038_v49 = vld [vmem:[#allocation2 + $0x80] sm:$0xff]   ;;  %v4066_v40 = vld [vmem:[#allocation2 + $0x150] sm:$0xff]  }
 0x1da   : > { %v813_v52 = vpop.f32.mrf.mxu0  ;;  %v4062_v14 = vld [vmem:[#allocation2 + $0x130] sm:$0xff]  }
 0x1db   : > { %v840_v43 = vmax.f32 %v822_v50, 0.0  ;;  %v814_v56 = vadd.f32 %v813_v52, %v651_v29  ;;  %v4463_v20 = vpack.c.bf16 %v828_v24, %v827_v27  ;;  %v826_v29 = vmax.f32 %v766_v25, 0.0  ;;  %v4039_v50 = vld [vmem:[#allocation2 + $0xc0] sm:$0xff]   ;;  %v4040_v52 = vld [vmem:[#allocation2 + $0x88] sm:$0xff]   ;;  %v4070_v16 = vld [vmem:[#allocation2 + $0x170] sm:$0xff]  }
 0x1dc   : > { %v4072_v24 = vld [vmem:[#allocation2 + $0x1c0] sm:$0xff]   ;;  %v4065_v25 = vld [vmem:[#allocation2 + $0x188] sm:$0xff]   ;;  %v4074_v27 = vld [vmem:[#allocation2 + $0x190] sm:$0xff]  }
 0x1dd   : > { %v4425_v61 = vpack.c.bf16 %v840_v43, %v839_v55  ;;  %v838_v62 = vmax.f32 %v814_v56, 0.0  ;;  %v4469_v30 = vpack.c.bf16 %v826_v29, %v825_v23  ;;  %v4042_v55 = vld [vmem:[#allocation2 + $0x90] sm:$0xff]   ;;  %v4044_v56 = vld [vmem:[#allocation2 + $0x98] sm:$0xff]  }
 0x1de   : > { %v4043_v43 = vld [vmem:[#allocation2 + $0xd0] sm:$0xff]   ;;  %v4076_v29 = vld [vmem:[#allocation2 + $0x198] sm:$0xff]  }
 0x1df   : > { %v4427_v46 = vpack.c.bf16 %v838_v62, %v837_v60  ;;  %3686 = vmatprep.subr.bf16.mxu1 %v4425_v61  ;;  %3718 = vmatprep.subr.bf16.mxu0 %v4425_v61  ;;  %v4047_v60 = vld [vmem:[#allocation2 + $0xe0] sm:$0xff]   ;;  %v4048_v62 = vld [vmem:[#allocation2 + $0xa8] sm:$0xff]   ;;  %v4077_v23 = vld [vmem:[#allocation2 + $0x1d8] sm:$0xff]  }
 0x1e0   : > { %3687 = vmatpush3.bf16.msra.mxu1 %v4425_v61  ;;  %3719 = vmatpush3.bf16.msra.mxu0 %v4425_v61 }
 0x1e1   : > { %3688 = vmatprep.subr.bf16.mxu1 %v4427_v46  ;;  %3720 = vmatprep.subr.bf16.mxu0 %v4427_v46 }
 0x1e4   : > { %3689 = vmatpush3.bf16.msra.mxu1 %v4427_v46  ;;  %3721 = vmatpush3.bf16.msra.mxu0 %v4427_v46 }
 0x1e5   : > { %3690 = vmatprep.subr.bf16.mxu1 %v4435_v6  ;;  %3722 = vmatprep.subr.bf16.mxu0 %v4435_v6 }
 0x1e8   : > { %3691 = vmatpush3.bf16.msra.mxu1 %v4435_v6  ;;  %3723 = vmatpush3.bf16.msra.mxu0 %v4435_v6 }
 0x1e9   : > { %3692 = vmatprep.subr.bf16.mxu1 %v4441_v51  ;;  %3724 = vmatprep.subr.bf16.mxu0 %v4441_v51 }
 0x1ec   : > { %3693 = vmatpush3.bf16.msra.mxu1 %v4441_v51  ;;  %3725 = vmatpush3.bf16.msra.mxu0 %v4441_v51 }
 0x1ed   : > { %3694 = vmatprep.subr.bf16.mxu1 %v4448_v15  ;;  %3726 = vmatprep.subr.bf16.mxu0 %v4448_v15 }
 0x1f0   : > { %3695 = vmatpush3.bf16.msra.mxu1 %v4448_v15  ;;  %3727 = vmatpush3.bf16.msra.mxu0 %v4448_v15 }
 0x1f1   : > { %3696 = vmatprep.subr.bf16.mxu1 %v4456_v26  ;;  %3728 = vmatprep.subr.bf16.mxu0 %v4456_v26 }
 0x1f4   : > { %3697 = vmatpush3.bf16.msra.mxu1 %v4456_v26  ;;  %3729 = vmatpush3.bf16.msra.mxu0 %v4456_v26 }
 0x1f5   : > { %3698 = vmatprep.subr.bf16.mxu1 %v4463_v20  ;;  %3730 = vmatprep.subr.bf16.mxu0 %v4463_v20 }
 0x1f8   : > { %3699 = vmatpush3.bf16.msra.mxu1 %v4463_v20  ;;  %3731 = vmatpush3.bf16.msra.mxu0 %v4463_v20 }
 0x1f9   : > { %3700 = vmatprep.subr.bf16.mxu1 %v4469_v30  ;;  %3732 = vmatprep.subr.bf16.mxu0 %v4469_v30 }
 0x1fc   : > { %3701 = vmatpush3.bf16.msra.mxu1 %v4469_v30  ;;  %3733 = vmatpush3.bf16.msra.mxu0 %v4469_v30 }
 0x1fd   : > { %3750 = vmatprep.subr.bf16.mxu1 %v4425_v61  ;;  %3782 = vmatprep.subr.bf16.mxu0 %v4425_v61 }
 0x1ff   : > { %3703 = vmatmul.mubr.bf16.vlgmr.msra.gmra.mxu1 %v4024_v21  ;;  %3735 = vmatmul.mubr.bf16.vlgmr.msra.gmra.mxu0 %v4025_v31  ;;  %v4078_v21 = vld [vmem:[#allocation2 + $0x1a0] sm:$0xff]  }
 0x200   : > { %3751 = vmatpush3.bf16.msra.mxu1 %v4425_v61  ;;  %3783 = vmatpush3.bf16.msra.mxu0 %v4425_v61  ;;  %v4079_v31 = vld [vmem:[#allocation2 + $0x1e0] sm:$0xff]  }
 0x201   : > { %3752 = vmatprep.subr.bf16.mxu1 %v4427_v46  ;;  %3784 = vmatprep.subr.bf16.mxu0 %v4427_v46 }
 0x202   : > { %3706 = vmatprep.mubr.bf16.mxu1 %v4026_v32  ;;  %3738 = vmatprep.mubr.bf16.mxu0 %v4028_v33  ;;  %v4081_v32 = vld [vmem:[#allocation2 + $0x1e8] sm:$0xff]   ;;  %v4082_v33 = vld [vmem:[#allocation2 + $0x1b0] sm:$0xff]  }
 0x204   : > { %3753 = vmatpush3.bf16.msra.mxu1 %v4427_v46  ;;  %3785 = vmatpush3.bf16.msra.mxu0 %v4427_v46 }
 0x205   : > { %3754 = vmatprep.subr.bf16.mxu1 %v4435_v6  ;;  %3786 = vmatprep.subr.bf16.mxu0 %v4435_v6 }
 0x207   : > { %3707 = vmatmul.mubr.bf16.gmra.mxu1 %v4027_v34  ;;  %3739 = vmatmul.mubr.bf16.gmra.mxu0 %v4029_v35 }
 0x208   : > { %3755 = vmatpush3.bf16.msra.mxu1 %v4435_v6  ;;  %3787 = vmatpush3.bf16.msra.mxu0 %v4435_v6 }
 0x209   : > { %3756 = vmatprep.subr.bf16.mxu1 %v4441_v51  ;;  %3788 = vmatprep.subr.bf16.mxu0 %v4441_v51 }
 0x20a   : > { %3710 = vmatprep.mubr.bf16.mxu1 %v4030_v36  ;;  %3742 = vmatprep.mubr.bf16.mxu0 %v4031_v37 }
 0x20c   : > { %3757 = vmatpush3.bf16.msra.mxu1 %v4441_v51  ;;  %3789 = vmatpush3.bf16.msra.mxu0 %v4441_v51 }
 0x20d   : > { %3758 = vmatprep.subr.bf16.mxu1 %v4448_v15  ;;  %3790 = vmatprep.subr.bf16.mxu0 %v4448_v15 }
 0x20f   : > { %3711 = vmatmul.mubr.bf16.gmra.mxu1 %v4032_v38  ;;  %3743 = vmatmul.mubr.bf16.gmra.mxu0 %v4033_v39 }
 0x210   : > { %3759 = vmatpush3.bf16.msra.mxu1 %v4448_v15  ;;  %3791 = vmatpush3.bf16.msra.mxu0 %v4448_v15 }
 0x211   : > { %3760 = vmatprep.subr.bf16.mxu1 %v4456_v26  ;;  %3792 = vmatprep.subr.bf16.mxu0 %v4456_v26 }
 0x212   : > { %3714 = vmatprep.mubr.bf16.mxu1 %v4034_v41  ;;  %3746 = vmatprep.mubr.bf16.mxu0 %v4035_v45 }
 0x214   : > { %3761 = vmatpush3.bf16.msra.mxu1 %v4456_v26  ;;  %3793 = vmatpush3.bf16.msra.mxu0 %v4456_v26 }
 0x215   : > { %3762 = vmatprep.subr.bf16.mxu1 %v4463_v20  ;;  %3794 = vmatprep.subr.bf16.mxu0 %v4463_v20 }
 0x217   : > { %3715 = vmatmul.mubr.bf16.gmra.mxu1 %v4036_v47  ;;  %3747 = vmatmul.mubr.bf16.gmra.mxu0 %v4037_v48 }
 0x218   : > { %3763 = vmatpush3.bf16.msra.mxu1 %v4463_v20  ;;  %3795 = vmatpush3.bf16.msra.mxu0 %v4463_v20 }
 0x219   : > { %3764 = vmatprep.subr.bf16.mxu1 %v4469_v30  ;;  %3796 = vmatprep.subr.bf16.mxu0 %v4469_v30 }
 0x21a   : > { %3766 = vmatprep.mubr.bf16.mxu1 %v4038_v49  ;;  %3798 = vmatprep.mubr.bf16.mxu0 %v4039_v50 }
 0x21c   : > { %3765 = vmatpush3.bf16.msra.mxu1 %v4469_v30  ;;  %3797 = vmatpush3.bf16.msra.mxu0 %v4469_v30 }
 0x21d   : > { %3814 = vmatprep.subr.bf16.mxu1 %v4425_v61  ;;  %3846 = vmatprep.subr.bf16.mxu0 %v4425_v61 }
 0x21f   : > { %3767 = vmatmul.mubr.bf16.vlgmr.msra.gmra.mxu1 %v4040_v52  ;;  %3799 = vmatmul.mubr.bf16.vlgmr.msra.gmra.mxu0 %v4041_v54 }
 0x220   : > { %3815 = vmatpush3.bf16.msra.mxu1 %v4425_v61  ;;  %3847 = vmatpush3.bf16.msra.mxu0 %v4425_v61 }
 0x221   : > { %3816 = vmatprep.subr.bf16.mxu1 %v4427_v46  ;;  %3848 = vmatprep.subr.bf16.mxu0 %v4427_v46 }
 0x222   : > { %3770 = vmatprep.mubr.bf16.mxu1 %v4042_v55  ;;  %3802 = vmatprep.mubr.bf16.mxu0 %v4043_v43 }
 0x224   : > { %3817 = vmatpush3.bf16.msra.mxu1 %v4427_v46  ;;  %3849 = vmatpush3.bf16.msra.mxu0 %v4427_v46 }
 0x225   : > { %3818 = vmatprep.subr.bf16.mxu1 %v4435_v6  ;;  %3850 = vmatprep.subr.bf16.mxu0 %v4435_v6 }
 0x227   : > { %3771 = vmatmul.mubr.bf16.gmra.mxu1 %v4044_v56  ;;  %3803 = vmatmul.mubr.bf16.gmra.mxu0 %v4045_v57 }
 0x228   : > { %3819 = vmatpush3.bf16.msra.mxu1 %v4435_v6  ;;  %3851 = vmatpush3.bf16.msra.mxu0 %v4435_v6 }
 0x229   : > { %3820 = vmatprep.subr.bf16.mxu1 %v4441_v51  ;;  %3852 = vmatprep.subr.bf16.mxu0 %v4441_v51 }
 0x22a   : > { %3774 = vmatprep.mubr.bf16.mxu1 %v4046_v59  ;;  %3806 = vmatprep.mubr.bf16.mxu0 %v4047_v60 }
 0x22c   : > { %3821 = vmatpush3.bf16.msra.mxu1 %v4441_v51  ;;  %3853 = vmatpush3.bf16.msra.mxu0 %v4441_v51 }
 0x22d   : > { %3822 = vmatprep.subr.bf16.mxu1 %v4448_v15  ;;  %3854 = vmatprep.subr.bf16.mxu0 %v4448_v15 }
 0x22f   : > { %3775 = vmatmul.mubr.bf16.gmra.mxu1 %v4048_v62  ;;  %3807 = vmatmul.mubr.bf16.gmra.mxu0 %v4049_v63 }
 0x230   : > { %3823 = vmatpush3.bf16.msra.mxu1 %v4448_v15  ;;  %3855 = vmatpush3.bf16.msra.mxu0 %v4448_v15 }
 0x231   : > { %3824 = vmatprep.subr.bf16.mxu1 %v4456_v26  ;;  %3856 = vmatprep.subr.bf16.mxu0 %v4456_v26 }
 0x232   : > { %3778 = vmatprep.mubr.bf16.mxu1 %v4050_v0  ;;  %3810 = vmatprep.mubr.bf16.mxu0 %v4051_v1 }
 0x234   : > { %3825 = vmatpush3.bf16.msra.mxu1 %v4456_v26  ;;  %3857 = vmatpush3.bf16.msra.mxu0 %v4456_v26 }
 0x235   : > { %3826 = vmatprep.subr.bf16.mxu1 %v4463_v20  ;;  %3858 = vmatprep.subr.bf16.mxu0 %v4463_v20 }
 0x237   : > { %3779 = vmatmul.mubr.bf16.gmra.mxu1 %v4052_v2  ;;  %3811 = vmatmul.mubr.bf16.gmra.mxu0 %v4053_v3 }
 0x238   : > { %3827 = vmatpush3.bf16.msra.mxu1 %v4463_v20  ;;  %3859 = vmatpush3.bf16.msra.mxu0 %v4463_v20 }
 0x239   : > { %3828 = vmatprep.subr.bf16.mxu1 %v4469_v30  ;;  %3860 = vmatprep.subr.bf16.mxu0 %v4469_v30 }
 0x23a   : > { %3830 = vmatprep.mubr.bf16.mxu1 %v4054_v4  ;;  %3862 = vmatprep.mubr.bf16.mxu0 %v4055_v5 }
 0x23c   : > { %3829 = vmatpush3.bf16.msra.mxu1 %v4469_v30  ;;  %3861 = vmatpush3.bf16.msra.mxu0 %v4469_v30 }
 0x23d   : > { %3878 = vmatprep.subr.bf16.mxu1 %v4425_v61  ;;  %3910 = vmatprep.subr.bf16.mxu0 %v4425_v61 }
 0x23f   : > { %3831 = vmatmul.mubr.bf16.vlgmr.msra.gmra.mxu1 %v4056_v7  ;;  %3863 = vmatmul.mubr.bf16.vlgmr.msra.gmra.mxu0 %v4057_v8 }
 0x240   : > { %3879 = vmatpush3.bf16.msra.mxu1 %v4425_v61  ;;  %3911 = vmatpush3.bf16.msra.mxu0 %v4425_v61 }
 0x241   : > { %3880 = vmatprep.subr.bf16.mxu1 %v4427_v46  ;;  %3912 = vmatprep.subr.bf16.mxu0 %v4427_v46 }
 0x242   : > { %3834 = vmatprep.mubr.bf16.mxu1 %v4058_v9  ;;  %3866 = vmatprep.mubr.bf16.mxu0 %v4066_v40 }
 0x244   : > { %3881 = vmatpush3.bf16.msra.mxu1 %v4427_v46  ;;  %3913 = vmatpush3.bf16.msra.mxu0 %v4427_v46 }
 0x245   : > { %3882 = vmatprep.subr.bf16.mxu1 %v4435_v6  ;;  %3914 = vmatprep.subr.bf16.mxu0 %v4435_v6 }
 0x247   : > { %3835 = vmatmul.mubr.bf16.gmra.mxu1 %v4059_v10  ;;  %3867 = vmatmul.mubr.bf16.gmra.mxu0 %v4067_v11 }
 0x248   : > { %3883 = vmatpush3.bf16.msra.mxu1 %v4435_v6  ;;  %3915 = vmatpush3.bf16.msra.mxu0 %v4435_v6 }
 0x249   : > { %3884 = vmatprep.subr.bf16.mxu1 %v4441_v51  ;;  %3916 = vmatprep.subr.bf16.mxu0 %v4441_v51 }
 0x24a   : > { %3838 = vmatprep.mubr.bf16.mxu1 %v4060_v53  ;;  %3870 = vmatprep.mubr.bf16.mxu0 %v4068_v58 }
 0x24c   : > { %3885 = vmatpush3.bf16.msra.mxu1 %v4441_v51  ;;  %3917 = vmatpush3.bf16.msra.mxu0 %v4441_v51 }
 0x24d   : > { %3886 = vmatprep.subr.bf16.mxu1 %v4448_v15  ;;  %3918 = vmatprep.subr.bf16.mxu0 %v4448_v15 }
 0x24f   : > { %3839 = vmatmul.mubr.bf16.gmra.mxu1 %v4061_v12  ;;  %3871 = vmatmul.mubr.bf16.gmra.mxu0 %v4069_v13 }
 0x250   : > { %3887 = vmatpush3.bf16.msra.mxu1 %v4448_v15  ;;  %3919 = vmatpush3.bf16.msra.mxu0 %v4448_v15 }
 0x251   : > { %3888 = vmatprep.subr.bf16.mxu1 %v4456_v26  ;;  %3920 = vmatprep.subr.bf16.mxu0 %v4456_v26 }
 0x252   : > { %3842 = vmatprep.mubr.bf16.mxu1 %v4062_v14  ;;  %3874 = vmatprep.mubr.bf16.mxu0 %v4070_v16 }
 0x254   : > { %3889 = vmatpush3.bf16.msra.mxu1 %v4456_v26  ;;  %3921 = vmatpush3.bf16.msra.mxu0 %v4456_v26 }
 0x255   : > { %3890 = vmatprep.subr.bf16.mxu1 %v4463_v20  ;;  %3922 = vmatprep.subr.bf16.mxu0 %v4463_v20 }
 0x257   : > { %3843 = vmatmul.mubr.bf16.gmra.mxu1 %v4063_v17  ;;  %3875 = vmatmul.mubr.bf16.gmra.mxu0 %v4071_v18 }
 0x258   : > { %3891 = vmatpush3.bf16.msra.mxu1 %v4463_v20  ;;  %3923 = vmatpush3.bf16.msra.mxu0 %v4463_v20 }
 0x259   : > { %3892 = vmatprep.subr.bf16.mxu1 %v4469_v30  ;;  %3924 = vmatprep.subr.bf16.mxu0 %v4469_v30 }
 0x25a   : > { %3894 = vmatprep.mubr.bf16.mxu1 %v4064_v19  ;;  %3926 = vmatprep.mubr.bf16.mxu0 %v4072_v24 }
 0x25c   : > { %3893 = vmatpush3.bf16.msra.mxu1 %v4469_v30  ;;  %3925 = vmatpush3.bf16.msra.mxu0 %v4469_v30 }
 0x25d   : > { %3942 = vmatprep.subr.bf16.mxu1 %v4425_v61 }
 0x25f   : > { %3895 = vmatmul.mubr.bf16.vlgmr.msra.gmra.mxu1 %v4065_v25  ;;  %3927 = vmatmul.mubr.bf16.vlgmr.msra.gmra.mxu0 %v4073_v22 }
 0x260   : > { %3950 = vmatpush3.bf16.msra.mxu1 %v4425_v61  ;;  %3898 = vmatprep.mubr.bf16.mxu1 %v4074_v27  ;;  %v4080_v61 = vld [vmem:[#allocation2 + $0x1a8] sm:$0xff]  }
 0x261   : > { %3943 = vmatprep.subr.bf16.mxu1 %v4427_v46  ;;  %3930 = vmatprep.mubr.bf16.mxu0 %v4075_v28 }
 0x264   : > { %3951 = vmatpush3.bf16.msra.mxu1 %v4427_v46  ;;  %v4083_v46 = vld [vmem:[#allocation2 + $0x1b8] sm:$0xff]  }
 0x265   : > { %3944 = vmatprep.subr.bf16.mxu1 %v4435_v6 }
 0x267   : > { %3899 = vmatmul.mubr.bf16.gmra.mxu1 %v4076_v29  ;;  %3931 = vmatmul.mubr.bf16.gmra.mxu0 %v4077_v23 }
 0x268   : > { %3952 = vmatpush3.bf16.msra.mxu1 %v4435_v6  ;;  %3902 = vmatprep.mubr.bf16.mxu1 %v4078_v21  ;;  %v4084_v6 = vld [vmem:[#allocation2 + $0x1f0] sm:$0xff]  }
 0x269   : > { %3945 = vmatprep.subr.bf16.mxu1 %v4441_v51  ;;  %3934 = vmatprep.mubr.bf16.mxu0 %v4079_v31 }
 0x26c   : > { %3953 = vmatpush3.bf16.msra.mxu1 %v4441_v51  ;;  %v4085_v51 = vld [vmem:[#allocation2 + $0x1f8] sm:$0xff]  }
 0x26d   : > { %3946 = vmatprep.subr.bf16.mxu1 %v4448_v15 }
 0x26f   : > { %3903 = vmatmul.mubr.bf16.gmra.mxu1 %v4080_v61  ;;  %3935 = vmatmul.mubr.bf16.gmra.mxu0 %v4081_v32 }
 0x270   : > { %3954 = vmatpush3.bf16.msra.mxu1 %v4448_v15  ;;  %3906 = vmatprep.mubr.bf16.mxu1 %v4082_v33 }
 0x271   : > { %3947 = vmatprep.subr.bf16.mxu1 %v4456_v26 }
 0x274   : > { %3955 = vmatpush3.bf16.msra.mxu1 %v4456_v26 }
 0x275   : > { %3948 = vmatprep.subr.bf16.mxu1 %v4463_v20 }
 0x277   : > { %3907 = vmatmul.mubr.bf16.gmra.mxu1 %v4083_v46 }
 0x278   : > { %3956 = vmatpush3.bf16.msra.mxu1 %v4463_v20  ;;  %3938 = vmatprep.mubr.bf16.mxu1 %v4084_v6 }
 0x279   : > { %3949 = vmatprep.subr.bf16.mxu1 %v4469_v30 }
 0x27c   : > { %3957 = vmatpush3.bf16.msra.mxu1 %v4469_v30 }
 0x27f   : > { %3939 = vmatmul.mubr.bf16.vlgmr.msra.gmra.mxu1 %v4085_v51 }
 0x2bf   : > { %v3704_v15 = vpop.f32.mrf.mxu1  ;;  %v3736_v34 = vpop.f32.mrf.mxu0 }
 0x2c0   : > { %v1017_v35 = vsel %vm1010_vm1, %v3704_v15, -inf  ;;  %v1357_v37 = vsel %vm1010_vm1, %v3736_v34, -inf }
 0x2c1   : > { %1018 = vmax.xlane.f32.xlu0 %v1017_v35  ;;  %v947_v26 = vpop.f32.mrf.mxu1  ;;  %v1288_v38 = vpop.f32.mrf.mxu0 }
 0x2c2   : > { %v1011_v36 = vsel %vm1010_vm1, %v947_v26, -inf  ;;  %v1351_v45 = vsel %vm1010_vm1, %v1288_v38, -inf }
 0x2c3   : > { %1012 = vmax.xlane.f32.xlu1 %v1011_v36  ;;  %v3705_v20 = vpop.f32.mrf.mxu1  ;;  %v3737_v30 = vpop.f32.mrf.mxu0 }
 0x2c4   : > { %v1020_v41 = vsel %vm1010_vm1, %v3705_v20, -inf  ;;  %v1360_v48 = vsel %vm1010_vm1, %v3737_v30, -inf }
 0x2c5   : > { %1358 = vmax.xlane.f32.xlu0 %v1357_v37  ;;  %v950_v39 = vpop.f32.mrf.mxu1  ;;  %v1291_v49 = vpop.f32.mrf.mxu0 }
 0x2c6   : > { %v1014_v50 = vsel %vm1010_vm1, %v950_v39, -inf  ;;  %v1354_v55 = vsel %vm1010_vm1, %v1291_v49, -inf }
 0x2c7   : > { %1021 = vmax.xlane.f32.xlu1 %v1020_v41  ;;  %v3708_v47 = vpop.f32.mrf.mxu1  ;;  %v3740_v54 = vpop.f32.mrf.mxu0  ;;  %v4146_v41 = vmov -inf  }
 0x2c8   : > { %v1029_v43 = vsel %vm1010_vm1, %v3708_v47, -inf  ;;  %v1369_v60 = vsel %vm1010_vm1, %v3740_v54, -inf  ;;  %317 = vst [vmem:[%s4625_s30] sm:$0xff] %v4146_v41 }
 0x2c9   : > { %1352 = vmax.xlane.f32.xlu0 %v1351_v45  ;;  %v963_v52 = vpop.f32.mrf.mxu1  ;;  %v1304_v57 = vpop.f32.mrf.mxu0 }
 0x2ca   : > { %v1023_v1 = vsel %vm1010_vm1, %v963_v52, -inf  ;;  %v1363_v5 = vsel %vm1010_vm1, %v1304_v57, -inf }
 0x2cb   : > { %1361 = vmax.xlane.f32.xlu1 %v1360_v48  ;;  %v3709_v56 = vpop.f32.mrf.mxu1  ;;  %v3741_v62 = vpop.f32.mrf.mxu0 }
 0x2cc   : > { %v1032_v59 = vsel %vm1010_vm1, %v3709_v56, -inf  ;;  %v1372_v63 = vsel %vm1010_vm1, %v3741_v62, -inf }
 0x2cd   : > { %1015 = vmax.xlane.f32.xlu0 %v1014_v50  ;;  %v966_v0 = vpop.f32.mrf.mxu1  ;;  %v1307_v4 = vpop.f32.mrf.mxu0 }
 0x2ce   : > { %v1026_v3 = vsel %vm1010_vm1, %v966_v0, -inf  ;;  %v1366_v9 = vsel %vm1010_vm1, %v1307_v4, -inf }
 0x2cf   : > { %1355 = vmax.xlane.f32.xlu1 %v1354_v55  ;;  %v3712_v2 = vpop.f32.mrf.mxu1  ;;  %v3744_v8 = vpop.f32.mrf.mxu0 }
 0x2d0   : > { %v1041_v40 = vsel %vm1010_vm1, %v3712_v2, -inf  ;;  %v1381_v58 = vsel %vm1010_vm1, %v3744_v8, -inf }
 0x2d1   : > { %1030 = vmax.xlane.f32.xlu0 %v1029_v43  ;;  %v979_v7 = vpop.f32.mrf.mxu1  ;;  %v1320_v11 = vpop.f32.mrf.mxu0 }
 0x2d2   : > { %v1035_v16 = vsel %vm1010_vm1, %v979_v7, -inf  ;;  %v1375_v24 = vsel %vm1010_vm1, %v1320_v11, -inf }
 0x2d3   : > { %1033 = vmax.xlane.f32.xlu1 %v1032_v59  ;;  %v3713_v10 = vpop.f32.mrf.mxu1  ;;  %v3745_v12 = vpop.f32.mrf.mxu0 }
 0x2d4   : > { %v1044_v53 = vsel %vm1010_vm1, %v3713_v10, -inf  ;;  %v1384_v13 = vsel %vm1010_vm1, %v3745_v12, -inf }
 0x2d5   : > { %1370 = vmax.xlane.f32.xlu0 %v1369_v60  ;;  %v982_v14 = vpop.f32.mrf.mxu1  ;;  %v1323_v19 = vpop.f32.mrf.mxu0 }
 0x2d6   : > { %v1038_v18 = vsel %vm1010_vm1, %v982_v14, -inf  ;;  %v1378_v27 = vsel %vm1010_vm1, %v1323_v19, -inf }
 0x2d7   : > { %1373 = vmax.xlane.f32.xlu1 %v1372_v63  ;;  %v3716_v17 = vpop.f32.mrf.mxu1  ;;  %v3748_v22 = vpop.f32.mrf.mxu0 }
 0x2d8   : > { %v1053_v28 = vsel %vm1010_vm1, %v3716_v17, -inf  ;;  %v1393_v31 = vsel %vm1010_vm1, %v3748_v22, -inf }
 0x2d9   : > { %1024 = vmax.xlane.f32.xlu0 %v1023_v1  ;;  %v995_v25 = vpop.f32.mrf.mxu1  ;;  %v1336_v23 = vpop.f32.mrf.mxu0 }
 0x2da   : > { %v1047_v46 = vsel %vm1010_vm1, %v995_v25, -inf  ;;  %v1387_v34 = vsel %vm1010_vm1, %v1336_v23, -inf }
 0x2db   : > { %1027 = vmax.xlane.f32.xlu1 %v1026_v3  ;;  %v3717_v29 = vpop.f32.mrf.mxu1  ;;  %v3749_v61 = vpop.f32.mrf.mxu0 }
 0x2dc   : > { %v1056_v21 = vsel %vm1010_vm1, %v3717_v29, -inf  ;;  %v1396_v32 = vsel %vm1010_vm1, %v3749_v61, -inf }
 0x2dd   : > { %1364 = vmax.xlane.f32.xlu0 %v1363_v5  ;;  %v998_v33 = vpop.f32.mrf.mxu1  ;;  %v1339_v15 = vpop.f32.mrf.mxu0 }
 0x2de   : > { %v1050_v51 = vsel %vm1010_vm1, %v998_v33, -inf  ;;  %v1390_v36 = vsel %vm1010_vm1, %v1339_v15, -inf }
 0x2df   : > { %1367 = vmax.xlane.f32.xlu1 %v1366_v9  ;;  %v3768_v6 = vpop.f32.mrf.mxu1  ;;  %v3800_v26 = vpop.f32.mrf.mxu0 }
 0x2e0   : > { %v1665_v37 = vsel %vm1010_vm1, %v3768_v6, -inf  ;;  %v1973_v30 = vsel %vm1010_vm1, %v3800_v26, -inf }
 0x2e1   : > { %1042 = vmax.xlane.f32.xlu0 %v1041_v40  ;;  %v1596_v35 = vpop.f32.mrf.mxu1  ;;  %v1904_v20 = vpop.f32.mrf.mxu0 }
 0x2e2   : > { %v1659_v49 = vsel %vm1010_vm1, %v1596_v35, -inf  ;;  %v1967_v55 = vsel %vm1010_vm1, %v1904_v20, -inf }
 0x2e3   : > { %1045 = vmax.xlane.f32.xlu1 %v1044_v53  ;;  %v3769_v38 = vpop.f32.mrf.mxu1  ;;  %v3801_v45 = vpop.f32.mrf.mxu0 }
 0x2e4   : > { %v1668_v39 = vsel %vm1010_vm1, %v3769_v38, -inf  ;;  %v1976_v47 = vsel %vm1010_vm1, %v3801_v45, -inf }
 0x2e5   : > { %1382 = vmax.xlane.f32.xlu0 %v1381_v58  ;;  %v1599_v48 = vpop.f32.mrf.mxu1  ;;  %v1907_v54 = vpop.f32.mrf.mxu0 }
 0x2e6   : > { %v1662_v52 = vsel %vm1010_vm1, %v1599_v48, -inf  ;;  %v1970_v57 = vsel %vm1010_vm1, %v1907_v54, -inf }
 0x2e7   : > { %1385 = vmax.xlane.f32.xlu1 %v1384_v13  ;;  %v3772_v50 = vpop.f32.mrf.mxu1  ;;  %v3804_v56 = vpop.f32.mrf.mxu0 }
 0x2e8   : > { %v1677_v59 = vsel %vm1010_vm1, %v3772_v50, -inf  ;;  %v1985_v0 = vsel %vm1010_vm1, %v3804_v56, -inf }
 0x2e9   : > { %1036 = vmax.xlane.f32.xlu0 %v1035_v16  ;;  %v1612_v43 = vpop.f32.mrf.mxu1  ;;  %v1920_v62 = vpop.f32.mrf.mxu0 }
 0x2ea   : > { %v1671_v4 = vsel %vm1010_vm1, %v1612_v43, -inf  ;;  %v1979_v9 = vsel %vm1010_vm1, %v1920_v62, -inf }
 0x2eb   : > { %1039 = vmax.xlane.f32.xlu1 %v1038_v18  ;;  %v3773_v60 = vpop.f32.mrf.mxu1  ;;  %v3805_v1 = vpop.f32.mrf.mxu0 }
 0x2ec   : > { %v1680_v63 = vsel %vm1010_vm1, %v3773_v60, -inf  ;;  %v1988_v2 = vsel %vm1010_vm1, %v3805_v1, -inf }
 0x2ed   : > { %1376 = vmax.xlane.f32.xlu0 %v1375_v24  ;;  %v1615_v3 = vpop.f32.mrf.mxu1  ;;  %v1923_v8 = vpop.f32.mrf.mxu0 }
 0x2ee   : > { %v1674_v7 = vsel %vm1010_vm1, %v1615_v3, -inf  ;;  %v1982_v11 = vsel %vm1010_vm1, %v1923_v8, -inf }
 0x2ef   : > { %1379 = vmax.xlane.f32.xlu1 %v1378_v27  ;;  %v3776_v5 = vpop.f32.mrf.mxu1  ;;  %v3808_v10 = vpop.f32.mrf.mxu0 }
 0x2f0   : > { %v1689_v53 = vsel %vm1010_vm1, %v3776_v5, -inf  ;;  %v1997_v14 = vsel %vm1010_vm1, %v3808_v10, -inf }
 0x2f1   : > { %1054 = vmax.xlane.f32.xlu0 %v1053_v28  ;;  %v1628_v40 = vpop.f32.mrf.mxu1  ;;  %v1936_v12 = vpop.f32.mrf.mxu0 }
 0x2f2   : > { %v1683_v19 = vsel %vm1010_vm1, %v1628_v40, -inf  ;;  %v1991_v27 = vsel %vm1010_vm1, %v1936_v12, -inf }
 0x2f3   : > { %1057 = vmax.xlane.f32.xlu1 %v1056_v21  ;;  %v3777_v58 = vpop.f32.mrf.mxu1  ;;  %v3809_v16 = vpop.f32.mrf.mxu0 }
 0x2f4   : > { %v1692_v13 = vsel %vm1010_vm1, %v3777_v58, -inf  ;;  %v2000_v17 = vsel %vm1010_vm1, %v3809_v16, -inf }
 0x2f5   : > { %1394 = vmax.xlane.f32.xlu0 %v1393_v31  ;;  %v1631_v18 = vpop.f32.mrf.mxu1  ;;  %v1939_v22 = vpop.f32.mrf.mxu0 }
 0x2f6   : > { %v1686_v25 = vsel %vm1010_vm1, %v1631_v18, -inf  ;;  %v1994_v23 = vsel %vm1010_vm1, %v1939_v22, -inf }
 0x2f7   : > { %1397 = vmax.xlane.f32.xlu1 %v1396_v32  ;;  %v3780_v24 = vpop.f32.mrf.mxu1  ;;  %v3812_v29 = vpop.f32.mrf.mxu0 }
 0x2f8   : > { %v1701_v21 = vsel %vm1010_vm1, %v3780_v24, -inf  ;;  %v2009_v33 = vsel %vm1010_vm1, %v3812_v29, -inf }
 0x2f9   : > { %1048 = vmax.xlane.f32.xlu0 %v1047_v46  ;;  %v1644_v28 = vpop.f32.mrf.mxu1  ;;  %v1952_v61 = vpop.f32.mrf.mxu0 }
 0x2fa   : > { %v1695_v15 = vsel %vm1010_vm1, %v1644_v28, -inf }
 0x2fb   : > { %1051 = vmax.xlane.f32.xlu1 %v1050_v51  ;;  %v3781_v31 = vpop.f32.mrf.mxu1  ;;  %v3813_v46 = vpop.f32.mrf.mxu0 }
 0x2fc   : > { %v1704_v32 = vsel %vm1010_vm1, %v3781_v31, -inf  ;;  %v2012_v6 = vsel %vm1010_vm1, %v3813_v46, -inf }
 0x2fd   : > { %1388 = vmax.xlane.f32.xlu0 %v1387_v34  ;;  %v1647_v51 = vpop.f32.mrf.mxu1  ;;  %v1955_v26 = vpop.f32.mrf.mxu0 }
 0x2fe   : > { %v1698_v35 = vsel %vm1010_vm1, %v1647_v51, -inf  ;;  %v2006_v20 = vsel %vm1010_vm1, %v1955_v26, -inf }
 0x2ff   : > { %1391 = vmax.xlane.f32.xlu1 %v1390_v36  ;;  %v3832_v34 = vpop.f32.mrf.mxu1  ;;  %v2003_v36 = vsel %vm1010_vm1, %v1952_v61, -inf  ;;  %v3864_v38 = vpop.f32.mrf.mxu0 }
 0x301   : > { %1666 = vmax.xlane.f32.xlu0 %v1665_v37  ;;  %v2212_v37 = vpop.f32.mrf.mxu1 }
 0x302   : > { %v2275_v54 = vsel %vm1010_vm1, %v2212_v37, -inf }
 0x303   : > { %1669 = vmax.xlane.f32.xlu1 %v1668_v39  ;;  %v2281_v39 = vsel %vm1010_vm1, %v3832_v34, -inf  ;;  %v3833_v41 = vpop.f32.mrf.mxu1 }
 0x304   : > { %v2284_v45 = vsel %vm1010_vm1, %v3833_v41, -inf }
 0x305   : > { %1974 = vmax.xlane.f32.xlu0 %v1973_v30  ;;  %v2520_v30 = vpop.f32.mrf.mxu0  ;;  %v2215_v48 = vpop.f32.mrf.mxu1 }
 0x307   : > { %1977 = vmax.xlane.f32.xlu1 %v1976_v47  ;;  %v2589_v47 = vsel %vm1010_vm1, %v3864_v38, -inf }
 0x309   : > { %1660 = vmax.xlane.f32.xlu0 %v1659_v49  ;;  %v3865_v49 = vpop.f32.mrf.mxu0 }
 0x30a   : > { %v2592_v50 = vsel %vm1010_vm1, %v3865_v49, -inf }
 0x30b   : > { %1663 = vmax.xlane.f32.xlu1 %v1662_v52  ;;  %v3836_v52 = vpop.f32.mrf.mxu1  ;;  %v2523_v56 = vpop.f32.mrf.mxu0 }
 0x30d   : > { %1968 = vmax.xlane.f32.xlu0 %v1967_v55  ;;  %v2278_v55 = vsel %vm1010_vm1, %v2215_v48, -inf  ;;  %v3868_v62 = vpop.f32.mrf.mxu0 }
 0x30f   : > { %1971 = vmax.xlane.f32.xlu1 %v1970_v57  ;;  %v2228_v57 = vpop.f32.mrf.mxu1 }
 0x310   : > { %v2287_v12 = vsel %vm1010_vm1, %v2228_v57, -inf }
 0x311   : > { %1678 = vmax.xlane.f32.xlu0 %v1677_v59  ;;  %v2583_v59 = vsel %vm1010_vm1, %v2520_v30, -inf  ;;  %v3837_v1 = vpop.f32.mrf.mxu1 }
 0x312   : > { %v2296_v5 = vsel %vm1010_vm1, %v3837_v1, -inf }
 0x313   : > { %1681 = vmax.xlane.f32.xlu1 %v1680_v63  ;;  %v2586_v63 = vsel %vm1010_vm1, %v2523_v56, -inf  ;;  %v2231_v8 = vpop.f32.mrf.mxu1 }
 0x314   : > { %v2290_v16 = vsel %vm1010_vm1, %v2231_v8, -inf }
 0x315   : > { %1986 = vmax.xlane.f32.xlu0 %v1985_v0 }
 0x317   : > { %1989 = vmax.xlane.f32.xlu1 %v1988_v2  ;;  %v2293_v2 = vsel %vm1010_vm1, %v3836_v52, -inf }
 0x319   : > { %1672 = vmax.xlane.f32.xlu0 %v1671_v4  ;;  %v2536_v4 = vpop.f32.mrf.mxu0 }
 0x31a   : > { %v2595_v24 = vsel %vm1010_vm1, %v2536_v4, -inf }
 0x31b   : > { %1675 = vmax.xlane.f32.xlu1 %v1674_v7  ;;  %v3869_v10 = vpop.f32.mrf.mxu0 }
 0x31d   : > { %1980 = vmax.xlane.f32.xlu0 %v1979_v9  ;;  %v2601_v9 = vsel %vm1010_vm1, %v3868_v62, -inf  ;;  %v2539_v18 = vpop.f32.mrf.mxu0 }
 0x31e   : > { %v2598_v28 = vsel %vm1010_vm1, %v2539_v18, -inf }
 0x31f   : > { %1983 = vmax.xlane.f32.xlu1 %v1982_v11  ;;  %v3840_v11 = vpop.f32.mrf.mxu1 }
 0x321   : > { %1690 = vmax.xlane.f32.xlu0 %v1689_v53  ;;  %v2604_v53 = vsel %vm1010_vm1, %v3869_v10, -inf }
 0x323   : > { %1693 = vmax.xlane.f32.xlu1 %v1692_v13 }
 0x325   : > { %1998 = vmax.xlane.f32.xlu0 %v1997_v14  ;;  %v2244_v14 = vpop.f32.mrf.mxu1 }
 0x327   : > { %2001 = vmax.xlane.f32.xlu1 %v2000_v17  ;;  %v3841_v22 = vpop.f32.mrf.mxu1 }
 0x329   : > { %1684 = vmax.xlane.f32.xlu0 %v1683_v19  ;;  %v4691_v19 = vand.u32 127, %v367_v42  ;;  %v2247_v61 = vpop.f32.mrf.mxu1 }
 0x32a   : > { %v2302_v56 = vsel %vm1010_vm1, %v2247_v61, -inf }
 0x32b   : > { %1687 = vmax.xlane.f32.xlu1 %v1686_v25  ;;  %v1082_v29 = vadd.s32 4294967288, %v4691_v19  ;;  %v3844_v51 = vpop.f32.mrf.mxu1  ;;  %v1096_v26 = vadd.s32 4294967272, %v4691_v19  ;;  %v1103_v37 = vadd.s32 4294967264, %v4691_v19  ;;  %v1110_v48 = vadd.s32 4294967256, %v4691_v19 }
 0x32c   : > { %v1117_v1 = vadd.s32 4294967248, %v4691_v19 }
 0x32d   : > { %1992 = vmax.xlane.f32.xlu0 %v1991_v27  ;;  %v3872_v27 = vpop.f32.mrf.mxu0  ;;  %v2260_v30 = vpop.f32.mrf.mxu1  ;;  %v4736_v52 = vsub.s32 %v1103_v37, %v4347_v44  ;;  %v4753_v4 = vsub.s32 %v1110_v48, %v4347_v44 }
 0x32e   : > { %v2613_v34 = vsel %vm1010_vm1, %v3872_v27, -inf  ;;  %v4772_v18 = vsub.s32 %v1117_v1, %v4347_v44 }
 0x32f   : > { %1995 = vmax.xlane.f32.xlu1 %v1994_v23  ;;  %v2552_v42 = vpop.f32.mrf.mxu0  ;;  %v4746_v62 = vpop.f32.mrf.mxu1 }
 0x331   : > { %1702 = vmax.xlane.f32.xlu0 %v1701_v21  ;;  %v2305_v21 = vsel %vm1010_vm1, %v3840_v11, -inf }
 0x333   : > { %1705 = vmax.xlane.f32.xlu1 %v1704_v32  ;;  %v4704_v32 = vsub.s32 %v1082_v29, %v4347_v44 }
 0x335   : > { %2010 = vmax.xlane.f32.xlu0 %v2009_v33  ;;  %v2308_v33 = vsel %vm1010_vm1, %v3841_v22, -inf }
 0x337   : > { %2013 = vmax.xlane.f32.xlu1 %v2012_v6  ;;  %v1089_v6 = vadd.s32 4294967280, %v4691_v19 }
 0x339   : > { %1696 = vmax.xlane.f32.xlu0 %v1695_v15  ;;  %v4712_v15 = vsub.s32 %v4691_v19, %v4347_v44  ;;  %v4724_v41 = vsub.s32 %v1089_v6, %v4347_v44 }
 0x33b   : > { %1699 = vmax.xlane.f32.xlu1 %v1698_v35 }
 0x33d   : > { %2004 = vmax.xlane.f32.xlu0 %v2003_v36  ;;  %v3873_v36 = vpop.f32.mrf.mxu0 }
 0x33f   : > { %2007 = vmax.xlane.f32.xlu1 %v2006_v20  ;;  %v2616_v20 = vsel %vm1010_vm1, %v3873_v36, -inf }
 0x341   : > { %2282 = vmax.xlane.f32.xlu0 %v2281_v39 }
 0x343   : > { %2285 = vmax.xlane.f32.xlu1 %v2284_v45 }
 0x345   : > { %2590 = vmax.xlane.f32.xlu0 %v2589_v47  ;;  %v2299_v47 = vsel %vm1010_vm1, %v2244_v14, -inf  ;;  %v2263_v14 = vpop.f32.mrf.mxu1 }
 0x347   : > { %2593 = vmax.xlane.f32.xlu1 %v2592_v50  ;;  %v4733_v50 = vsub.s32 %v1096_v26, %v4347_v44 }
 0x349   : > { %2276 = vmax.xlane.f32.xlu0 %v2275_v54 }
 0x34a   : > { %v4666_v43 = vpop.xlane.xlu0 %1018 }
 0x34b   : > { %2279 = vmax.xlane.f32.xlu1 %v2278_v55 }
 0x34c   : > { %v4669_v60 = vpop.xlane.xlu1 %1012 }
 0x34d   : > { %2584 = vmax.xlane.f32.xlu0 %v2583_v59  ;;  %v1081_v45 = vrot.slane %v4669_v60, %v4712_v15  ;;  %v1093_v59 = vrot.slane %v4666_v43, %v4724_v41  ;;  %v2555_v60 = vpop.f32.mrf.mxu0 }
 0x34e   : > { %v4672_v0 = vpop.xlane.xlu0 %1358  ;;  %v2610_v11 = vsel %vm1010_vm1, %v2555_v60, -inf }
 0x34f   : > { %2587 = vmax.xlane.f32.xlu1 %v2586_v63 }
 0x350   : > { %v4675_v3 = vpop.xlane.xlu1 %1021 }
 0x351   : > { %2294 = vmax.xlane.f32.xlu0 %v2293_v2  ;;  %v2607_v2 = vsel %vm1010_vm1, %v2552_v42, -inf  ;;  %v4784_v42 = vpop.f32.mrf.mxu1 }
 0x352   : > { %v4678_v7 = vpop.xlane.xlu0 %1352 }
 0x353   : > { %2297 = vmax.xlane.f32.xlu1 %v2296_v5  ;;  %v1419_v63 = vrot.slane %v4678_v7, %v4712_v15  ;;  %v1100_v7 = vrot.slane %v4675_v3, %v4733_v50 }
 0x354   : > { %v4681_v40 = vpop.xlane.xlu1 %1361 }
 0x355   : > { %2602 = vmax.xlane.f32.xlu0 %v2601_v9  ;;  %v3876_v9 = vpop.f32.mrf.mxu0  ;;  %v1433_v61 = vrot.slane %v4681_v40, %v4733_v50  ;;  %v2311_v40 = vsel %vm1010_vm1, %v2260_v30, -inf }
 0x356   : > { %v1016_v58 = vpop.xlane.xlu0 %1015  ;;  %v2625_v22 = vsel %vm1010_vm1, %v3876_v9, -inf }
 0x357   : > { %2605 = vmax.xlane.f32.xlu1 %v2604_v53  ;;  %v1086_v38 = vrot.slane %v1016_v58, %v4704_v32  ;;  %v2317_v53 = vsel %vm1010_vm1, %v3844_v51, -inf }
 0x358   : > { %v4685_v13 = vpop.xlane.xlu1 %1355 }
 0x359   : > { %2288 = vmax.xlane.f32.xlu0 %v2287_v12  ;;  %v1088_v54 = vsel %vm1087_vm2, %v1086_v38, %v1081_v45  ;;  %v1423_v55 = vrot.slane %v4685_v13, %v4704_v32  ;;  %v1428_v12 = vrot.slane %v4672_v0, %v4724_v41  ;;  %v1124_v13 = vadd.s32 4294967240, %v4691_v19  ;;  %v4804_v45 = vpop.f32.mrf.mxu1 }
 0x35a   : > { %v4688_v17 = vpop.xlane.xlu0 %1030  ;;  %v1095_v8 = vsel %vm1094_vm3, %v1093_v59, %v1088_v54  ;;  %v1152_v54 = vadd.s32 4294967208, %v4691_v19 }
 0x35b   : > { %2291 = vmax.xlane.f32.xlu1 %v2290_v16  ;;  %v1424_v10 = vsel %vm1087_vm2, %v1423_v55, %v1419_v63  ;;  %v1131_v16 = vadd.s32 4294967232, %v4691_v19  ;;  %v1102_v3 = vsel %vm1101_vm4, %v1100_v7, %v1095_v8  ;;  %v4790_v6 = vsub.s32 %v1124_v13, %v4347_v44 }
 0x35c   : > { %v4694_v25 = vpop.xlane.xlu1 %1033  ;;  %v1429_v0 = vsel %vm1094_vm3, %v1428_v12, %v1424_v10  ;;  %v1121_v37 = vrot.slane %v4688_v17, %v4772_v18  ;;  %v4836_v13 = vsub.s32 %v1152_v54, %v4347_v44 }
 0x35d   : > { %2596 = vmax.xlane.f32.xlu0 %v2595_v24  ;;  %v4793_v51 = vsub.s32 %v1131_v16, %v4347_v44  ;;  %v1128_v55 = vrot.slane %v4694_v25, %v4790_v6 }
 0x35e   : > { %v4698_v23 = vpop.xlane.xlu0 %1370 }
 0x35f   : > { %2599 = vmax.xlane.f32.xlu1 %v2598_v28  ;;  %v1448_v63 = vrot.slane %v4698_v23, %v4772_v18 }
 0x360   : > { %v4701_v31 = vpop.xlane.xlu1 %1373 }
 0x361   : > { %2306 = vmax.xlane.f32.xlu0 %v2305_v21  ;;  %v2568_v21 = vpop.f32.mrf.mxu0  ;;  %v1453_v12 = vrot.slane %v4701_v31, %v4790_v6 }
 0x362   : > { %v4707_v46 = vpop.xlane.xlu0 %1024  ;;  %v2619_v59 = vsel %vm1010_vm1, %v2568_v21, -inf }
 0x363   : > { %2309 = vmax.xlane.f32.xlu1 %v2308_v33  ;;  %v1107_v43 = vrot.slane %v4707_v46, %v4736_v52  ;;  %v1138_v46 = vadd.s32 4294967224, %v4691_v19 }
 0x364   : > { %v4715_v35 = vpop.xlane.xlu1 %1027 }
 0x365   : > { %2614 = vmax.xlane.f32.xlu0 %v2613_v34  ;;  %v1114_v24 = vrot.slane %v4715_v35, %v4753_v4  ;;  %v1109_v28 = vsel %vm1108_vm5, %v1107_v43, %v1102_v3  ;;  %v1434_v35 = vsel %vm1101_vm4, %v1433_v61, %v1429_v0  ;;  %v4808_v48 = vsub.s32 %v1138_v46, %v4347_v44 }
 0x366   : > { %v4721_v39 = vpop.xlane.xlu0 %1364  ;;  %v2314_v43 = vsel %vm1010_vm1, %v2263_v14, -inf  ;;  %v2320_v14 = vsel %vm1010_vm1, %v4746_v62, -inf }
 0x367   : > { %2617 = vmax.xlane.f32.xlu1 %v2616_v20  ;;  %v1438_v29 = vrot.slane %v4721_v39, %v4736_v52  ;;  %v1116_v34 = vsel %vm1115_vm6, %v1114_v24, %v1109_v28  ;;  %v1145_v20 = vadd.s32 4294967216, %v4691_v19  ;;  %v3877_v39 = vpop.f32.mrf.mxu0  ;;  %v1173_v24 = vadd.s32 4294967184, %v4691_v19 }
 0x368   : > { %v4730_v49 = vpop.xlane.xlu1 %1367  ;;  %v1123_v30 = vsel %vm1122_vm7, %v1121_v37, %v1116_v34  ;;  %v1166_v28 = vadd.s32 4294967192, %v4691_v19  ;;  %v1180_v34 = vadd.s32 4294967176, %v4691_v19 }
 0x369   : > { %2300 = vmax.xlane.f32.xlu0 %v2299_v47  ;;  %v1443_v26 = vrot.slane %v4730_v49, %v4753_v4  ;;  %v1439_v38 = vsel %vm1108_vm5, %v1438_v29, %v1434_v35  ;;  %v2628_v47 = vsel %vm1010_vm1, %v3877_v39, -inf  ;;  %v4820_v1 = vsub.s32 %v1145_v20, %v4347_v44  ;;  %v2571_v8 = vpop.f32.mrf.mxu0 }
 0x36a   : > { %v4742_v57 = vpop.xlane.xlu0 %1042  ;;  %v1130_v25 = vsel %vm1129_vm8, %v1128_v55, %v1123_v30  ;;  %v2622_v3 = vsel %vm1010_vm1, %v2571_v8, -inf  ;;  %v4870_v39 = vsub.s32 %v1173_v24, %v4347_v44 }
 0x36b   : > { %2303 = vmax.xlane.f32.xlu1 %v2302_v56  ;;  %v1444_v56 = vsel %vm1115_vm6, %v1443_v26, %v1439_v38 }
 0x36c   : > { %v4755_v5 = vpop.xlane.xlu1 %1045  ;;  %v1449_v10 = vsel %vm1122_vm7, %v1448_v63, %v1444_v56 }
 0x36d   : > { %2608 = vmax.xlane.f32.xlu0 %v2607_v2  ;;  %v4822_v2 = vpop.f32.mrf.mxu1  ;;  %v1454_v29 = vsel %vm1129_vm8, %v1453_v12, %v1449_v10 }
 0x36e   : > { %v4765_v58 = vpop.xlane.xlu0 %1382 }
 0x36f   : > { %2611 = vmax.xlane.f32.xlu1 %v2610_v11  ;;  %v2831_v0 = vpop.f32.mrf.mxu1 }
 0x370   : > { %v4778_v27 = vpop.xlane.xlu1 %1385  ;;  %v2894_v24 = vsel %vm1010_vm1, %v2831_v0, -inf }
 0x371   : > { %2318 = vmax.xlane.f32.xlu0 %v2317_v53  ;;  %v1159_v53 = vadd.s32 4294967200, %v4691_v19  ;;  %v4858_v26 = vpop.f32.mrf.mxu1  ;;  %v1156_v19 = vrot.slane %v4755_v5, %v4836_v13  ;;  %v2891_v5 = vsel %vm1010_vm1, %v4804_v45, -inf }
 0x372   : > { %v1037_v33 = vpop.xlane.xlu0 %1036 }
 0x373   : > { %2626 = vmax.xlane.f32.xlu1 %v2625_v22  ;;  %v1135_v17 = vrot.slane %v1037_v33, %v4793_v51  ;;  %v3928_v22 = vpop.f32.mrf.mxu0  ;;  %v1149_v33 = vrot.slane %v4742_v57, %v4820_v1  ;;  %v4856_v35 = vsub.s32 %v1159_v53, %v4347_v44  ;;  %v4864_v57 = vsub.s32 %v1166_v28, %v4347_v44  ;;  %v4878_v54 = vpop.f32.mrf.mxu1 }
 0x374   : > { %v1040_v36 = vpop.xlane.xlu1 %1039  ;;  %v3205_v62 = vsel %vm1010_vm1, %v3928_v22, -inf }
 0x375   : > { %2312 = vmax.xlane.f32.xlu0 %v2311_v40  ;;  %v1142_v9 = vrot.slane %v1040_v36, %v4808_v48  ;;  %v1137_v23 = vsel %vm1136_vm9, %v1135_v17, %v1130_v25  ;;  %v2897_v40 = vsel %vm1010_vm1, %v4784_v42, -inf  ;;  %v3136_v38 = vpop.f32.mrf.mxu0  ;;  %v1468_v42 = vrot.slane %v4765_v58, %v4820_v1  ;;  %v1059_v25 = vld [vmem:[%s4625_s30] sm:$0x1] }
 0x376   : > { %v1377_v49 = vpop.xlane.xlu0 %1376 }
 0x377   : > { %2629 = vmax.xlane.f32.xlu1 %v2628_v47  ;;  %v1458_v11 = vrot.slane %v1377_v49, %v4793_v51  ;;  %v1144_v31 = vsel %vm1143_vm10, %v1142_v9, %v1137_v23  ;;  %v4875_v49 = vsub.s32 %v1180_v34, %v4347_v44  ;;  %v3901_v23 = vpop.f32.mrf.mxu1 }
 0x378   : > { %v1380_v60 = vpop.xlane.xlu1 %1379  ;;  %v1151_v37 = vsel %vm1150_vm11, %v1149_v33, %v1144_v31 }
 0x379   : > { %2620 = vmax.xlane.f32.xlu0 %v2619_v59  ;;  %v1463_v21 = vrot.slane %v1380_v60, %v4808_v48  ;;  %v1459_v46 = vsel %vm1136_vm9, %v1458_v11, %v1454_v29  ;;  %v1158_v17 = vsel %vm1157_vm12, %v1156_v19, %v1151_v37  ;;  %v3929_v59 = vpop.f32.mrf.mxu0  ;;  %v1473_v60 = vrot.slane %v4778_v27, %v4836_v13  ;;  %v2847_v33 = vpop.f32.mrf.mxu1 }
 0x37a   : > { %v4827_v7 = vpop.xlane.xlu0 %1054  ;;  %v3208_v63 = vsel %vm1010_vm1, %v3929_v59, -inf  ;;  %v3199_v27 = vsel %vm1010_vm1, %v3136_v38, -inf  ;;  %v2903_v59 = vsel %vm1010_vm1, %v4878_v54, -inf }
 0x37b   : > { %2315 = vmax.xlane.f32.xlu1 %v2314_v43  ;;  %v1464_v20 = vsel %vm1143_vm10, %v1463_v21, %v1459_v46  ;;  %v1177_v45 = vrot.slane %v4827_v7, %v4870_v39  ;;  %v3139_v29 = vpop.f32.mrf.mxu0  ;;  %v1399_v21 = vld [vmem:[%s4625_s30 + $0x1] sm:$0x1]  ;;  %v2900_v46 = vsel %vm1010_vm1, %v4822_v2, -inf  ;;  %v2909_v2 = vsel %vm1010_vm1, %v4858_v26, -inf }
 0x37c   : > { %v4840_v16 = vpop.xlane.xlu1 %1057  ;;  %v1469_v56 = vsel %vm1150_vm11, %v1468_v42, %v1464_v20  ;;  %v3202_v37 = vsel %vm1010_vm1, %v3139_v29, -inf  ;;  %v2912_v26 = vsel %vm1010_vm1, %v3901_v23, -inf }
 0x37d   : > { %2321 = vmax.xlane.f32.xlu0 %v2320_v14  ;;  %v1184_v43 = vrot.slane %v4840_v16, %v4875_v49  ;;  %v1474_v7 = vsel %vm1157_vm12, %v1473_v60, %v1469_v56 }
 0x37e   : > { %v4849_v61 = vpop.xlane.xlu0 %1394 }
 0x37f   : > { %2623 = vmax.xlane.f32.xlu1 %v2622_v3  ;;  %v1488_v3 = vrot.slane %v4849_v61, %v4870_v39 }
 0x380   : > { %v1398_v36 = vpop.xlane.xlu1 %1397 }
 0x381   : > { %3206 = vmax.xlane.f32.xlu0 %v3205_v62  ;;  %v1493_v31 = vrot.slane %v1398_v36, %v4875_v49  ;;  %v3904_v36 = vpop.f32.mrf.mxu1 }
 0x382   : > { %v1049_v47 = vpop.xlane.xlu0 %1048 }
 0x383   : > { %v1163_v30 = vrot.slane %v1049_v47, %v4856_v35  ;;  %2898 = vmax.xlane.f32.xlu1 %v2897_v40  ;;  %v3932_v40 = vpop.f32.mrf.mxu0  ;;  %v2860_v42 = vpop.f32.mrf.mxu1 }
 0x384   : > { %v1052_v55 = vpop.xlane.xlu1 %1051  ;;  %v3217_v19 = vsel %vm1010_vm1, %v3932_v40, -inf  ;;  %v2915_v29 = vsel %vm1010_vm1, %v2860_v42, -inf }
 0x385   : > { %v1165_v58 = vsel %vm1164_vm13, %v1163_v30, %v1158_v17  ;;  %v1170_v44 = vrot.slane %v1052_v55, %v4864_v57  ;;  %2892 = vmax.xlane.f32.xlu0 %v2891_v5  ;;  %v3152_v5 = vpop.f32.mrf.mxu0  ;;  %v3905_v56 = vpop.f32.mrf.mxu1 }
 0x386   : > { %v1389_v8 = vpop.xlane.xlu0 %1388  ;;  %v3211_v17 = vsel %vm1010_vm1, %v3152_v5, -inf }
 0x387   : > { %v1172_v9 = vsel %vm1171_vm14, %v1170_v44, %v1165_v58  ;;  %v1478_v10 = vrot.slane %v1389_v8, %v4856_v35  ;;  %3209 = vmax.xlane.f32.xlu1 %v3208_v63  ;;  %v3933_v44 = vpop.f32.mrf.mxu0 }
 0x388   : > { %v1179_v11 = vsel %vm1178_vm15, %v1177_v45, %v1172_v9  ;;  %v1392_v53 = vpop.xlane.xlu1 %1391  ;;  %v2863_v45 = vpop.f32.mrf.mxu1  ;;  %v3220_v63 = vsel %vm1010_vm1, %v3933_v44, -inf  ;;  %v2906_v9 = vsel %vm1010_vm1, %v2847_v33, -inf }
 0x389   : > { %v1186_v12 = vsel %vm1185_vm0, %v1184_v43, %v1179_v11  ;;  %v1479_v14 = vsel %vm1164_vm13, %v1478_v10, %v1474_v7  ;;  %v1483_v16 = vrot.slane %v1392_v53, %v4864_v57  ;;  %3200 = vmax.xlane.f32.xlu0 %v3199_v27  ;;  %v3155_v43 = vpop.f32.mrf.mxu0  ;;  %v2921_v53 = vsel %vm1010_vm1, %v3904_v36, -inf }
 0x38a   : > { %v1188_v22 = vmax.f32 %v1059_v25, %v1186_v12  ;;  %v4905_v28 = vpop.xlane.xlu0 %1666  ;;  %v3908_v25 = vpop.f32.mrf.mxu1  ;;  %v3214_v27 = vsel %vm1010_vm1, %v3155_v43, -inf  ;;  %v2918_v5 = vsel %vm1010_vm1, %v2863_v45, -inf }
 0x38b   : > { %v1484_v62 = vsel %vm1171_vm14, %v1483_v16, %v1479_v14  ;;  %2895 = vmax.xlane.f32.xlu1 %v2894_v24  ;;  %v3936_v54 = vpop.f32.mrf.mxu0  ;;  %v2933_v43 = vsel %vm1010_vm1, %v3908_v25, -inf }
 0x38c   : > { %1189 = vst [vmem:[%s4625_s30] sm:$0x1] %v1188_v22  ;;  %v1489_v61 = vsel %vm1178_vm15, %v1488_v3, %v1484_v62  ;;  %v4914_v34 = vpop.xlane.xlu1 %1669  ;;  %v3229_v23 = vsel %vm1010_vm1, %v3936_v54, -inf  ;;  %v2876_v7 = vpop.f32.mrf.mxu1 }
 0x38d   : > { %v1494_v0 = vsel %vm1185_vm0, %v1493_v31, %v1489_v61  ;;  %2901 = vmax.xlane.f32.xlu0 %v2900_v46  ;;  %v3168_v16 = vpop.f32.mrf.mxu0  ;;  %v2924_v61 = vsel %vm1010_vm1, %v3905_v56, -inf }
 0x38e   : > { %v1496_v38 = vmax.f32 %v1399_v21, %v1494_v0  ;;  %v4919_v20 = vpop.xlane.xlu0 %1974  ;;  %v4943_v3 = vpop.f32.mrf.mxu1  ;;  %v3223_v24 = vsel %vm1010_vm1, %v3168_v16, -inf }
 0x38f   : > { %3203 = vmax.xlane.f32.xlu1 %v3202_v37  ;;  %v3937_v62 = vpop.f32.mrf.mxu0 }
 0x390   : > { %1497 = vst [vmem:[%s4625_s30 + $0x1] sm:$0x1] %v1496_v38  ;;  %v4924_v47 = vpop.xlane.xlu1 %1977  ;;  %v2879_v33 = vpop.f32.mrf.mxu1  ;;  %v3232_v37 = vsel %vm1010_vm1, %v3937_v62, -inf }
 0x391   : > { %3218 = vmax.xlane.f32.xlu0 %v3217_v19  ;;  %v1736_v19 = vrot.slane %v4905_v28, %v4724_v41 }
 0x392   : > { %v1661_v30 = vpop.xlane.xlu0 %1660  ;;  %v3940_v42 = vpop.f32.mrf.mxu1 }
 0x393   : > { %2910 = vmax.xlane.f32.xlu1 %v2909_v2  ;;  %v1727_v46 = vrot.slane %v1661_v30, %v4712_v15  ;;  %v3171_v2 = vpop.f32.mrf.mxu0 }
 0x394   : > { %v1664_v55 = vpop.xlane.xlu1 %1663  ;;  %v3226_v28 = vsel %vm1010_vm1, %v3171_v2, -inf }
 0x395   : > { %3212 = vmax.xlane.f32.xlu0 %v3211_v17  ;;  %v1731_v31 = vrot.slane %v1664_v55, %v4704_v32 }
 0x396   : > { %v1969_v58 = vpop.xlane.xlu0 %1968 }
 0x397   : > { %2904 = vmax.xlane.f32.xlu1 %v2903_v59  ;;  %v1732_v40 = vsel %vm1087_vm2, %v1731_v31, %v1727_v46  ;;  %v2035_v30 = vrot.slane %v1969_v58, %v4712_v15  ;;  %v1741_v59 = vrot.slane %v4914_v34, %v4733_v50  ;;  %v2044_v58 = vrot.slane %v4919_v20, %v4724_v41 }
 0x398   : > { %v1972_v60 = vpop.xlane.xlu1 %1971  ;;  %v1737_v55 = vsel %vm1094_vm3, %v1736_v19, %v1732_v40  ;;  %v2049_v20 = vrot.slane %v4924_v47, %v4733_v50  ;;  %v3241_v47 = vsel %vm1010_vm1, %v3940_v42, -inf }
 0x399   : > { %2913 = vmax.xlane.f32.xlu0 %v2912_v26  ;;  %v2039_v36 = vrot.slane %v1972_v60, %v4704_v32  ;;  %v3184_v60 = vpop.f32.mrf.mxu1  ;;  %v1742_v45 = vsel %vm1101_vm4, %v1741_v59, %v1737_v55 }
 0x39a   : > { %v4931_v8 = vpop.xlane.xlu0 %1678  ;;  %v3235_v40 = vsel %vm1010_vm1, %v3184_v60, -inf }
 0x39b   : > { %3221 = vmax.xlane.f32.xlu1 %v3220_v63  ;;  %v2040_v44 = vsel %vm1087_vm2, %v2039_v36, %v2035_v30 }
 0x39c   : > { %v4934_v10 = vpop.xlane.xlu1 %1681  ;;  %v2045_v34 = vsel %vm1094_vm3, %v2044_v58, %v2040_v44 }
 0x39d   : > { %2907 = vmax.xlane.f32.xlu0 %v2906_v9  ;;  %v2050_v25 = vsel %vm1101_vm4, %v2049_v20, %v2045_v34 }
 0x39e   : > { %v4938_v11 = vpop.xlane.xlu0 %1986 }
 0x39f   : > { %3215 = vmax.xlane.f32.xlu1 %v3214_v27  ;;  %v2064_v36 = vrot.slane %v4938_v11, %v4772_v18  ;;  %v2936_v11 = vsel %vm1010_vm1, %v4943_v3, -inf }
 0x3a0   : > { %v4941_v12 = vpop.xlane.xlu1 %1989 }
 0x3a1   : > { %3230 = vmax.xlane.f32.xlu0 %v3229_v23  ;;  %v2927_v23 = vsel %vm1010_vm1, %v2876_v7, -inf  ;;  %v2069_v55 = vrot.slane %v4941_v12, %v4790_v6 }
 0x3a2   : > { %v1673_v14 = vpop.xlane.xlu0 %1672 }
 0x3a3   : > { %2922 = vmax.xlane.f32.xlu1 %v2921_v53  ;;  %v1746_v56 = vrot.slane %v1673_v14, %v4736_v52  ;;  %v3941_v14 = vpop.f32.mrf.mxu1 }
 0x3a4   : > { %v1676_v22 = vpop.xlane.xlu1 %1675  ;;  %v3244_v59 = vsel %vm1010_vm1, %v3941_v14, -inf }
 0x3a5   : > { %3224 = vmax.xlane.f32.xlu0 %v3223_v24  ;;  %v1751_v63 = vrot.slane %v1676_v22, %v4753_v4  ;;  %v1747_v54 = vsel %vm1108_vm5, %v1746_v56, %v1742_v45  ;;  %v2930_v22 = vsel %vm1010_vm1, %v2879_v33, -inf }
 0x3a6   : > { %v1981_v21 = vpop.xlane.xlu0 %1980 }
 0x3a7   : > { %2916 = vmax.xlane.f32.xlu1 %v2915_v29  ;;  %v2054_v27 = vrot.slane %v1981_v21, %v4736_v52  ;;  %v1752_v16 = vsel %vm1115_vm6, %v1751_v63, %v1747_v54  ;;  %v1756_v29 = vrot.slane %v4931_v8, %v4772_v18 }
 0x3a8   : > { %v1984_v0 = vpop.xlane.xlu1 %1983 }
 0x3a9   : > { %2925 = vmax.xlane.f32.xlu0 %v2924_v61  ;;  %v2059_v24 = vrot.slane %v1984_v0, %v4753_v4  ;;  %v2055_v21 = vsel %vm1108_vm5, %v2054_v27, %v2050_v25  ;;  %v1757_v62 = vsel %vm1122_vm7, %v1756_v29, %v1752_v16  ;;  %v3187_v61 = vpop.f32.mrf.mxu1  ;;  %v1761_v0 = vrot.slane %v4934_v10, %v4790_v6 }
 0x3aa   : > { %v4953_v38 = vpop.xlane.xlu0 %1690  ;;  %v3238_v19 = vsel %vm1010_vm1, %v3187_v61, -inf }
 0x3ab   : > { %3233 = vmax.xlane.f32.xlu1 %v3232_v37  ;;  %v2060_v33 = vsel %vm1115_vm6, %v2059_v24, %v2055_v21  ;;  %v1762_v37 = vsel %vm1129_vm8, %v1761_v0, %v1757_v62  ;;  %v1776_v45 = vrot.slane %v4953_v38, %v4820_v1 }
 0x3ac   : > { %v4959_v17 = vpop.xlane.xlu1 %1693  ;;  %v2065_v30 = vsel %vm1122_vm7, %v2064_v36, %v2060_v33 }
 0x3ad   : > { %2919 = vmax.xlane.f32.xlu0 %v2918_v5 }
 0x3ae   : > { %v4967_v26 = vpop.xlane.xlu0 %1998 }
 0x3af   : > { %3227 = vmax.xlane.f32.xlu1 %v3226_v28  ;;  %v2070_v28 = vsel %vm1129_vm8, %v2069_v55, %v2065_v30  ;;  %v2084_v27 = vrot.slane %v4967_v26, %v4820_v1 }
 0x3b0   : > { %v4974_v9 = vpop.xlane.xlu1 %2001 }
 0x3b1   : > { %2934 = vmax.xlane.f32.xlu0 %v2933_v43  ;;  %v1781_v43 = vrot.slane %v4959_v17, %v4836_v13  ;;  %v2089_v17 = vrot.slane %v4974_v9, %v4836_v13 }
 0x3b2   : > { %v1685_v53 = vpop.xlane.xlu0 %1684 }
 0x3b3   : > { %2928 = vmax.xlane.f32.xlu1 %v2927_v23  ;;  %v1766_v46 = vrot.slane %v1685_v53, %v4793_v51 }
 0x3b4   : > { %v1688_v31 = vpop.xlane.xlu1 %1687 }
 0x3b5   : > { %2931 = vmax.xlane.f32.xlu0 %v2930_v22  ;;  %v1771_v2 = vrot.slane %v1688_v31, %v4808_v48  ;;  %v1767_v10 = vsel %vm1136_vm9, %v1766_v46, %v1762_v37  ;;  %v1707_v22 = vld [vmem:[%s4625_s30 + $0x2] sm:$0x1] }
 0x3b6   : > { %v1993_v7 = vpop.xlane.xlu0 %1992 }
 0x3b7   : > { %3242 = vmax.xlane.f32.xlu1 %v3241_v47  ;;  %v2074_v5 = vrot.slane %v1993_v7, %v4793_v51  ;;  %v1772_v44 = vsel %vm1143_vm10, %v1771_v2, %v1767_v10 }
 0x3b8   : > { %v1996_v8 = vpop.xlane.xlu1 %1995  ;;  %v1777_v3 = vsel %vm1150_vm11, %v1776_v45, %v1772_v44 }
 0x3b9   : > { %3236 = vmax.xlane.f32.xlu0 %v3235_v40  ;;  %v2079_v58 = vrot.slane %v1996_v8, %v4808_v48  ;;  %v2075_v63 = vsel %vm1136_vm9, %v2074_v5, %v2070_v28  ;;  %v1782_v38 = vsel %vm1157_vm12, %v1781_v43, %v1777_v3  ;;  %v2015_v8 = vld [vmem:[%s4625_s30 + $0x3] sm:$0x1] }
 0x3ba   : > { %v1703_v42 = vpop.xlane.xlu0 %1702 }
 0x3bb   : > { %3239 = vmax.xlane.f32.xlu1 %v3238_v19  ;;  %v2080_v34 = vsel %vm1143_vm10, %v2079_v58, %v2075_v63  ;;  %v1796_v25 = vrot.slane %v1703_v42, %v4870_v39 }
 0x3bc   : > { %v1706_v56 = vpop.xlane.xlu1 %1705  ;;  %v2085_v53 = vsel %vm1150_vm11, %v2084_v27, %v2080_v34 }
 0x3bd   : > { %2937 = vmax.xlane.f32.xlu0 %v2936_v11  ;;  %v1801_v26 = vrot.slane %v1706_v56, %v4875_v49  ;;  %v2090_v47 = vsel %vm1157_vm12, %v2089_v17, %v2085_v53 }
 0x3be   : > { %v2011_v60 = vpop.xlane.xlu0 %2010 }
 0x3bf   : > { %3245 = vmax.xlane.f32.xlu1 %v3244_v59  ;;  %v2104_v61 = vrot.slane %v2011_v60, %v4870_v39 }
 0x3c0   : > { %v2014_v12 = vpop.xlane.xlu1 %2013 }
 0x3c1   : > { %v2109_v40 = vrot.slane %v2014_v12, %v4875_v49 }
 0x3c2   : > { %v1697_v54 = vpop.xlane.xlu0 %1696 }
 0x3c3   : > { %v1786_v20 = vrot.slane %v1697_v54, %v4856_v35 }
 0x3c4   : > { %v1700_v23 = vpop.xlane.xlu1 %1699 }
 0x3c5   : > { %v1787_v14 = vsel %vm1164_vm13, %v1786_v20, %v1782_v38  ;;  %v1791_v16 = vrot.slane %v1700_v23, %v4864_v57 }
 0x3c6   : > { %v2005_v24 = vpop.xlane.xlu0 %2004 }
 0x3c7   : > { %v1792_v31 = vsel %vm1171_vm14, %v1791_v16, %v1787_v14  ;;  %v2094_v29 = vrot.slane %v2005_v24, %v4856_v35 }
 0x3c8   : > { %v1797_v21 = vsel %vm1178_vm15, %v1796_v25, %v1792_v31  ;;  %v2008_v7 = vpop.xlane.xlu1 %2007 }
 0x3c9   : > { %v1802_v9 = vsel %vm1185_vm0, %v1801_v26, %v1797_v21  ;;  %v2095_v62 = vsel %vm1164_vm13, %v2094_v29, %v2090_v47  ;;  %v2099_v46 = vrot.slane %v2008_v7, %v4864_v57 }
 0x3ca   : > { %v1804_v0 = vmax.f32 %v1707_v22, %v1802_v9  ;;  %v2283_v33 = vpop.xlane.xlu0 %2282 }
 0x3cb   : > { %v2100_v36 = vsel %vm1171_vm14, %v2099_v46, %v2095_v62  ;;  %v2352_v20 = vrot.slane %v2283_v33, %v4724_v41 }
 0x3cc   : > { %1805 = vst [vmem:[%s4625_s30 + $0x2] sm:$0x1] %v1804_v0  ;;  %v2105_v37 = vsel %vm1178_vm15, %v2104_v61, %v2100_v36  ;;  %v2286_v19 = vpop.xlane.xlu1 %2285 }
 0x3cd   : > { %v2110_v2 = vsel %vm1185_vm0, %v2109_v40, %v2105_v37  ;;  %v2357_v17 = vrot.slane %v2286_v19, %v4733_v50 }
 0x3ce   : > { %v2112_v42 = vmax.f32 %v2015_v8, %v2110_v2  ;;  %v2591_v30 = vpop.xlane.xlu0 %2590 }
 0x3cf   : > { %v2660_v24 = vrot.slane %v2591_v30, %v4724_v41 }
 0x3d0   : > { %2113 = vst [vmem:[%s4625_s30 + $0x3] sm:$0x1] %v2112_v42  ;;  %v2594_v10 = vpop.xlane.xlu1 %2593 }
 0x3d1   : > { %v2665_v9 = vrot.slane %v2594_v10, %v4733_v50 }
 0x3d2   : > { %v2277_v5 = vpop.xlane.xlu0 %2276 }
 0x3d3   : > { %v2343_v43 = vrot.slane %v2277_v5, %v4712_v15 }
 0x3d4   : > { %v2280_v55 = vpop.xlane.xlu1 %2279 }
 0x3d5   : > { %v2347_v12 = vrot.slane %v2280_v55, %v4704_v32 }
 0x3d6   : > { %v2585_v11 = vpop.xlane.xlu0 %2584 }
 0x3d7   : > { %v2348_v54 = vsel %vm1087_vm2, %v2347_v12, %v2343_v43  ;;  %v2651_v23 = vrot.slane %v2585_v11, %v4712_v15 }
 0x3d8   : > { %v2588_v56 = vpop.xlane.xlu1 %2587  ;;  %v2353_v53 = vsel %vm1094_vm3, %v2352_v20, %v2348_v54 }
 0x3d9   : > { %v2655_v27 = vrot.slane %v2588_v56, %v4704_v32  ;;  %v2358_v22 = vsel %vm1101_vm4, %v2357_v17, %v2353_v53 }
 0x3da   : > { %v2295_v59 = vpop.xlane.xlu0 %2294 }
 0x3db   : > { %v2656_v25 = vsel %vm1087_vm2, %v2655_v27, %v2651_v23  ;;  %v2372_v33 = vrot.slane %v2295_v59, %v4772_v18 }
 0x3dc   : > { %v2298_v44 = vpop.xlane.xlu1 %2297  ;;  %v2661_v29 = vsel %vm1094_vm3, %v2660_v24, %v2656_v25 }
 0x3dd   : > { %v2666_v61 = vsel %vm1101_vm4, %v2665_v9, %v2661_v29  ;;  %v2377_v2 = vrot.slane %v2298_v44, %v4790_v6 }
 0x3de   : > { %v2603_v28 = vpop.xlane.xlu0 %2602 }
 0x3df   : > { %v2680_v30 = vrot.slane %v2603_v28, %v4772_v18 }
 0x3e0   : > { %v2606_v58 = vpop.xlane.xlu1 %2605 }
 0x3e2   : > { %v2289_v60 = vpop.xlane.xlu0 %2288 }
 0x3e3   : > { %v2362_v14 = vrot.slane %v2289_v60, %v4736_v52 }
 0x3e4   : > { %v2292_v45 = vpop.xlane.xlu1 %2291 }
 0x3e5   : > { %v2367_v31 = vrot.slane %v2292_v45, %v4753_v4  ;;  %v2363_v21 = vsel %vm1108_vm5, %v2362_v14, %v2358_v22  ;;  %v2685_v45 = vrot.slane %v2606_v58, %v4790_v6 }
 0x3e6   : > { %v2597_v63 = vpop.xlane.xlu0 %2596 }
 0x3e7   : > { %v2670_v47 = vrot.slane %v2597_v63, %v4736_v52  ;;  %v2368_v46 = vsel %vm1115_vm6, %v2367_v31, %v2363_v21 }
 0x3e8   : > { %v2600_v3 = vpop.xlane.xlu1 %2599  ;;  %v2373_v36 = vsel %vm1122_vm7, %v2372_v33, %v2368_v46 }
 0x3e9   : > { %v2675_v0 = vrot.slane %v2600_v3, %v4753_v4  ;;  %v2671_v40 = vsel %vm1108_vm5, %v2670_v47, %v2666_v61  ;;  %v2378_v5 = vsel %vm1129_vm8, %v2377_v2, %v2373_v36  ;;  %v2323_v47 = vld [vmem:[%s4625_s30 + $0x4] sm:$0x1] }
 0x3ea   : > { %v2307_v34 = vpop.xlane.xlu0 %2306 }
 0x3eb   : > { %v2676_v42 = vsel %vm1115_vm6, %v2675_v0, %v2671_v40  ;;  %v2392_v3 = vrot.slane %v2307_v34, %v4820_v1 }
 0x3ec   : > { %v2310_v38 = vpop.xlane.xlu1 %2309  ;;  %v2681_v11 = vsel %vm1122_vm7, %v2680_v30, %v2676_v42 }
 0x3ed   : > { %v2686_v12 = vsel %vm1129_vm8, %v2685_v45, %v2681_v11  ;;  %v2397_v58 = vrot.slane %v2310_v38, %v4836_v13 }
 0x3ee   : > { %v2615_v16 = vpop.xlane.xlu0 %2614 }
 0x3ef   : > { %v2700_v14 = vrot.slane %v2615_v16, %v4820_v1 }
 0x3f0   : > { %v2618_v26 = vpop.xlane.xlu1 %2617 }
 0x3f1   : > { %v2705_v38 = vrot.slane %v2618_v26, %v4836_v13 }
 0x3f2   : > { %v2301_v7 = vpop.xlane.xlu0 %2300 }
 0x3f3   : > { %v2382_v37 = vrot.slane %v2301_v7, %v4793_v51 }
 0x3f4   : > { %v2304_v62 = vpop.xlane.xlu1 %2303 }
 0x3f5   : > { %v2387_v55 = vrot.slane %v2304_v62, %v4808_v48  ;;  %v2383_v56 = vsel %vm1136_vm9, %v2382_v37, %v2378_v5  ;;  %v2631_v37 = vld [vmem:[%s4625_s30 + $0x5] sm:$0x1] }
 0x3f6   : > { %v2609_v8 = vpop.xlane.xlu0 %2608 }
 0x3f7   : > { %v2690_v59 = vrot.slane %v2609_v8, %v4793_v51  ;;  %v2388_v44 = vsel %vm1143_vm10, %v2387_v55, %v2383_v56 }
 0x3f8   : > { %v2612_v19 = vpop.xlane.xlu1 %2611  ;;  %v2393_v27 = vsel %vm1150_vm11, %v2392_v3, %v2388_v44 }
 0x3f9   : > { %v2695_v28 = vrot.slane %v2612_v19, %v4808_v48  ;;  %v2691_v43 = vsel %vm1136_vm9, %v2690_v59, %v2686_v12  ;;  %v2398_v25 = vsel %vm1157_vm12, %v2397_v58, %v2393_v27 }
 0x3fa   : > { %v2319_v10 = vpop.xlane.xlu0 %2318 }
 0x3fb   : > { %v2696_v53 = vsel %vm1143_vm10, %v2695_v28, %v2691_v43  ;;  %v2412_v22 = vrot.slane %v2319_v10, %v4870_v39 }
 0x3fc   : > { %v2627_v60 = vpop.xlane.xlu1 %2626  ;;  %v2701_v24 = vsel %vm1150_vm11, %v2700_v14, %v2696_v53 }
 0x3fd   : > { %v2706_v46 = vsel %vm1157_vm12, %v2705_v38, %v2701_v24  ;;  %v2720_v33 = vrot.slane %v2627_v60, %v4870_v39 }
 0x3fe   : > { %v2313_v63 = vpop.xlane.xlu0 %2312 }
 0x3ff   : > { %v2402_v20 = vrot.slane %v2313_v63, %v4856_v35 }
 0x400   : > { %v2630_v54 = vpop.xlane.xlu1 %2629 }
 0x401   : > { %v2403_v31 = vsel %vm1164_vm13, %v2402_v20, %v2398_v25  ;;  %v2725_v36 = vrot.slane %v2630_v54, %v4875_v49 }
 0x402   : > { %v2621_v23 = vpop.xlane.xlu0 %2620 }
 0x403   : > { %v2710_v29 = vrot.slane %v2621_v23, %v4856_v35 }
 0x404   : > { %v2316_v17 = vpop.xlane.xlu1 %2315 }
 0x405   : > { %v2407_v34 = vrot.slane %v2316_v17, %v4864_v57  ;;  %v2711_v26 = vsel %vm1164_vm13, %v2710_v29, %v2706_v46 }
 0x406   : > { %v2322_v21 = vpop.xlane.xlu0 %2321 }
 0x407   : > { %v2408_v16 = vsel %vm1171_vm14, %v2407_v34, %v2403_v31  ;;  %v2417_v7 = vrot.slane %v2322_v21, %v4875_v49 }
 0x408   : > { %v2413_v9 = vsel %vm1178_vm15, %v2412_v22, %v2408_v16  ;;  %v2624_v62 = vpop.xlane.xlu1 %2623 }
 0x409   : > { %v2418_v61 = vsel %vm1185_vm0, %v2417_v7, %v2413_v9  ;;  %v2715_v0 = vrot.slane %v2624_v62, %v4864_v57 }
 0x40a   : > { %v2420_v40 = vmax.f32 %v2323_v47, %v2418_v61  ;;  %v3207_v8 = vpop.xlane.xlu0 %3206 }
 0x40b   : > { %v2716_v19 = vsel %vm1171_vm14, %v2715_v0, %v2711_v26  ;;  %v3276_v21 = vrot.slane %v3207_v8, %v4724_v41 }
 0x40c   : > { %2421 = vst [vmem:[%s4625_s30 + $0x4] sm:$0x1] %v2420_v40  ;;  %v2721_v2 = vsel %vm1178_vm15, %v2720_v33, %v2716_v19  ;;  %v2899_v42 = vpop.xlane.xlu1 %2898 }
 0x40d   : > { %v2726_v30 = vsel %vm1185_vm0, %v2725_v36, %v2721_v2  ;;  %v2968_v14 = vrot.slane %v2899_v42, %v4724_v41 }
 0x40e   : > { %v2728_v10 = vmax.f32 %v2631_v37, %v2726_v30  ;;  %v2893_v5 = vpop.xlane.xlu0 %2892 }
 0x40f   : > { %v2959_v20 = vrot.slane %v2893_v5, %v4712_v15 }
 0x410   : > { %2729 = vst [vmem:[%s4625_s30 + $0x5] sm:$0x1] %v2728_v10  ;;  %v3210_v55 = vpop.xlane.xlu1 %3209 }
 0x411   : > { %v3281_v7 = vrot.slane %v3210_v55, %v4733_v50 }
 0x412   : > { %v3201_v11 = vpop.xlane.xlu0 %3200 }
 0x413   : > { %v3267_v17 = vrot.slane %v3201_v11, %v4712_v15 }
 0x414   : > { %v2896_v56 = vpop.xlane.xlu1 %2895 }
 0x415   : > { %v2963_v54 = vrot.slane %v2896_v56, %v4704_v32 }
 0x416   : > { %v2902_v59 = vpop.xlane.xlu0 %2901 }
 0x417   : > { %v2964_v53 = vsel %vm1087_vm2, %v2963_v54, %v2959_v20  ;;  %v2973_v34 = vrot.slane %v2902_v59, %v4733_v50 }
 0x418   : > { %v3204_v60 = vpop.xlane.xlu1 %3203  ;;  %v2969_v24 = vsel %vm1094_vm3, %v2968_v14, %v2964_v53 }
 0x419   : > { %v3271_v23 = vrot.slane %v3204_v60, %v4704_v32  ;;  %v2974_v16 = vsel %vm1101_vm4, %v2973_v34, %v2969_v24 }
 0x41a   : > { %v3219_v45 = vpop.xlane.xlu0 %3218 }
 0x41b   : > { %v3272_v22 = vsel %vm1087_vm2, %v3271_v23, %v3267_v17  ;;  %v3296_v36 = vrot.slane %v3219_v45, %v4772_v18 }
 0x41c   : > { %v2911_v63 = vpop.xlane.xlu1 %2910  ;;  %v3277_v47 = vsel %vm1094_vm3, %v3276_v21, %v3272_v22  ;;  %v2939_v22 = vld [vmem:[%s4625_s30 + $0x6] sm:$0x1] }
 0x41d   : > { %v2988_v41 = vrot.slane %v2911_v63, %v4772_v18  ;;  %v3282_v0 = vsel %vm1101_vm4, %v3281_v7, %v3277_v47 }
 0x41e   : > { %v3213_v44 = vpop.xlane.xlu0 %3212 }
 0x41f   : > { %v3286_v15 = vrot.slane %v3213_v44, %v4736_v52 }
 0x420   : > { %v2905_v12 = vpop.xlane.xlu1 %2904 }
 0x421   : > { %v2978_v31 = vrot.slane %v2905_v12, %v4736_v52  ;;  %v3287_v26 = vsel %vm1108_vm5, %v3286_v15, %v3282_v0 }
 0x422   : > { %v2914_v28 = vpop.xlane.xlu0 %2913 }
 0x423   : > { %v2979_v9 = vsel %vm1108_vm5, %v2978_v31, %v2974_v16 }
 0x424   : > { %v3222_v3 = vpop.xlane.xlu1 %3221 }
 0x425   : > { %v3301_v10 = vrot.slane %v3222_v3, %v4790_v6 }
 0x426   : > { %v2908_v43 = vpop.xlane.xlu0 %2907 }
 0x427   : > { %v2983_v32 = vrot.slane %v2908_v43, %v4753_v4 }
 0x428   : > { %v3216_v27 = vpop.xlane.xlu1 %3215 }
 0x429   : > { %v3291_v62 = vrot.slane %v3216_v27, %v4753_v4  ;;  %v2984_v61 = vsel %vm1115_vm6, %v2983_v32, %v2979_v9  ;;  %v2993_v4 = vrot.slane %v2914_v28, %v4790_v6 }
 0x42a   : > { %v3231_v58 = vpop.xlane.xlu0 %3230  ;;  %v2989_v40 = vsel %vm1122_vm7, %v2988_v41, %v2984_v61 }
 0x42b   : > { %v3292_v52 = vsel %vm1115_vm6, %v3291_v62, %v3287_v26  ;;  %v2994_v30 = vsel %vm1129_vm8, %v2993_v4, %v2989_v40  ;;  %v3316_v12 = vrot.slane %v3231_v58, %v4820_v1 }
 0x42c   : > { %v2923_v25 = vpop.xlane.xlu1 %2922  ;;  %v3297_v2 = vsel %vm1122_vm7, %v3296_v36, %v3292_v52 }
 0x42d   : > { %v3008_v56 = vrot.slane %v2923_v25, %v4820_v1  ;;  %v3302_v59 = vsel %vm1129_vm8, %v3301_v10, %v3297_v2 }
 0x42e   : > { %v3225_v29 = vpop.xlane.xlu0 %3224 }
 0x42f   : > { %v3306_v42 = vrot.slane %v3225_v29, %v4793_v51 }
 0x430   : > { %v2917_v38 = vpop.xlane.xlu1 %2916 }
 0x431   : > { %v2998_v50 = vrot.slane %v2917_v38, %v4793_v51  ;;  %v3307_v45 = vsel %vm1136_vm9, %v3306_v42, %v3302_v59  ;;  %v3247_v38 = vld [vmem:[%s4625_s30 + $0x7] sm:$0x1] }
 0x432   : > { %v2926_v46 = vpop.xlane.xlu0 %2925 }
 0x433   : > { %v2999_v5 = vsel %vm1136_vm9, %v2998_v50, %v2994_v30 }
 0x434   : > { %v3234_v33 = vpop.xlane.xlu1 %3233 }
 0x435   : > { %v3321_v27 = vrot.slane %v3234_v33, %v4836_v13 }
 0x436   : > { %v2920_v8 = vpop.xlane.xlu0 %2919 }
 0x437   : > { %v3003_v37 = vrot.slane %v2920_v8, %v4808_v48 }
 0x438   : > { %v3228_v19 = vpop.xlane.xlu1 %3227 }
 0x439   : > { %v3311_v55 = vrot.slane %v3228_v19, %v4808_v48  ;;  %v3004_v18 = vsel %vm1143_vm10, %v3003_v37, %v2999_v5  ;;  %v3013_v48 = vrot.slane %v2926_v46, %v4836_v13 }
 0x43a   : > { %v2935_v11 = vpop.xlane.xlu0 %2934  ;;  %v3009_v51 = vsel %vm1150_vm11, %v3008_v56, %v3004_v18 }
 0x43b   : > { %v3312_v63 = vsel %vm1143_vm10, %v3311_v55, %v3307_v45  ;;  %v3014_v43 = vsel %vm1157_vm12, %v3013_v48, %v3009_v51  ;;  %v3028_v34 = vrot.slane %v2935_v11, %v4870_v39 }
 0x43c   : > { %v2929_v60 = vpop.xlane.xlu1 %2928  ;;  %v3317_v3 = vsel %vm1150_vm11, %v3316_v12, %v3312_v63 }
 0x43d   : > { %v3018_v6 = vrot.slane %v2929_v60, %v4856_v35  ;;  %v3322_v1 = vsel %vm1157_vm12, %v3321_v27, %v3317_v3 }
 0x43e   : > { %v2932_v44 = vpop.xlane.xlu0 %2931 }
 0x43f   : > { %v3023_v54 = vrot.slane %v2932_v44, %v4864_v57  ;;  %v3019_v20 = vsel %vm1164_vm13, %v3018_v6, %v3014_v43 }
 0x440   : > { %v3243_v28 = vpop.xlane.xlu1 %3242 }
 0x441   : > { %v3024_v14 = vsel %vm1171_vm14, %v3023_v54, %v3019_v20  ;;  %v3336_v31 = vrot.slane %v3243_v28, %v4870_v39  ;;  %v3350_v39 = vld [vmem:[%s5198_s6] sm:$0xff] }
 0x442   : > { %v3237_v23 = vpop.xlane.xlu0 %3236  ;;  %v3029_v29 = vsel %vm1178_vm15, %v3028_v34, %v3024_v14 }
 0x443   : > { %v3326_v53 = vrot.slane %v3237_v23, %v4856_v35 }
 0x444   : > { %v3240_v58 = vpop.xlane.xlu1 %3239 }
 0x445   : > { %v3327_v17 = vsel %vm1164_vm13, %v3326_v53, %v3322_v1  ;;  %v3331_v25 = vrot.slane %v3240_v58, %v4864_v57 }
 0x446   : > { %v2938_v13 = vpop.xlane.xlu0 %2937 }
 0x447   : > { %v3332_v24 = vsel %vm1171_vm14, %v3331_v25, %v3327_v17  ;;  %v3033_v35 = vrot.slane %v2938_v13, %v4875_v49 }
 0x448   : > { %v3246_v21 = vpop.xlane.xlu1 %3245  ;;  %v3337_v47 = vsel %vm1178_vm15, %v3336_v31, %v3332_v24 }
 0x449   : > { %v3034_v32 = vsel %vm1185_vm0, %v3033_v35, %v3029_v29  ;;  %v3341_v57 = vrot.slane %v3246_v21, %v4875_v49 }
 0x44a   : > { %v3036_v16 = vmax.f32 %v2939_v22, %v3034_v32 }
 0x44b   : > { %v3342_v15 = vsel %vm1185_vm0, %v3341_v57, %v3337_v47 }
 0x44c   : > { %3037 = vst [vmem:[%s4625_s30 + $0x6] sm:$0x1] %v3036_v16  ;;  %v3344_v7 = vmax.f32 %v3247_v38, %v3342_v15 }
 0x44e   : > { %3345 = vst [vmem:[%s4625_s30 + $0x7] sm:$0x1] %v3344_v7 }
 0x455   : > { %v3349_v9 = vld [vmem:[%s4625_s30] sm:$0xff] }
 0x456   : > { %v3351_v62 = vadd.f32 %v3350_v39, %v3349_v9 }
 0x458   : > { %v3352_v46 = vmax.f32 %v3351_v62, 0.0 }
 0x45a   : > { %3353 = vst [vmem:[%s4625_s30] sm:$0xff] %v3352_v46 }
 0x45b PF: > { %s18_s26 = sadd.s32 1, %s4138_s26   ;;  %s5202_s24 = smov %s4134_s25 }
 0x45c   : > { %p15_p2 = scmp.ge.s32.totalorder %s18_s26, 4   ;;  %s5203_s25 = smov %s5205_s28 }
 0x45e   :  { %17 = sbr.rel (!%p15_p2) target bundleno = 2 (0x2), region = 91 }
 0x463   :  { %3373 = vsyncpa [#allocation3], 1 }
 0x464   :  { %3375 = vsyncpa [#allocation3 + $0x1], 1 }

// kernel: stn3d_forward.3
= control target key start
LH: loop header
LB: loop body
LE: loop exit
PB: predicated region body
PF: predicated region fallthrough
CT: control target
= control target key end

     0   :  { %12 = vsyncpa [#allocation3], 0  ;;  %s3494_s24 = smov [#allocation2]   ;;  %s3880_s0 = inlined_call_operand.vmem [shape: f32[8,1024], index: 0, kind: input, shape index: {}]   ;;  %s3881_s1 = inlined_call_operand.hbm [shape: bf16[1024,512], index: 1, kind: input, shape index: {}]   ;;  %s3882_s2 = inlined_call_operand.vmem [shape: f32[1,512], index: 2, kind: input, shape index: {}]   ;;  %s3883_s3 = inlined_call_operand.vmem [shape: bf16[512,256], index: 3, kind: input, shape index: {}]   ;;  %s3884_s4 = inlined_call_operand.vmem [shape: f32[1,256], index: 4, kind: input, shape index: {}]   ;;  %s3885_s5 = inlined_call_operand.vmem [shape: bf16[256,128], index: 5, kind: input, shape index: {}]   ;;  %s3886_s6 = inlined_call_operand.vmem [shape: f32[1,128], index: 6, kind: input, shape index: {}]   ;;  %s3887_s7 = inlined_call_operand.vmem [shape: f32[8,128], index: 7, kind: output, shape index: {}]  }
   0x1   :  { %s20_s25 = sshll.u32 %s3494_s24, 4  ;;  %s21_s25 = int_to_ptr.vmem [resolvable:$true] %s20_s25 }
   0x2   :  { %s3480_s26 = scalar_lea.vmem %s21_s25, 32768  ;;  %p3485_p1 = scmp.lt.s32.totalorder %s21_s25, %s21_s25 }
   0x3   :  { %p3481_p0 = scmp.ne.s32.totalorder %s21_s25, %s3480_s26  ;;  %p3486_p2 = scmp.lt.s32.totalorder %s3480_s26, %s3480_s26 }
   0x5   :  { %p3487_p3 = por %p3486_p2, %p3485_p1 }
   0x7   :  { %p3488_p4 = pnand %p3487_p3, %p3481_p0 }
   0x9   :  { %3491 = shalt.err (!%p3488_p4)
}
   0xa   :  { %s3495_s27 = smov 256   ;;  %s3496_s28 = smov 16  }
   0xb   :  { %26 = dma.hbm_to_vmem [thread:$0]  %s3881_s1, 32768, %s21_s25, [#allocation3], %s3495_s27, %s3495_s27, %s3496_s28  }
   0xc   :  { %3492 = dma.done.wait [#allocation3], 32768  }
   0xd   :  { %3493 = vsyncadd [#allocation3], 4294934528  ;;  %v2976_v0 = vld [vmem:[#allocation2 + $0xe4] ss:$16 sps:$4 sm:$0xff]   ;;  %v2980_v2 = vld [vmem:[#allocation2 + $0xe0] ss:$16 sps:$4 sm:$0xff]  }
   0xe   :  { %v2978_v1 = vld [vmem:[#allocation2 + $0x2e4] ss:$16 sps:$4 sm:$0xff]   ;;  %1615 = vmatprep.subr.bf16.mxu0 %v2976_v0  ;;  %v2981_v3 = vld [vmem:[#allocation2 + $0x2e0] ss:$16 sps:$4 sm:$0xff]   ;;  %v42_v46 = vld [vmem:[%s3880_s0 + $0x8] sm:$0xff] }
   0xf   :  { %1656 = vmatprep.subr.bf16.mxu1 %v2978_v1  ;;  %v2982_v4 = vld [vmem:[#allocation2 + $0xc4] ss:$16 sps:$4 sm:$0xff]   ;;  %1616 = vmatpush1.bf16.msra.mxu0 %v2980_v2  ;;  %v2986_v6 = vld [vmem:[#allocation2 + $0xc0] ss:$16 sps:$4 sm:$0xff]   ;;  %v3543_v49 = vpack.c.bf16 %v42_v46, %v42_v46  ;;  %v44_v50 = vld [vmem:[%s3880_s0 + $0x18] sm:$0xff] }
  0x10   :  { %1657 = vmatpush1.bf16.msra.mxu1 %v2981_v3  ;;  %v2984_v5 = vld [vmem:[#allocation2 + $0x2c4] ss:$16 sps:$4 sm:$0xff]   ;;  %1617 = vmatprep.subr.bf16.mxu0 %v2982_v4  ;;  %v2987_v7 = vld [vmem:[#allocation2 + $0x2c0] ss:$16 sps:$4 sm:$0xff]   ;;  %v3548_v52 = vpack.c.bf16 %v44_v50, %v44_v50 }
  0x11   :  { %1658 = vmatprep.subr.bf16.mxu1 %v2984_v5  ;;  %v2988_v8 = vld [vmem:[#allocation2 + $0xa4] ss:$16 sps:$4 sm:$0xff]   ;;  %v2992_v10 = vld [vmem:[#allocation2 + $0xa0] ss:$16 sps:$4 sm:$0xff]   ;;  %1647 = vmatprep.mubr.bf16.mxu0 %v3543_v49 }
  0x12   :  { %v2990_v9 = vld [vmem:[#allocation2 + $0x2a4] ss:$16 sps:$4 sm:$0xff]   ;;  %v2993_v11 = vld [vmem:[#allocation2 + $0x2a0] ss:$16 sps:$4 sm:$0xff]   ;;  %1688 = vmatprep.mubr.bf16.mxu1 %v3548_v52 }
  0x13   :  { %1618 = vmatpush1.bf16.msra.mxu0 %v2986_v6  ;;  %v2994_v12 = vld [vmem:[#allocation2 + $0x84] ss:$16 sps:$4 sm:$0xff]   ;;  %v2998_v14 = vld [vmem:[#allocation2 + $0x80] ss:$16 sps:$4 sm:$0xff]  }
  0x14   :  { %1659 = vmatpush1.bf16.msra.mxu1 %v2987_v7  ;;  %1619 = vmatprep.subr.bf16.mxu0 %v2988_v8  ;;  %v2996_v13 = vld [vmem:[#allocation2 + $0x284] ss:$16 sps:$4 sm:$0xff]   ;;  %v2999_v15 = vld [vmem:[#allocation2 + $0x280] ss:$16 sps:$4 sm:$0xff]  }
  0x15   :  { %1660 = vmatprep.subr.bf16.mxu1 %v2990_v9  ;;  %v3000_v16 = vld [vmem:[#allocation2 + $0x64] ss:$16 sps:$4 sm:$0xff]   ;;  %v3004_v18 = vld [vmem:[#allocation2 + $0x60] ss:$16 sps:$4 sm:$0xff]  }
  0x16   :  { %v3002_v17 = vld [vmem:[#allocation2 + $0x264] ss:$16 sps:$4 sm:$0xff]   ;;  %v3005_v19 = vld [vmem:[#allocation2 + $0x260] ss:$16 sps:$4 sm:$0xff]  }
  0x17   :  { %1620 = vmatpush1.bf16.msra.mxu0 %v2992_v10  ;;  %v3006_v20 = vld [vmem:[#allocation2 + $0x44] ss:$16 sps:$4 sm:$0xff]   ;;  %v3010_v22 = vld [vmem:[#allocation2 + $0x40] ss:$16 sps:$4 sm:$0xff]  }
  0x18   :  { %1661 = vmatpush1.bf16.msra.mxu1 %v2993_v11  ;;  %1621 = vmatprep.subr.bf16.mxu0 %v2994_v12  ;;  %v3008_v21 = vld [vmem:[#allocation2 + $0x244] ss:$16 sps:$4 sm:$0xff]   ;;  %v3011_v23 = vld [vmem:[#allocation2 + $0x240] ss:$16 sps:$4 sm:$0xff]  }
  0x19   :  { %1662 = vmatprep.subr.bf16.mxu1 %v2996_v13  ;;  %v3012_v24 = vld [vmem:[#allocation2 + $0x24] ss:$16 sps:$4 sm:$0xff]   ;;  %v3016_v26 = vld [vmem:[#allocation2 + $0x20] ss:$16 sps:$4 sm:$0xff]  }
  0x1a   :  { %v3014_v25 = vld [vmem:[#allocation2 + $0x224] ss:$16 sps:$4 sm:$0xff]   ;;  %v3017_v27 = vld [vmem:[#allocation2 + $0x220] ss:$16 sps:$4 sm:$0xff]  }
  0x1b   :  { %1622 = vmatpush1.bf16.msra.mxu0 %v2998_v14  ;;  %v3018_v28 = vld [vmem:[#allocation2 + $0x4] ss:$16 sps:$4 sm:$0xff]   ;;  %v3022_v30 = vld [vmem:[#allocation2] ss:$16 sps:$4 sm:$0xff]  }
  0x1c   :  { %1663 = vmatpush1.bf16.msra.mxu1 %v2999_v15  ;;  %1623 = vmatprep.subr.bf16.mxu0 %v3000_v16  ;;  %v3020_v29 = vld [vmem:[#allocation2 + $0x204] ss:$16 sps:$4 sm:$0xff]   ;;  %v3023_v31 = vld [vmem:[#allocation2 + $0x200] ss:$16 sps:$4 sm:$0xff]  }
  0x1d   :  { %1664 = vmatprep.subr.bf16.mxu1 %v3002_v17  ;;  %v3024_v32 = vld [vmem:[#allocation2 + $0x1e4] ss:$16 sps:$4 sm:$0xff]   ;;  %v3028_v34 = vld [vmem:[#allocation2 + $0x1e0] ss:$16 sps:$4 sm:$0xff]  }
  0x1e   :  { %v3026_v33 = vld [vmem:[#allocation2 + $0x3e4] ss:$16 sps:$4 sm:$0xff]   ;;  %v3029_v35 = vld [vmem:[#allocation2 + $0x3e0] ss:$16 sps:$4 sm:$0xff]  }
  0x1f   :  { %1624 = vmatpush1.bf16.msra.mxu0 %v3004_v18  ;;  %v3030_v36 = vld [vmem:[#allocation2 + $0x1c4] ss:$16 sps:$4 sm:$0xff]   ;;  %v3034_v38 = vld [vmem:[#allocation2 + $0x1c0] ss:$16 sps:$4 sm:$0xff]  }
  0x20   :  { %1665 = vmatpush1.bf16.msra.mxu1 %v3005_v19  ;;  %1625 = vmatprep.subr.bf16.mxu0 %v3006_v20  ;;  %v3032_v37 = vld [vmem:[#allocation2 + $0x3c4] ss:$16 sps:$4 sm:$0xff]   ;;  %v3035_v39 = vld [vmem:[#allocation2 + $0x3c0] ss:$16 sps:$4 sm:$0xff]  }
  0x21   :  { %1666 = vmatprep.subr.bf16.mxu1 %v3008_v21  ;;  %v3036_v40 = vld [vmem:[#allocation2 + $0x1a4] ss:$16 sps:$4 sm:$0xff]   ;;  %v3040_v42 = vld [vmem:[#allocation2 + $0x1a0] ss:$16 sps:$4 sm:$0xff]  }
  0x22   :  { %v3038_v41 = vld [vmem:[#allocation2 + $0x3a4] ss:$16 sps:$4 sm:$0xff]   ;;  %v3041_v43 = vld [vmem:[#allocation2 + $0x3a0] ss:$16 sps:$4 sm:$0xff]  }
  0x23   :  { %1626 = vmatpush1.bf16.msra.mxu0 %v3010_v22  ;;  %v3042_v44 = vld [vmem:[#allocation2 + $0x184] ss:$16 sps:$4 sm:$0xff]   ;;  %v3046_v47 = vld [vmem:[#allocation2 + $0x180] ss:$16 sps:$4 sm:$0xff]  }
  0x24   :  { %1667 = vmatpush1.bf16.msra.mxu1 %v3011_v23  ;;  %1627 = vmatprep.subr.bf16.mxu0 %v3012_v24  ;;  %v3044_v45 = vld [vmem:[#allocation2 + $0x384] ss:$16 sps:$4 sm:$0xff]   ;;  %v3047_v48 = vld [vmem:[#allocation2 + $0x380] ss:$16 sps:$4 sm:$0xff]  }
  0x25   :  { %1668 = vmatprep.subr.bf16.mxu1 %v3014_v25  ;;  %v3048_v51 = vld [vmem:[#allocation2 + $0x164] ss:$16 sps:$4 sm:$0xff]   ;;  %v3052_v54 = vld [vmem:[#allocation2 + $0x160] ss:$16 sps:$4 sm:$0xff]  }
  0x26   :  { %v3050_v53 = vld [vmem:[#allocation2 + $0x364] ss:$16 sps:$4 sm:$0xff]   ;;  %v3053_v55 = vld [vmem:[#allocation2 + $0x360] ss:$16 sps:$4 sm:$0xff]  }
  0x27   :  { %1628 = vmatpush1.bf16.msra.mxu0 %v3016_v26  ;;  %v3054_v56 = vld [vmem:[#allocation2 + $0x144] ss:$16 sps:$4 sm:$0xff]   ;;  %v3058_v58 = vld [vmem:[#allocation2 + $0x140] ss:$16 sps:$4 sm:$0xff]  }
  0x28   :  { %1669 = vmatpush1.bf16.msra.mxu1 %v3017_v27  ;;  %1629 = vmatprep.subr.bf16.mxu0 %v3018_v28  ;;  %v3056_v57 = vld [vmem:[#allocation2 + $0x344] ss:$16 sps:$4 sm:$0xff]   ;;  %v3059_v59 = vld [vmem:[#allocation2 + $0x340] ss:$16 sps:$4 sm:$0xff]  }
  0x29   :  { %1670 = vmatprep.subr.bf16.mxu1 %v3020_v29  ;;  %v3060_v60 = vld [vmem:[#allocation2 + $0x124] ss:$16 sps:$4 sm:$0xff]   ;;  %v3064_v62 = vld [vmem:[#allocation2 + $0x120] ss:$16 sps:$4 sm:$0xff]  }
  0x2a   :  { %v3062_v61 = vld [vmem:[#allocation2 + $0x324] ss:$16 sps:$4 sm:$0xff]   ;;  %v3065_v63 = vld [vmem:[#allocation2 + $0x320] ss:$16 sps:$4 sm:$0xff]  }
  0x2b   :  { %1630 = vmatpush1.bf16.msra.mxu0 %v3022_v30  ;;  %v3066_v0 = vld [vmem:[#allocation2 + $0x104] ss:$16 sps:$4 sm:$0xff]   ;;  %v3070_v2 = vld [vmem:[#allocation2 + $0x100] ss:$16 sps:$4 sm:$0xff]  }
  0x2c   :  { %1671 = vmatpush1.bf16.msra.mxu1 %v3023_v31  ;;  %1631 = vmatprep.subr.bf16.mxu0 %v3024_v32  ;;  %v3068_v1 = vld [vmem:[#allocation2 + $0x304] ss:$16 sps:$4 sm:$0xff]   ;;  %v3071_v3 = vld [vmem:[#allocation2 + $0x300] ss:$16 sps:$4 sm:$0xff]  }
  0x2d   :  { %1672 = vmatprep.subr.bf16.mxu1 %v3026_v33  ;;  %v41_v4 = vld [vmem:[%s3880_s0] sm:$0xff]  ;;  %v43_v5 = vld [vmem:[%s3880_s0 + $0x10] sm:$0xff] }
  0x2e   :  { %v3074_v6 = vld [vmem:[#allocation2 + $0x4e4] ss:$16 sps:$4 sm:$0xff]   ;;  %v3558_v8 = vpack.c.bf16 %v41_v4, %v41_v4  ;;  %v3560_v9 = vpack.c.bf16 %v43_v5, %v43_v5  ;;  %v3072_v10 = vld [vmem:[#allocation2 + $0x4e0] ss:$16 sps:$4 sm:$0xff]  }
  0x2f   :  { %1632 = vmatpush2.bf16.msra.mxu0 %v3028_v34  ;;  %v3077_v7 = vld [vmem:[#allocation2 + $0x6e4] ss:$16 sps:$4 sm:$0xff]   ;;  %v3075_v11 = vld [vmem:[#allocation2 + $0x6e0] ss:$16 sps:$4 sm:$0xff]   ;;  %v46_v34 = vld [vmem:[%s3880_s0 + $0x28] sm:$0xff] }
  0x30   :  { %1673 = vmatpush2.bf16.msra.mxu1 %v3029_v35  ;;  %1633 = vmatprep.subr.bf16.mxu0 %v3030_v36  ;;  %v3080_v12 = vld [vmem:[#allocation2 + $0x4c4] ss:$16 sps:$4 sm:$0xff]   ;;  %v3078_v14 = vld [vmem:[#allocation2 + $0x4c0] ss:$16 sps:$4 sm:$0xff]  }
  0x31   :  { %1674 = vmatprep.subr.bf16.mxu1 %v3032_v37  ;;  %v3083_v13 = vld [vmem:[#allocation2 + $0x6c4] ss:$16 sps:$4 sm:$0xff]   ;;  %v3081_v15 = vld [vmem:[#allocation2 + $0x6c0] ss:$16 sps:$4 sm:$0xff]   ;;  %v3567_v37 = vpack.c.bf16 %v46_v34, %v46_v34  ;;  %v3186_v34 = vld [vmem:[#allocation2 + $0x88] ss:$16 sps:$4 sm:$0xff]  }
  0x32   :  { %v3086_v16 = vld [vmem:[#allocation2 + $0x4a4] ss:$16 sps:$4 sm:$0xff]   ;;  %v3084_v18 = vld [vmem:[#allocation2 + $0x4a0] ss:$16 sps:$4 sm:$0xff]  }
  0x33   :  { %1634 = vmatpush2.bf16.msra.mxu0 %v3034_v38  ;;  %v3089_v17 = vld [vmem:[#allocation2 + $0x6a4] ss:$16 sps:$4 sm:$0xff]   ;;  %v3087_v19 = vld [vmem:[#allocation2 + $0x6a0] ss:$16 sps:$4 sm:$0xff]   ;;  %v48_v38 = vld [vmem:[%s3880_s0 + $0x38] sm:$0xff] }
  0x34   :  { %1675 = vmatpush2.bf16.msra.mxu1 %v3035_v39  ;;  %1635 = vmatprep.subr.bf16.mxu0 %v3036_v40  ;;  %v3092_v20 = vld [vmem:[#allocation2 + $0x484] ss:$16 sps:$4 sm:$0xff]   ;;  %v3090_v22 = vld [vmem:[#allocation2 + $0x480] ss:$16 sps:$4 sm:$0xff]   ;;  %v3572_v40 = vpack.c.bf16 %v48_v38, %v48_v38  ;;  %v3197_v38 = vld [vmem:[#allocation2 + $0x26c] ss:$16 sps:$4 sm:$0xff]  }
  0x35   :  { %1676 = vmatprep.subr.bf16.mxu1 %v3038_v41  ;;  %v3095_v21 = vld [vmem:[#allocation2 + $0x684] ss:$16 sps:$4 sm:$0xff]   ;;  %v3093_v23 = vld [vmem:[#allocation2 + $0x680] ss:$16 sps:$4 sm:$0xff]  }
  0x36   :  { %v3098_v24 = vld [vmem:[#allocation2 + $0x464] ss:$16 sps:$4 sm:$0xff]   ;;  %v3096_v26 = vld [vmem:[#allocation2 + $0x460] ss:$16 sps:$4 sm:$0xff]  }
  0x37   :  { %1636 = vmatpush2.bf16.msra.mxu0 %v3040_v42  ;;  %v3101_v25 = vld [vmem:[#allocation2 + $0x664] ss:$16 sps:$4 sm:$0xff]   ;;  %v3099_v27 = vld [vmem:[#allocation2 + $0x660] ss:$16 sps:$4 sm:$0xff]  }
  0x38   :  { %1677 = vmatpush2.bf16.msra.mxu1 %v3041_v43  ;;  %1637 = vmatprep.subr.bf16.mxu0 %v3042_v44  ;;  %v3104_v28 = vld [vmem:[#allocation2 + $0x444] ss:$16 sps:$4 sm:$0xff]   ;;  %v3102_v30 = vld [vmem:[#allocation2 + $0x440] ss:$16 sps:$4 sm:$0xff]  }
  0x39   :  { %1678 = vmatprep.subr.bf16.mxu1 %v3044_v45  ;;  %v3107_v29 = vld [vmem:[#allocation2 + $0x644] ss:$16 sps:$4 sm:$0xff]   ;;  %v3105_v31 = vld [vmem:[#allocation2 + $0x640] ss:$16 sps:$4 sm:$0xff]  }
  0x3a   :  { %v3110_v32 = vld [vmem:[#allocation2 + $0x424] ss:$16 sps:$4 sm:$0xff]   ;;  %v3108_v35 = vld [vmem:[#allocation2 + $0x420] ss:$16 sps:$4 sm:$0xff]  }
  0x3b   :  { %1638 = vmatpush2.bf16.msra.mxu0 %v3046_v47  ;;  %v3113_v33 = vld [vmem:[#allocation2 + $0x624] ss:$16 sps:$4 sm:$0xff]   ;;  %v3111_v36 = vld [vmem:[#allocation2 + $0x620] ss:$16 sps:$4 sm:$0xff]  }
  0x3c   :  { %1679 = vmatpush2.bf16.msra.mxu1 %v3047_v48  ;;  %1639 = vmatprep.subr.bf16.mxu0 %v3048_v51  ;;  %v3116_v39 = vld [vmem:[#allocation2 + $0x404] ss:$16 sps:$4 sm:$0xff]   ;;  %v3114_v42 = vld [vmem:[#allocation2 + $0x400] ss:$16 sps:$4 sm:$0xff]  }
  0x3d   :  { %1680 = vmatprep.subr.bf16.mxu1 %v3050_v53  ;;  %v3119_v41 = vld [vmem:[#allocation2 + $0x604] ss:$16 sps:$4 sm:$0xff]   ;;  %v3117_v43 = vld [vmem:[#allocation2 + $0x600] ss:$16 sps:$4 sm:$0xff]  }
  0x3e   :  { %v3122_v44 = vld [vmem:[#allocation2 + $0x5e4] ss:$16 sps:$4 sm:$0xff]   ;;  %v3120_v46 = vld [vmem:[#allocation2 + $0x5e0] ss:$16 sps:$4 sm:$0xff]  }
  0x3f   :  { %1640 = vmatpush2.bf16.msra.mxu0 %v3052_v54  ;;  %v3125_v45 = vld [vmem:[#allocation2 + $0x7e4] ss:$16 sps:$4 sm:$0xff]   ;;  %v3123_v47 = vld [vmem:[#allocation2 + $0x7e0] ss:$16 sps:$4 sm:$0xff]  }
  0x40   :  { %1681 = vmatpush2.bf16.msra.mxu1 %v3053_v55  ;;  %1641 = vmatprep.subr.bf16.mxu0 %v3054_v56  ;;  %v3128_v48 = vld [vmem:[#allocation2 + $0x5c4] ss:$16 sps:$4 sm:$0xff]   ;;  %v3126_v51 = vld [vmem:[#allocation2 + $0x5c0] ss:$16 sps:$4 sm:$0xff]  }
  0x41   :  { %1682 = vmatprep.subr.bf16.mxu1 %v3056_v57  ;;  %v3131_v50 = vld [vmem:[#allocation2 + $0x7c4] ss:$16 sps:$4 sm:$0xff]   ;;  %v3129_v53 = vld [vmem:[#allocation2 + $0x7c0] ss:$16 sps:$4 sm:$0xff]  }
  0x42   :  { %v3134_v54 = vld [vmem:[#allocation2 + $0x5a4] ss:$16 sps:$4 sm:$0xff]   ;;  %v3132_v56 = vld [vmem:[#allocation2 + $0x5a0] ss:$16 sps:$4 sm:$0xff]  }
  0x43   :  { %1642 = vmatpush2.bf16.msra.mxu0 %v3058_v58  ;;  %v3137_v55 = vld [vmem:[#allocation2 + $0x7a4] ss:$16 sps:$4 sm:$0xff]   ;;  %v3135_v57 = vld [vmem:[#allocation2 + $0x7a0] ss:$16 sps:$4 sm:$0xff]  }
  0x44   :  { %1683 = vmatpush2.bf16.msra.mxu1 %v3059_v59  ;;  %1643 = vmatprep.subr.bf16.mxu0 %v3060_v60  ;;  %v3140_v58 = vld [vmem:[#allocation2 + $0x584] ss:$16 sps:$4 sm:$0xff]   ;;  %v3138_v60 = vld [vmem:[#allocation2 + $0x580] ss:$16 sps:$4 sm:$0xff]  }
  0x45   :  { %1684 = vmatprep.subr.bf16.mxu1 %v3062_v61  ;;  %v3143_v59 = vld [vmem:[#allocation2 + $0x784] ss:$16 sps:$4 sm:$0xff]   ;;  %v3141_v61 = vld [vmem:[#allocation2 + $0x780] ss:$16 sps:$4 sm:$0xff]  }
  0x46   :  { %v3150_v4 = vld [vmem:[#allocation2 + $0x540] ss:$16 sps:$4 sm:$0xff]  }
  0x47   :  { %1644 = vmatpush2.bf16.msra.mxu0 %v3064_v62  ;;  %v3146_v62 = vld [vmem:[#allocation2 + $0x564] ss:$16 sps:$4 sm:$0xff]   ;;  %v3153_v5 = vld [vmem:[#allocation2 + $0x740] ss:$16 sps:$4 sm:$0xff]  }
  0x48   :  { %1685 = vmatpush2.bf16.msra.mxu1 %v3065_v63  ;;  %1645 = vmatprep.subr.bf16.mxu0 %v3066_v0  ;;  %v3149_v63 = vld [vmem:[#allocation2 + $0x764] ss:$16 sps:$4 sm:$0xff]   ;;  %v3144_v0 = vld [vmem:[#allocation2 + $0x560] ss:$16 sps:$4 sm:$0xff]  }
  0x49   :  { %1686 = vmatprep.subr.bf16.mxu1 %v3068_v1  ;;  %v3147_v1 = vld [vmem:[#allocation2 + $0x760] ss:$16 sps:$4 sm:$0xff]  }
  0x4b   :  { %1646 = vmatpush2.bf16.msra.mxu0 %v3070_v2  ;;  %v3152_v2 = vld [vmem:[#allocation2 + $0x544] ss:$16 sps:$4 sm:$0xff]  }
  0x4c   :  { %1687 = vmatpush2.bf16.msra.mxu1 %v3071_v3  ;;  %1697 = vmatprep.subr.bf16.mxu0 %v3074_v6  ;;  %v3155_v3 = vld [vmem:[#allocation2 + $0x744] ss:$16 sps:$4 sm:$0xff]  }
  0x4d   :  { %1738 = vmatprep.subr.bf16.mxu1 %v3077_v7  ;;  %v3158_v6 = vld [vmem:[#allocation2 + $0x524] ss:$16 sps:$4 sm:$0xff]  }
  0x4e   :  { %1648 = vmatmul.mubr.bf16.vlgmr.msra.gmra.mxu0 %v3558_v8  ;;  %v3161_v7 = vld [vmem:[#allocation2 + $0x724] ss:$16 sps:$4 sm:$0xff]  }
  0x4f   :  { %1689 = vmatmul.mubr.bf16.vlgmr.msra.gmra.mxu1 %v3560_v9  ;;  %1698 = vmatpush1.bf16.msra.mxu0 %v3072_v10  ;;  %v3156_v10 = vld [vmem:[#allocation2 + $0x520] ss:$16 sps:$4 sm:$0xff]  }
  0x50   :  { %1739 = vmatpush1.bf16.msra.mxu1 %v3075_v11  ;;  %1699 = vmatprep.subr.bf16.mxu0 %v3080_v12  ;;  %v3159_v11 = vld [vmem:[#allocation2 + $0x720] ss:$16 sps:$4 sm:$0xff]   ;;  %v3164_v12 = vld [vmem:[#allocation2 + $0x504] ss:$16 sps:$4 sm:$0xff]  }
  0x51   :  { %1740 = vmatprep.subr.bf16.mxu1 %v3083_v13  ;;  %1729 = vmatprep.mubr.bf16.mxu0 %v3567_v37  ;;  %v3167_v13 = vld [vmem:[#allocation2 + $0x704] ss:$16 sps:$4 sm:$0xff]  }
  0x52   :  { %1770 = vmatprep.mubr.bf16.mxu1 %v3572_v40 }
  0x53   :  { %1700 = vmatpush1.bf16.msra.mxu0 %v3078_v14  ;;  %v3162_v14 = vld [vmem:[#allocation2 + $0x500] ss:$16 sps:$4 sm:$0xff]  }
  0x54   :  { %1741 = vmatpush1.bf16.msra.mxu1 %v3081_v15  ;;  %1701 = vmatprep.subr.bf16.mxu0 %v3086_v16  ;;  %v3165_v15 = vld [vmem:[#allocation2 + $0x700] ss:$16 sps:$4 sm:$0xff]  }
  0x55   :  { %1742 = vmatprep.subr.bf16.mxu1 %v3089_v17  ;;  %v45_v16 = vld [vmem:[%s3880_s0 + $0x20] sm:$0xff]  ;;  %v47_v17 = vld [vmem:[%s3880_s0 + $0x30] sm:$0xff] }
  0x57   :  { %1702 = vmatpush1.bf16.msra.mxu0 %v3084_v18  ;;  %v3170_v18 = vld [vmem:[#allocation2 + $0xec] ss:$16 sps:$4 sm:$0xff]  }
  0x58   :  { %1743 = vmatpush1.bf16.msra.mxu1 %v3087_v19  ;;  %1703 = vmatprep.subr.bf16.mxu0 %v3092_v20  ;;  %v3173_v19 = vld [vmem:[#allocation2 + $0x2ec] ss:$16 sps:$4 sm:$0xff]   ;;  %v3582_v20 = vpack.c.bf16 %v45_v16, %v45_v16 }
  0x59   :  { %1744 = vmatprep.subr.bf16.mxu1 %v3095_v21  ;;  %v3584_v21 = vpack.c.bf16 %v47_v17, %v47_v17  ;;  %v3254_v16 = vld [vmem:[#allocation2 + $0x12c] ss:$16 sps:$4 sm:$0xff]  }
  0x5a   :  { %v3257_v17 = vld [vmem:[#allocation2 + $0x32c] ss:$16 sps:$4 sm:$0xff]  }
  0x5b   :  { %1704 = vmatpush1.bf16.msra.mxu0 %v3090_v22  ;;  %v3168_v22 = vld [vmem:[#allocation2 + $0xe8] ss:$16 sps:$4 sm:$0xff]  }
  0x5c   :  { %1745 = vmatpush1.bf16.msra.mxu1 %v3093_v23  ;;  %1705 = vmatprep.subr.bf16.mxu0 %v3098_v24  ;;  %v3171_v23 = vld [vmem:[#allocation2 + $0x2e8] ss:$16 sps:$4 sm:$0xff]   ;;  %v3176_v24 = vld [vmem:[#allocation2 + $0xcc] ss:$16 sps:$4 sm:$0xff]  }
  0x5d   :  { %1746 = vmatprep.subr.bf16.mxu1 %v3101_v25  ;;  %v3179_v25 = vld [vmem:[#allocation2 + $0x2cc] ss:$16 sps:$4 sm:$0xff]  }
  0x5f   :  { %1706 = vmatpush1.bf16.msra.mxu0 %v3096_v26  ;;  %v3174_v26 = vld [vmem:[#allocation2 + $0xc8] ss:$16 sps:$4 sm:$0xff]  }
  0x60   :  { %1747 = vmatpush1.bf16.msra.mxu1 %v3099_v27  ;;  %1707 = vmatprep.subr.bf16.mxu0 %v3104_v28  ;;  %v3177_v27 = vld [vmem:[#allocation2 + $0x2c8] ss:$16 sps:$4 sm:$0xff]   ;;  %v3182_v28 = vld [vmem:[#allocation2 + $0xac] ss:$16 sps:$4 sm:$0xff]  }
  0x61   :  { %1748 = vmatprep.subr.bf16.mxu1 %v3107_v29  ;;  %v3185_v29 = vld [vmem:[#allocation2 + $0x2ac] ss:$16 sps:$4 sm:$0xff]  }
  0x63   :  { %1708 = vmatpush1.bf16.msra.mxu0 %v3102_v30  ;;  %v3180_v30 = vld [vmem:[#allocation2 + $0xa8] ss:$16 sps:$4 sm:$0xff]  }
  0x64   :  { %1749 = vmatpush1.bf16.msra.mxu1 %v3105_v31  ;;  %1709 = vmatprep.subr.bf16.mxu0 %v3110_v32  ;;  %v3183_v31 = vld [vmem:[#allocation2 + $0x2a8] ss:$16 sps:$4 sm:$0xff]   ;;  %v3188_v32 = vld [vmem:[#allocation2 + $0x8c] ss:$16 sps:$4 sm:$0xff]  }
  0x65   :  { %1750 = vmatprep.subr.bf16.mxu1 %v3113_v33  ;;  %v3191_v33 = vld [vmem:[#allocation2 + $0x28c] ss:$16 sps:$4 sm:$0xff]  }
  0x67   :  { %1710 = vmatpush1.bf16.msra.mxu0 %v3108_v35  ;;  %v3189_v35 = vld [vmem:[#allocation2 + $0x288] ss:$16 sps:$4 sm:$0xff]  }
  0x68   :  { %1751 = vmatpush1.bf16.msra.mxu1 %v3111_v36  ;;  %1711 = vmatprep.subr.bf16.mxu0 %v3116_v39  ;;  %v3194_v36 = vld [vmem:[#allocation2 + $0x6c] ss:$16 sps:$4 sm:$0xff]   ;;  %v3192_v39 = vld [vmem:[#allocation2 + $0x68] ss:$16 sps:$4 sm:$0xff]  }
  0x69   :  { %1752 = vmatprep.subr.bf16.mxu1 %v3119_v41  ;;  %v3203_v41 = vld [vmem:[#allocation2 + $0x24c] ss:$16 sps:$4 sm:$0xff]  }
  0x6b   :  { %1712 = vmatpush1.bf16.msra.mxu0 %v3114_v42  ;;  %v3198_v42 = vld [vmem:[#allocation2 + $0x48] ss:$16 sps:$4 sm:$0xff]  }
  0x6c   :  { %1753 = vmatpush1.bf16.msra.mxu1 %v3117_v43  ;;  %1713 = vmatprep.subr.bf16.mxu0 %v3122_v44  ;;  %v3201_v43 = vld [vmem:[#allocation2 + $0x248] ss:$16 sps:$4 sm:$0xff]   ;;  %v3206_v44 = vld [vmem:[#allocation2 + $0x2c] ss:$16 sps:$4 sm:$0xff]  }
  0x6d   :  { %1754 = vmatprep.subr.bf16.mxu1 %v3125_v45  ;;  %v3209_v45 = vld [vmem:[#allocation2 + $0x22c] ss:$16 sps:$4 sm:$0xff]  }
  0x6f   :  { %1714 = vmatpush2.bf16.msra.mxu0 %v3120_v46  ;;  %v3204_v46 = vld [vmem:[#allocation2 + $0x28] ss:$16 sps:$4 sm:$0xff]  }
  0x70   :  { %1755 = vmatpush2.bf16.msra.mxu1 %v3123_v47  ;;  %1715 = vmatprep.subr.bf16.mxu0 %v3128_v48  ;;  %v3207_v47 = vld [vmem:[#allocation2 + $0x228] ss:$16 sps:$4 sm:$0xff]   ;;  %v3212_v48 = vld [vmem:[#allocation2 + $0xc] ss:$16 sps:$4 sm:$0xff]  }
  0x71   :  { %1756 = vmatprep.subr.bf16.mxu1 %v3131_v50  ;;  %v3215_v50 = vld [vmem:[#allocation2 + $0x20c] ss:$16 sps:$4 sm:$0xff]  }
  0x73   :  { %1716 = vmatpush2.bf16.msra.mxu0 %v3126_v51  ;;  %v3210_v51 = vld [vmem:[#allocation2 + $0x8] ss:$16 sps:$4 sm:$0xff]  }
  0x74   :  { %1757 = vmatpush2.bf16.msra.mxu1 %v3129_v53  ;;  %1717 = vmatprep.subr.bf16.mxu0 %v3134_v54  ;;  %v3213_v53 = vld [vmem:[#allocation2 + $0x208] ss:$16 sps:$4 sm:$0xff]   ;;  %v3218_v54 = vld [vmem:[#allocation2 + $0x1ec] ss:$16 sps:$4 sm:$0xff]  }
  0x75   :  { %1758 = vmatprep.subr.bf16.mxu1 %v3137_v55  ;;  %v3221_v55 = vld [vmem:[#allocation2 + $0x3ec] ss:$16 sps:$4 sm:$0xff]  }
  0x77   :  { %1718 = vmatpush2.bf16.msra.mxu0 %v3132_v56  ;;  %v3216_v56 = vld [vmem:[#allocation2 + $0x1e8] ss:$16 sps:$4 sm:$0xff]  }
  0x78   :  { %1759 = vmatpush2.bf16.msra.mxu1 %v3135_v57  ;;  %1719 = vmatprep.subr.bf16.mxu0 %v3140_v58  ;;  %v3219_v57 = vld [vmem:[#allocation2 + $0x3e8] ss:$16 sps:$4 sm:$0xff]   ;;  %v3224_v58 = vld [vmem:[#allocation2 + $0x1cc] ss:$16 sps:$4 sm:$0xff]  }
  0x79   :  { %1760 = vmatprep.subr.bf16.mxu1 %v3143_v59  ;;  %v3227_v59 = vld [vmem:[#allocation2 + $0x3cc] ss:$16 sps:$4 sm:$0xff]  }
  0x7b   :  { %1720 = vmatpush2.bf16.msra.mxu0 %v3138_v60  ;;  %v3222_v60 = vld [vmem:[#allocation2 + $0x1c8] ss:$16 sps:$4 sm:$0xff]  }
  0x7c   :  { %1761 = vmatpush2.bf16.msra.mxu1 %v3141_v61  ;;  %1721 = vmatprep.subr.bf16.mxu0 %v3146_v62  ;;  %v3225_v61 = vld [vmem:[#allocation2 + $0x3c8] ss:$16 sps:$4 sm:$0xff]   ;;  %v3230_v62 = vld [vmem:[#allocation2 + $0x1ac] ss:$16 sps:$4 sm:$0xff]  }
  0x7d   :  { %1762 = vmatprep.subr.bf16.mxu1 %v3149_v63  ;;  %v3233_v63 = vld [vmem:[#allocation2 + $0x3ac] ss:$16 sps:$4 sm:$0xff]  }
  0x7f   :  { %1722 = vmatpush2.bf16.msra.mxu0 %v3144_v0  ;;  %v3228_v0 = vld [vmem:[#allocation2 + $0x1a8] ss:$16 sps:$4 sm:$0xff]  }
  0x80   :  { %1763 = vmatpush2.bf16.msra.mxu1 %v3147_v1  ;;  %1723 = vmatprep.subr.bf16.mxu0 %v3152_v2  ;;  %v3231_v1 = vld [vmem:[#allocation2 + $0x3a8] ss:$16 sps:$4 sm:$0xff]   ;;  %v3236_v2 = vld [vmem:[#allocation2 + $0x18c] ss:$16 sps:$4 sm:$0xff]  }
  0x81   :  { %1764 = vmatprep.subr.bf16.mxu1 %v3155_v3  ;;  %v3239_v3 = vld [vmem:[#allocation2 + $0x38c] ss:$16 sps:$4 sm:$0xff]  }
  0x83   :  { %1724 = vmatpush2.bf16.msra.mxu0 %v3150_v4  ;;  %v3234_v4 = vld [vmem:[#allocation2 + $0x188] ss:$16 sps:$4 sm:$0xff]  }
  0x84   :  { %1765 = vmatpush2.bf16.msra.mxu1 %v3153_v5  ;;  %1725 = vmatprep.subr.bf16.mxu0 %v3158_v6  ;;  %v3237_v5 = vld [vmem:[#allocation2 + $0x388] ss:$16 sps:$4 sm:$0xff]   ;;  %v3242_v6 = vld [vmem:[#allocation2 + $0x16c] ss:$16 sps:$4 sm:$0xff]  }
  0x85   :  { %1766 = vmatprep.subr.bf16.mxu1 %v3161_v7  ;;  %v3245_v7 = vld [vmem:[#allocation2 + $0x36c] ss:$16 sps:$4 sm:$0xff]  }
  0x87   :  { %1726 = vmatpush2.bf16.msra.mxu0 %v3156_v10  ;;  %v3240_v10 = vld [vmem:[#allocation2 + $0x168] ss:$16 sps:$4 sm:$0xff]  }
  0x88   :  { %1767 = vmatpush2.bf16.msra.mxu1 %v3159_v11  ;;  %1727 = vmatprep.subr.bf16.mxu0 %v3164_v12  ;;  %v3243_v11 = vld [vmem:[#allocation2 + $0x368] ss:$16 sps:$4 sm:$0xff]   ;;  %v3248_v12 = vld [vmem:[#allocation2 + $0x14c] ss:$16 sps:$4 sm:$0xff]  }
  0x89   :  { %1768 = vmatprep.subr.bf16.mxu1 %v3167_v13  ;;  %v3251_v13 = vld [vmem:[#allocation2 + $0x34c] ss:$16 sps:$4 sm:$0xff]  }
  0x8b   :  { %1728 = vmatpush2.bf16.msra.mxu0 %v3162_v14  ;;  %v3246_v14 = vld [vmem:[#allocation2 + $0x148] ss:$16 sps:$4 sm:$0xff]  }
  0x8c   :  { %1769 = vmatpush2.bf16.msra.mxu1 %v3165_v15  ;;  %1779 = vmatprep.subr.bf16.mxu0 %v3170_v18  ;;  %v3249_v15 = vld [vmem:[#allocation2 + $0x348] ss:$16 sps:$4 sm:$0xff]  }
  0x8d   :  { %1820 = vmatprep.subr.bf16.mxu1 %v3173_v19  ;;  %v3252_v18 = vld [vmem:[#allocation2 + $0x128] ss:$16 sps:$4 sm:$0xff]  }
  0x8e   :  { %1730 = vmatmul.mubr.bf16.vlgmr.msra.gmra.mxu0 %v3582_v20  ;;  %v3255_v19 = vld [vmem:[#allocation2 + $0x328] ss:$16 sps:$4 sm:$0xff]  }
  0x8f   :  { %1771 = vmatmul.mubr.bf16.vlgmr.msra.gmra.mxu1 %v3584_v21  ;;  %1780 = vmatpush1.bf16.msra.mxu0 %v3168_v22  ;;  %v3260_v22 = vld [vmem:[#allocation2 + $0x10c] ss:$16 sps:$4 sm:$0xff]  }
  0x90   :  { %1821 = vmatpush1.bf16.msra.mxu1 %v3171_v23  ;;  %1781 = vmatprep.subr.bf16.mxu0 %v3176_v24  ;;  %v3263_v23 = vld [vmem:[#allocation2 + $0x30c] ss:$16 sps:$4 sm:$0xff]   ;;  %v3258_v24 = vld [vmem:[#allocation2 + $0x108] ss:$16 sps:$4 sm:$0xff]  }
  0x91   :  { %1822 = vmatprep.subr.bf16.mxu1 %v3179_v25  ;;  %1811 = vmatprep.mubr.bf16.mxu0 %v3543_v49  ;;  %v3195_v49 = vld [vmem:[#allocation2 + $0x268] ss:$16 sps:$4 sm:$0xff]  }
  0x92   :  { %1852 = vmatprep.mubr.bf16.mxu1 %v3548_v52  ;;  %v3200_v52 = vld [vmem:[#allocation2 + $0x4c] ss:$16 sps:$4 sm:$0xff]   ;;  %v3261_v25 = vld [vmem:[#allocation2 + $0x308] ss:$16 sps:$4 sm:$0xff]  }
  0x93   :  { %1782 = vmatpush1.bf16.msra.mxu0 %v3174_v26  ;;  %v3266_v26 = vld [vmem:[#allocation2 + $0x4ec] ss:$16 sps:$4 sm:$0xff]  }
  0x94   :  { %1823 = vmatpush1.bf16.msra.mxu1 %v3177_v27  ;;  %1783 = vmatprep.subr.bf16.mxu0 %v3182_v28  ;;  %v3269_v27 = vld [vmem:[#allocation2 + $0x6ec] ss:$16 sps:$4 sm:$0xff]   ;;  %v3264_v28 = vld [vmem:[#allocation2 + $0x4e8] ss:$16 sps:$4 sm:$0xff]  }
  0x95   :  { %1824 = vmatprep.subr.bf16.mxu1 %v3185_v29  ;;  %v3267_v29 = vld [vmem:[#allocation2 + $0x6e8] ss:$16 sps:$4 sm:$0xff]  }
  0x97   :  { %1784 = vmatpush1.bf16.msra.mxu0 %v3180_v30  ;;  %v3272_v30 = vld [vmem:[#allocation2 + $0x4cc] ss:$16 sps:$4 sm:$0xff]  }
  0x98   :  { %1825 = vmatpush1.bf16.msra.mxu1 %v3183_v31  ;;  %1785 = vmatprep.subr.bf16.mxu0 %v3188_v32  ;;  %v3275_v31 = vld [vmem:[#allocation2 + $0x6cc] ss:$16 sps:$4 sm:$0xff]   ;;  %v3270_v32 = vld [vmem:[#allocation2 + $0x4c8] ss:$16 sps:$4 sm:$0xff]  }
  0x99   :  { %1826 = vmatprep.subr.bf16.mxu1 %v3191_v33  ;;  %v3273_v33 = vld [vmem:[#allocation2 + $0x6c8] ss:$16 sps:$4 sm:$0xff]  }
  0x9b   :  { %1786 = vmatpush1.bf16.msra.mxu0 %v3186_v34  ;;  %v3278_v34 = vld [vmem:[#allocation2 + $0x4ac] ss:$16 sps:$4 sm:$0xff]  }
  0x9c   :  { %1827 = vmatpush1.bf16.msra.mxu1 %v3189_v35  ;;  %1787 = vmatprep.subr.bf16.mxu0 %v3194_v36  ;;  %v3281_v35 = vld [vmem:[#allocation2 + $0x6ac] ss:$16 sps:$4 sm:$0xff]   ;;  %v3276_v36 = vld [vmem:[#allocation2 + $0x4a8] ss:$16 sps:$4 sm:$0xff]  }
  0x9d   :  { %1828 = vmatprep.subr.bf16.mxu1 %v3197_v38  ;;  %v3279_v38 = vld [vmem:[#allocation2 + $0x6a8] ss:$16 sps:$4 sm:$0xff]  }
  0x9f   :  { %1788 = vmatpush1.bf16.msra.mxu0 %v3192_v39  ;;  %v3284_v39 = vld [vmem:[#allocation2 + $0x48c] ss:$16 sps:$4 sm:$0xff]  }
  0xa0   :  { %1829 = vmatpush1.bf16.msra.mxu1 %v3195_v49  ;;  %1789 = vmatprep.subr.bf16.mxu0 %v3200_v52  ;;  %v3282_v49 = vld [vmem:[#allocation2 + $0x488] ss:$16 sps:$4 sm:$0xff]   ;;  %v3290_v52 = vld [vmem:[#allocation2 + $0x46c] ss:$16 sps:$4 sm:$0xff]  }
  0xa1   :  { %1830 = vmatprep.subr.bf16.mxu1 %v3203_v41  ;;  %v3293_v41 = vld [vmem:[#allocation2 + $0x66c] ss:$16 sps:$4 sm:$0xff]  }
  0xa3   :  { %1790 = vmatpush1.bf16.msra.mxu0 %v3198_v42  ;;  %v3288_v42 = vld [vmem:[#allocation2 + $0x468] ss:$16 sps:$4 sm:$0xff]  }
  0xa4   :  { %1831 = vmatpush1.bf16.msra.mxu1 %v3201_v43  ;;  %1791 = vmatprep.subr.bf16.mxu0 %v3206_v44  ;;  %v3291_v43 = vld [vmem:[#allocation2 + $0x668] ss:$16 sps:$4 sm:$0xff]   ;;  %v3296_v44 = vld [vmem:[#allocation2 + $0x44c] ss:$16 sps:$4 sm:$0xff]  }
  0xa5   :  { %1832 = vmatprep.subr.bf16.mxu1 %v3209_v45  ;;  %v3297_v45 = vld [vmem:[#allocation2 + $0x648] ss:$16 sps:$4 sm:$0xff]  }
  0xa7   :  { %1792 = vmatpush1.bf16.msra.mxu0 %v3204_v46  ;;  %v3302_v46 = vld [vmem:[#allocation2 + $0x42c] ss:$16 sps:$4 sm:$0xff]  }
  0xa8   :  { %1833 = vmatpush1.bf16.msra.mxu1 %v3207_v47  ;;  %1793 = vmatprep.subr.bf16.mxu0 %v3212_v48  ;;  %v3305_v47 = vld [vmem:[#allocation2 + $0x62c] ss:$16 sps:$4 sm:$0xff]   ;;  %v3300_v48 = vld [vmem:[#allocation2 + $0x428] ss:$16 sps:$4 sm:$0xff]  }
  0xa9   :  { %1834 = vmatprep.subr.bf16.mxu1 %v3215_v50  ;;  %v3303_v50 = vld [vmem:[#allocation2 + $0x628] ss:$16 sps:$4 sm:$0xff]  }
  0xab   :  { %1794 = vmatpush1.bf16.msra.mxu0 %v3210_v51  ;;  %v3308_v51 = vld [vmem:[#allocation2 + $0x40c] ss:$16 sps:$4 sm:$0xff]  }
  0xac   :  { %1835 = vmatpush1.bf16.msra.mxu1 %v3213_v53  ;;  %1795 = vmatprep.subr.bf16.mxu0 %v3218_v54  ;;  %v3311_v53 = vld [vmem:[#allocation2 + $0x60c] ss:$16 sps:$4 sm:$0xff]   ;;  %v3306_v54 = vld [vmem:[#allocation2 + $0x408] ss:$16 sps:$4 sm:$0xff]  }
  0xad   :  { %1836 = vmatprep.subr.bf16.mxu1 %v3221_v55  ;;  %v3309_v55 = vld [vmem:[#allocation2 + $0x608] ss:$16 sps:$4 sm:$0xff]  }
  0xaf   :  { %1796 = vmatpush2.bf16.msra.mxu0 %v3216_v56  ;;  %v3314_v56 = vld [vmem:[#allocation2 + $0x5ec] ss:$16 sps:$4 sm:$0xff]  }
  0xb0   :  { %1837 = vmatpush2.bf16.msra.mxu1 %v3219_v57  ;;  %1797 = vmatprep.subr.bf16.mxu0 %v3224_v58  ;;  %v3317_v57 = vld [vmem:[#allocation2 + $0x7ec] ss:$16 sps:$4 sm:$0xff]   ;;  %v3312_v58 = vld [vmem:[#allocation2 + $0x5e8] ss:$16 sps:$4 sm:$0xff]  }
  0xb1   :  { %1838 = vmatprep.subr.bf16.mxu1 %v3227_v59  ;;  %v3315_v59 = vld [vmem:[#allocation2 + $0x7e8] ss:$16 sps:$4 sm:$0xff]  }
  0xb3   :  { %1798 = vmatpush2.bf16.msra.mxu0 %v3222_v60  ;;  %v3320_v60 = vld [vmem:[#allocation2 + $0x5cc] ss:$16 sps:$4 sm:$0xff]  }
  0xb4   :  { %1839 = vmatpush2.bf16.msra.mxu1 %v3225_v61  ;;  %1799 = vmatprep.subr.bf16.mxu0 %v3230_v62  ;;  %v3323_v61 = vld [vmem:[#allocation2 + $0x7cc] ss:$16 sps:$4 sm:$0xff]   ;;  %v3318_v62 = vld [vmem:[#allocation2 + $0x5c8] ss:$16 sps:$4 sm:$0xff]  }
  0xb5   :  { %1840 = vmatprep.subr.bf16.mxu1 %v3233_v63  ;;  %v3321_v63 = vld [vmem:[#allocation2 + $0x7c8] ss:$16 sps:$4 sm:$0xff]  }
  0xb7   :  { %1800 = vmatpush2.bf16.msra.mxu0 %v3228_v0  ;;  %v3326_v0 = vld [vmem:[#allocation2 + $0x5ac] ss:$16 sps:$4 sm:$0xff]  }
  0xb8   :  { %1841 = vmatpush2.bf16.msra.mxu1 %v3231_v1  ;;  %1801 = vmatprep.subr.bf16.mxu0 %v3236_v2  ;;  %v3329_v1 = vld [vmem:[#allocation2 + $0x7ac] ss:$16 sps:$4 sm:$0xff]   ;;  %v3324_v2 = vld [vmem:[#allocation2 + $0x5a8] ss:$16 sps:$4 sm:$0xff]  }
  0xb9   :  { %1842 = vmatprep.subr.bf16.mxu1 %v3239_v3  ;;  %v3327_v3 = vld [vmem:[#allocation2 + $0x7a8] ss:$16 sps:$4 sm:$0xff]  }
  0xbb   :  { %1802 = vmatpush2.bf16.msra.mxu0 %v3234_v4  ;;  %v3332_v4 = vld [vmem:[#allocation2 + $0x58c] ss:$16 sps:$4 sm:$0xff]  }
  0xbc   :  { %1843 = vmatpush2.bf16.msra.mxu1 %v3237_v5  ;;  %1803 = vmatprep.subr.bf16.mxu0 %v3242_v6  ;;  %v3335_v5 = vld [vmem:[#allocation2 + $0x78c] ss:$16 sps:$4 sm:$0xff]   ;;  %v3330_v6 = vld [vmem:[#allocation2 + $0x588] ss:$16 sps:$4 sm:$0xff]  }
  0xbd   :  { %1844 = vmatprep.subr.bf16.mxu1 %v3245_v7  ;;  %v3333_v7 = vld [vmem:[#allocation2 + $0x788] ss:$16 sps:$4 sm:$0xff]  }
  0xbf   :  { %1804 = vmatpush2.bf16.msra.mxu0 %v3240_v10  ;;  %v3338_v10 = vld [vmem:[#allocation2 + $0x56c] ss:$16 sps:$4 sm:$0xff]  }
  0xc0   :  { %1845 = vmatpush2.bf16.msra.mxu1 %v3243_v11  ;;  %1805 = vmatprep.subr.bf16.mxu0 %v3248_v12  ;;  %v3341_v11 = vld [vmem:[#allocation2 + $0x76c] ss:$16 sps:$4 sm:$0xff]   ;;  %v3336_v12 = vld [vmem:[#allocation2 + $0x568] ss:$16 sps:$4 sm:$0xff]  }
  0xc1   :  { %1846 = vmatprep.subr.bf16.mxu1 %v3251_v13  ;;  %v3339_v13 = vld [vmem:[#allocation2 + $0x768] ss:$16 sps:$4 sm:$0xff]  }
  0xc3   :  { %1806 = vmatpush2.bf16.msra.mxu0 %v3246_v14  ;;  %v3344_v14 = vld [vmem:[#allocation2 + $0x54c] ss:$16 sps:$4 sm:$0xff]  }
  0xc4   :  { %1847 = vmatpush2.bf16.msra.mxu1 %v3249_v15  ;;  %1807 = vmatprep.subr.bf16.mxu0 %v3254_v16  ;;  %v3347_v15 = vld [vmem:[#allocation2 + $0x74c] ss:$16 sps:$4 sm:$0xff]   ;;  %v3342_v16 = vld [vmem:[#allocation2 + $0x548] ss:$16 sps:$4 sm:$0xff]  }
  0xc5   :  { %1848 = vmatprep.subr.bf16.mxu1 %v3257_v17  ;;  %v3345_v17 = vld [vmem:[#allocation2 + $0x748] ss:$16 sps:$4 sm:$0xff]  }
  0xc7   :  { %1808 = vmatpush2.bf16.msra.mxu0 %v3252_v18  ;;  %v3350_v18 = vld [vmem:[#allocation2 + $0x52c] ss:$16 sps:$4 sm:$0xff]  }
  0xc8   :  { %1849 = vmatpush2.bf16.msra.mxu1 %v3255_v19  ;;  %1809 = vmatprep.subr.bf16.mxu0 %v3260_v22  ;;  %v3353_v19 = vld [vmem:[#allocation2 + $0x72c] ss:$16 sps:$4 sm:$0xff]   ;;  %v3348_v22 = vld [vmem:[#allocation2 + $0x528] ss:$16 sps:$4 sm:$0xff]  }
  0xc9   :  { %1850 = vmatprep.subr.bf16.mxu1 %v3263_v23  ;;  %v3351_v23 = vld [vmem:[#allocation2 + $0x728] ss:$16 sps:$4 sm:$0xff]  }
  0xcb   :  { %1810 = vmatpush2.bf16.msra.mxu0 %v3258_v24  ;;  %v3356_v24 = vld [vmem:[#allocation2 + $0x50c] ss:$16 sps:$4 sm:$0xff]  }
  0xcc   :  { %1851 = vmatpush2.bf16.msra.mxu1 %v3261_v25  ;;  %1861 = vmatprep.subr.bf16.mxu0 %v3266_v26  ;;  %v3359_v25 = vld [vmem:[#allocation2 + $0x70c] ss:$16 sps:$4 sm:$0xff]   ;;  %v3354_v26 = vld [vmem:[#allocation2 + $0x508] ss:$16 sps:$4 sm:$0xff]  }
  0xcd   :  { %1902 = vmatprep.subr.bf16.mxu1 %v3269_v27  ;;  %v3357_v27 = vld [vmem:[#allocation2 + $0x708] ss:$16 sps:$4 sm:$0xff]  }
  0xce   :  { %1812 = vmatmul.mubr.bf16.vlgmr.msra.gmra.mxu0 %v3558_v8  ;;  %v3287_v8 = vld [vmem:[#allocation2 + $0x68c] ss:$16 sps:$4 sm:$0xff]  }
  0xcf   :  { %1853 = vmatmul.mubr.bf16.vlgmr.msra.gmra.mxu1 %v3560_v9  ;;  %1862 = vmatpush1.bf16.msra.mxu0 %v3264_v28  ;;  %v3285_v9 = vld [vmem:[#allocation2 + $0x688] ss:$16 sps:$4 sm:$0xff]   ;;  %v3362_v28 = vld [vmem:[%s3883_s3 + $0x74] ss:$8 sps:$4 sm:$0xff]  }
  0xd0   :  { %1903 = vmatpush1.bf16.msra.mxu1 %v3267_v29  ;;  %1863 = vmatprep.subr.bf16.mxu0 %v3272_v30  ;;  %v3360_v29 = vld [vmem:[%s3883_s3 + $0x70] ss:$8 sps:$4 sm:$0xff]   ;;  %v3365_v30 = vld [vmem:[%s3883_s3 + $0x64] ss:$8 sps:$4 sm:$0xff]  }
  0xd1   :  { %1904 = vmatprep.subr.bf16.mxu1 %v3275_v31  ;;  %1893 = vmatprep.mubr.bf16.mxu0 %v3567_v37  ;;  %v3299_v37 = vld [vmem:[#allocation2 + $0x64c] ss:$16 sps:$4 sm:$0xff]  }
  0xd2   :  { %1934 = vmatprep.mubr.bf16.mxu1 %v3572_v40  ;;  %v3294_v40 = vld [vmem:[#allocation2 + $0x448] ss:$16 sps:$4 sm:$0xff]  }
  0xd3   :  { %1864 = vmatpush1.bf16.msra.mxu0 %v3270_v32 }
  0xd4   :  { %1905 = vmatpush1.bf16.msra.mxu1 %v3273_v33  ;;  %1865 = vmatprep.subr.bf16.mxu0 %v3278_v34  ;;  %v3363_v33 = vld [vmem:[%s3883_s3 + $0x60] ss:$8 sps:$4 sm:$0xff]  }
  0xd5   :  { %1906 = vmatprep.subr.bf16.mxu1 %v3281_v35 }
  0xd7   :  { %1866 = vmatpush1.bf16.msra.mxu0 %v3276_v36  ;;  %v3368_v36 = vld [vmem:[%s3883_s3 + $0x54] ss:$8 sps:$4 sm:$0xff]  }
  0xd8   :  { %1907 = vmatpush1.bf16.msra.mxu1 %v3279_v38  ;;  %1867 = vmatprep.subr.bf16.mxu0 %v3284_v39 }
  0xd9   :  { %1908 = vmatprep.subr.bf16.mxu1 %v3287_v8 }
  0xdb   :  { %1868 = vmatpush1.bf16.msra.mxu0 %v3282_v49  ;;  %v3371_v49 = vld [vmem:[%s3883_s3 + $0x44] ss:$8 sps:$4 sm:$0xff]  }
  0xdc   :  { %1909 = vmatpush1.bf16.msra.mxu1 %v3285_v9  ;;  %1869 = vmatprep.subr.bf16.mxu0 %v3290_v52  ;;  %v3408_v9 = vld [vmem:[%s3883_s3 + $0x170] ss:$8 sps:$4 sm:$0xff]   ;;  %v3410_v52 = vld [vmem:[%s3883_s3 + $0x174] ss:$8 sps:$4 sm:$0xff]  }
  0xdd   :  { %1910 = vmatprep.subr.bf16.mxu1 %v3293_v41  ;;  %v3413_v41 = vld [vmem:[%s3883_s3 + $0x164] ss:$8 sps:$4 sm:$0xff]  }
  0xdf   :  { %1870 = vmatpush1.bf16.msra.mxu0 %v3288_v42  ;;  %v3369_v42 = vld [vmem:[%s3883_s3 + $0x40] ss:$8 sps:$4 sm:$0xff]  }
  0xe0   :  { %1911 = vmatpush1.bf16.msra.mxu1 %v3291_v43  ;;  %1871 = vmatprep.subr.bf16.mxu0 %v3296_v44  ;;  %v3411_v43 = vld [vmem:[%s3883_s3 + $0x160] ss:$8 sps:$4 sm:$0xff]   ;;  %v3374_v44 = vld [vmem:[%s3883_s3 + $0x34] ss:$8 sps:$4 sm:$0xff]  }
  0xe1   :  { %1912 = vmatprep.subr.bf16.mxu1 %v3299_v37  ;;  %v3416_v37 = vld [vmem:[%s3883_s3 + $0x154] ss:$8 sps:$4 sm:$0xff]  }
  0xe3   :  { %1872 = vmatpush1.bf16.msra.mxu0 %v3294_v40  ;;  %v3372_v40 = vld [vmem:[%s3883_s3 + $0x30] ss:$8 sps:$4 sm:$0xff]  }
  0xe4   :  { %1913 = vmatpush1.bf16.msra.mxu1 %v3297_v45  ;;  %1873 = vmatprep.subr.bf16.mxu0 %v3302_v46  ;;  %v3414_v45 = vld [vmem:[%s3883_s3 + $0x150] ss:$8 sps:$4 sm:$0xff]   ;;  %v3377_v46 = vld [vmem:[%s3883_s3 + $0x24] ss:$8 sps:$4 sm:$0xff]  }
  0xe5   :  { %1914 = vmatprep.subr.bf16.mxu1 %v3305_v47  ;;  %v3419_v47 = vld [vmem:[%s3883_s3 + $0x144] ss:$8 sps:$4 sm:$0xff]  }
  0xe7   :  { %1874 = vmatpush1.bf16.msra.mxu0 %v3300_v48  ;;  %v3375_v48 = vld [vmem:[%s3883_s3 + $0x20] ss:$8 sps:$4 sm:$0xff]  }
  0xe8   :  { %1915 = vmatpush1.bf16.msra.mxu1 %v3303_v50  ;;  %1875 = vmatprep.subr.bf16.mxu0 %v3308_v51  ;;  %v3417_v50 = vld [vmem:[%s3883_s3 + $0x140] ss:$8 sps:$4 sm:$0xff]   ;;  %v3380_v51 = vld [vmem:[%s3883_s3 + $0x14] ss:$8 sps:$4 sm:$0xff]  }
  0xe9   :  { %1916 = vmatprep.subr.bf16.mxu1 %v3311_v53  ;;  %v3422_v53 = vld [vmem:[%s3883_s3 + $0x134] ss:$8 sps:$4 sm:$0xff]  }
  0xeb   :  { %1876 = vmatpush1.bf16.msra.mxu0 %v3306_v54  ;;  %v3378_v54 = vld [vmem:[%s3883_s3 + $0x10] ss:$8 sps:$4 sm:$0xff]  }
  0xec   :  { %1917 = vmatpush1.bf16.msra.mxu1 %v3309_v55  ;;  %1877 = vmatprep.subr.bf16.mxu0 %v3314_v56  ;;  %v3420_v55 = vld [vmem:[%s3883_s3 + $0x130] ss:$8 sps:$4 sm:$0xff]   ;;  %v3383_v56 = vld [vmem:[%s3883_s3 + $0x4] ss:$8 sps:$4 sm:$0xff]  }
  0xed   :  { %1918 = vmatprep.subr.bf16.mxu1 %v3317_v57  ;;  %v3425_v57 = vld [vmem:[%s3883_s3 + $0x124] ss:$8 sps:$4 sm:$0xff]  }
  0xef   :  { %1878 = vmatpush2.bf16.msra.mxu0 %v3312_v58  ;;  %v3381_v58 = vld [vmem:[%s3883_s3] ss:$8 sps:$4 sm:$0xff]  }
  0xf0   :  { %1919 = vmatpush2.bf16.msra.mxu1 %v3315_v59  ;;  %1879 = vmatprep.subr.bf16.mxu0 %v3320_v60  ;;  %v3423_v59 = vld [vmem:[%s3883_s3 + $0x120] ss:$8 sps:$4 sm:$0xff]   ;;  %v3386_v60 = vld [vmem:[%s3883_s3 + $0xf4] ss:$8 sps:$4 sm:$0xff]  }
  0xf1   :  { %1920 = vmatprep.subr.bf16.mxu1 %v3323_v61  ;;  %v3428_v61 = vld [vmem:[%s3883_s3 + $0x114] ss:$8 sps:$4 sm:$0xff]  }
  0xf3   :  { %1880 = vmatpush2.bf16.msra.mxu0 %v3318_v62  ;;  %v3384_v62 = vld [vmem:[%s3883_s3 + $0xf0] ss:$8 sps:$4 sm:$0xff]  }
  0xf4   :  { %1921 = vmatpush2.bf16.msra.mxu1 %v3321_v63  ;;  %1881 = vmatprep.subr.bf16.mxu0 %v3326_v0  ;;  %v3426_v63 = vld [vmem:[%s3883_s3 + $0x110] ss:$8 sps:$4 sm:$0xff]   ;;  %v3389_v0 = vld [vmem:[%s3883_s3 + $0xe4] ss:$8 sps:$4 sm:$0xff]  }
  0xf5   :  { %1922 = vmatprep.subr.bf16.mxu1 %v3329_v1  ;;  %v3431_v1 = vld [vmem:[%s3883_s3 + $0x104] ss:$8 sps:$4 sm:$0xff]  }
  0xf7   :  { %1882 = vmatpush2.bf16.msra.mxu0 %v3324_v2  ;;  %v3387_v2 = vld [vmem:[%s3883_s3 + $0xe0] ss:$8 sps:$4 sm:$0xff]  }
  0xf8   :  { %1923 = vmatpush2.bf16.msra.mxu1 %v3327_v3  ;;  %1883 = vmatprep.subr.bf16.mxu0 %v3332_v4  ;;  %v3429_v3 = vld [vmem:[%s3883_s3 + $0x100] ss:$8 sps:$4 sm:$0xff]   ;;  %v3392_v4 = vld [vmem:[%s3883_s3 + $0xd4] ss:$8 sps:$4 sm:$0xff]  }
  0xf9   :  { %1924 = vmatprep.subr.bf16.mxu1 %v3335_v5  ;;  %v3434_v5 = vld [vmem:[%s3883_s3 + $0x1f4] ss:$8 sps:$4 sm:$0xff]  }
  0xfb   :  { %1884 = vmatpush2.bf16.msra.mxu0 %v3330_v6  ;;  %v3390_v6 = vld [vmem:[%s3883_s3 + $0xd0] ss:$8 sps:$4 sm:$0xff]  }
  0xfc   :  { %1925 = vmatpush2.bf16.msra.mxu1 %v3333_v7  ;;  %1885 = vmatprep.subr.bf16.mxu0 %v3338_v10  ;;  %v3432_v7 = vld [vmem:[%s3883_s3 + $0x1f0] ss:$8 sps:$4 sm:$0xff]   ;;  %v3395_v10 = vld [vmem:[%s3883_s3 + $0xc4] ss:$8 sps:$4 sm:$0xff]  }
  0xfd   :  { %1926 = vmatprep.subr.bf16.mxu1 %v3341_v11  ;;  %v3437_v11 = vld [vmem:[%s3883_s3 + $0x1e4] ss:$8 sps:$4 sm:$0xff]  }
  0xff   :  { %1886 = vmatpush2.bf16.msra.mxu0 %v3336_v12  ;;  %v3393_v12 = vld [vmem:[%s3883_s3 + $0xc0] ss:$8 sps:$4 sm:$0xff]  }
 0x100   :  { %1927 = vmatpush2.bf16.msra.mxu1 %v3339_v13  ;;  %1887 = vmatprep.subr.bf16.mxu0 %v3344_v14  ;;  %v3435_v13 = vld [vmem:[%s3883_s3 + $0x1e0] ss:$8 sps:$4 sm:$0xff]   ;;  %v3398_v14 = vld [vmem:[%s3883_s3 + $0xb4] ss:$8 sps:$4 sm:$0xff]  }
 0x101   :  { %1928 = vmatprep.subr.bf16.mxu1 %v3347_v15  ;;  %v3440_v15 = vld [vmem:[%s3883_s3 + $0x1d4] ss:$8 sps:$4 sm:$0xff]  }
 0x103   :  { %1888 = vmatpush2.bf16.msra.mxu0 %v3342_v16  ;;  %v315_v16 = vlaneseq }
 0x104   :  { %1929 = vmatpush2.bf16.msra.mxu1 %v3345_v17  ;;  %1889 = vmatprep.subr.bf16.mxu0 %v3350_v18  ;;  %v3396_v17 = vld [vmem:[%s3883_s3 + $0xb0] ss:$8 sps:$4 sm:$0xff]  }
 0x105   :  { %1930 = vmatprep.subr.bf16.mxu1 %v3353_v19  ;;  %v3438_v18 = vld [vmem:[%s3883_s3 + $0x1d0] ss:$8 sps:$4 sm:$0xff]   ;;  %v3401_v19 = vld [vmem:[%s3883_s3 + $0xa4] ss:$8 sps:$4 sm:$0xff]  }
 0x107   :  { %1890 = vmatpush2.bf16.msra.mxu0 %v3348_v22  ;;  %v3443_v22 = vld [vmem:[%s3883_s3 + $0x1c4] ss:$8 sps:$4 sm:$0xff]  }
 0x108   :  { %1931 = vmatpush2.bf16.msra.mxu1 %v3351_v23  ;;  %1891 = vmatprep.subr.bf16.mxu0 %v3356_v24  ;;  %v3754_v23 = vshrl.u32 %v315_v16, 7  ;;  %v3399_v24 = vld [vmem:[%s3883_s3 + $0xa0] ss:$8 sps:$4 sm:$0xff]   ;;  %v3467_v16 = vld [vmem:[%s3885_s5 + $0x10] sm:$0xff]  }
 0x109   :  { %1932 = vmatprep.subr.bf16.mxu1 %v3359_v25  ;;  %v3441_v25 = vld [vmem:[%s3883_s3 + $0x1c0] ss:$8 sps:$4 sm:$0xff]  }
 0x10b   :  { %1892 = vmatpush2.bf16.msra.mxu0 %v3354_v26  ;;  %v3404_v26 = vld [vmem:[%s3883_s3 + $0x94] ss:$8 sps:$4 sm:$0xff]  }
 0x10c   :  { %1933 = vmatpush2.bf16.msra.mxu1 %v3357_v27  ;;  %2347 = vmatprep.subr.bf16.mxu0 %v3362_v28  ;;  %v3446_v27 = vld [vmem:[%s3883_s3 + $0x1b4] ss:$8 sps:$4 sm:$0xff]   ;;  %v317_v28 = vsub.s32 0, %v3754_v23 }
 0x10d   :  { %2388 = vmatprep.subr.bf16.mxu1 %v3410_v52 }
 0x10e   :  { %v3603_v31 = vpop.f32.mrf.mxu0  ;;  %1894 = vmatmul.mubr.bf16.vlgmr.msra.gmra.mxu0 %v3582_v20  ;;  %v3366_v20 = vld [vmem:[%s3883_s3 + $0x50] ss:$8 sps:$4 sm:$0xff]  }
 0x10f   :  { %v3605_v32 = vpop.f32.mrf.mxu1  ;;  %1935 = vmatmul.mubr.bf16.vlgmr.msra.gmra.mxu1 %v3584_v21  ;;  %2348 = vmatpush1.bf16.msra.mxu0 %v3360_v29  ;;  %v3772_v29 = vld [vmem:[%s3882_s2] sm:$0xf] }
 0x110   :  { %v3612_v34 = vpop.f32.mrf.mxu0  ;;  %2349 = vmatprep.subr.bf16.mxu0 %v3365_v30  ;;  %2389 = vmatpush1.bf16.msra.mxu1 %v3408_v9  ;;  %v321_v30 = vsub.s32 1, %v3754_v23  ;;  %v3449_v9 = vld [vmem:[%s3883_s3 + $0x1a4] ss:$8 sps:$4 sm:$0xff]  }
 0x111   :  { %v3614_v35 = vpop.f32.mrf.mxu1  ;;  %2390 = vmatprep.subr.bf16.mxu1 %v3413_v41  ;;  %v3447_v41 = vld [vmem:[%s3883_s3 + $0x1a0] ss:$8 sps:$4 sm:$0xff]  }
 0x112   :  { %v1653_v38 = vpop.f32.mrf.mxu0 }
 0x113   :  { %v1694_v39 = vpop.f32.mrf.mxu1  ;;  %2350 = vmatpush1.bf16.msra.mxu0 %v3363_v33  ;;  %v3402_v33 = vld [vmem:[%s3883_s3 + $0x90] ss:$8 sps:$4 sm:$0xff]   ;;  %v3407_v38 = vld [vmem:[%s3883_s3 + $0x84] ss:$8 sps:$4 sm:$0xff]  }
 0x114   :  { %v1654_v21 = vpop.f32.mrf.mxu0  ;;  %2351 = vmatprep.subr.bf16.mxu0 %v3368_v36  ;;  %2391 = vmatpush1.bf16.msra.mxu1 %v3411_v43  ;;  %v3444_v36 = vld [vmem:[%s3883_s3 + $0x1b0] ss:$8 sps:$4 sm:$0xff]   ;;  %v318_v39 = vrot.slane %v3772_v29, %v317_v28 }
 0x115   :  { %v1695_v8 = vpop.f32.mrf.mxu1  ;;  %2392 = vmatprep.subr.bf16.mxu1 %v3416_v37  ;;  %v3405_v21 = vld [vmem:[%s3883_s3 + $0x80] ss:$8 sps:$4 sm:$0xff]  }
 0x116   :  { %v1650_v8 = vadd.f32 %v3603_v31, %v318_v39 }
 0x117   :  { %2352 = vmatpush1.bf16.msra.mxu0 %v3366_v20  ;;  %v322_v20 = vrot.slane %v3772_v29, %v321_v30 }
 0x118   :  { %2353 = vmatprep.subr.bf16.mxu0 %v3371_v49  ;;  %2393 = vmatpush1.bf16.msra.mxu1 %v3414_v45  ;;  %v1691_v52 = vadd.f32 %v3605_v32, %v1650_v8  ;;  %v3450_v32 = vld [vmem:[%s3883_s3 + $0x190] ss:$8 sps:$4 sm:$0xff]  }
 0x119   :  { %2394 = vmatprep.subr.bf16.mxu1 %v3419_v47  ;;  %v1652_v49 = vadd.f32 %v3612_v34, %v322_v20 }
 0x11b   :  { %2354 = vmatpush1.bf16.msra.mxu0 %v3369_v42 }
 0x11c   :  { %2355 = vmatprep.subr.bf16.mxu0 %v3374_v44  ;;  %2395 = vmatpush1.bf16.msra.mxu1 %v3417_v50  ;;  %v1693_v44 = vadd.f32 %v3614_v35, %v1652_v49 }
 0x11d   :  { %2396 = vmatprep.subr.bf16.mxu1 %v3422_v53 }
 0x11f   :  { %2356 = vmatpush1.bf16.msra.mxu0 %v3372_v40  ;;  %v3452_v40 = vld [vmem:[%s3883_s3 + $0x194] ss:$8 sps:$4 sm:$0xff]  }
 0x120   :  { %2357 = vmatprep.subr.bf16.mxu0 %v3377_v46  ;;  %2397 = vmatpush1.bf16.msra.mxu1 %v3420_v55 }
 0x121   :  { %2398 = vmatprep.subr.bf16.mxu1 %v3425_v57 }
 0x123   :  { %2358 = vmatpush1.bf16.msra.mxu0 %v3375_v48 }
 0x124   :  { %2359 = vmatprep.subr.bf16.mxu0 %v3380_v51  ;;  %2399 = vmatpush1.bf16.msra.mxu1 %v3423_v59 }
 0x125   :  { %2400 = vmatprep.subr.bf16.mxu1 %v3428_v61 }
 0x127   :  { %2360 = vmatpush1.bf16.msra.mxu0 %v3378_v54  ;;  %v3455_v54 = vld [vmem:[%s3883_s3 + $0x184] ss:$8 sps:$4 sm:$0xff]  }
 0x128   :  { %2361 = vmatprep.subr.bf16.mxu0 %v3383_v56  ;;  %2401 = vmatpush1.bf16.msra.mxu1 %v3426_v63  ;;  %v3453_v56 = vld [vmem:[%s3883_s3 + $0x180] ss:$8 sps:$4 sm:$0xff]  }
 0x129   :  { %2402 = vmatprep.subr.bf16.mxu1 %v3431_v1 }
 0x12b   :  { %2362 = vmatpush1.bf16.msra.mxu0 %v3381_v58 }
 0x12c   :  { %2363 = vmatprep.subr.bf16.mxu0 %v3386_v60  ;;  %2403 = vmatpush1.bf16.msra.mxu1 %v3429_v3  ;;  %v3456_v3 = vld [vmem:[%s3885_s5 + $0x78] sm:$0xff]  }
 0x12d   :  { %2404 = vmatprep.subr.bf16.mxu1 %v3434_v5  ;;  %v3458_v5 = vld [vmem:[%s3885_s5 + $0x70] sm:$0xff]  }
 0x12f   :  { %2364 = vmatpush2.bf16.msra.mxu0 %v3384_v62 }
 0x130   :  { %2365 = vmatprep.subr.bf16.mxu0 %v3389_v0  ;;  %2405 = vmatpush2.bf16.msra.mxu1 %v3432_v7  ;;  %v3460_v7 = vld [vmem:[%s3885_s5 + $0x68] sm:$0xff]  }
 0x131   :  { %2406 = vmatprep.subr.bf16.mxu1 %v3437_v11  ;;  %v3462_v11 = vld [vmem:[%s3885_s5 + $0x60] sm:$0xff]  }
 0x133   :  { %2366 = vmatpush2.bf16.msra.mxu0 %v3387_v2 }
 0x134   :  { %2367 = vmatprep.subr.bf16.mxu0 %v3392_v4  ;;  %2407 = vmatpush2.bf16.msra.mxu1 %v3435_v13  ;;  %v3457_v4 = vld [vmem:[%s3885_s5 + $0x38] sm:$0xff]  }
 0x135   :  { %2408 = vmatprep.subr.bf16.mxu1 %v3440_v15  ;;  %v3464_v13 = vld [vmem:[%s3885_s5 + $0x58] sm:$0xff]   ;;  %v3466_v15 = vld [vmem:[%s3885_s5 + $0x50] sm:$0xff]  }
 0x137   :  { %2368 = vmatpush2.bf16.msra.mxu0 %v3390_v6  ;;  %v3459_v6 = vld [vmem:[%s3885_s5 + $0x30] sm:$0xff]  }
 0x138   :  { %2369 = vmatprep.subr.bf16.mxu0 %v3395_v10  ;;  %2409 = vmatpush2.bf16.msra.mxu1 %v3438_v18  ;;  %v3461_v10 = vld [vmem:[%s3885_s5 + $0x28] sm:$0xff]   ;;  %v329_v18 = vsub.s32 3, %v3754_v23 }
 0x139   :  { %2410 = vmatprep.subr.bf16.mxu1 %v3443_v22 }
 0x13a   :  { %v330_v22 = vrot.slane %v3772_v29, %v329_v18 }
 0x13b   :  { %2370 = vmatpush2.bf16.msra.mxu0 %v3393_v12  ;;  %v3463_v12 = vld [vmem:[%s3885_s5 + $0x20] sm:$0xff]  }
 0x13c   :  { %2371 = vmatprep.subr.bf16.mxu0 %v3398_v14  ;;  %2411 = vmatpush2.bf16.msra.mxu1 %v3441_v25  ;;  %v3465_v14 = vld [vmem:[%s3885_s5 + $0x18] sm:$0xff]  }
 0x13d   :  { %2412 = vmatprep.subr.bf16.mxu1 %v3446_v27 }
 0x13f   :  { %2372 = vmatpush2.bf16.msra.mxu0 %v3396_v17  ;;  %v325_v17 = vsub.s32 2, %v3754_v23  ;;  %v2934_v23 = vld [vmem:[%s3886_s6] ss:$0 sm:$0xff] }
 0x140   :  { %2373 = vmatprep.subr.bf16.mxu0 %v3401_v19  ;;  %2413 = vmatpush2.bf16.msra.mxu1 %v3444_v36 }
 0x141   :  { %2414 = vmatprep.subr.bf16.mxu1 %v3449_v9  ;;  %v326_v19 = vrot.slane %v3772_v29, %v325_v17 }
 0x143   :  { %2374 = vmatpush2.bf16.msra.mxu0 %v3399_v24 }
 0x144   :  { %2375 = vmatprep.subr.bf16.mxu0 %v3404_v26  ;;  %2415 = vmatpush2.bf16.msra.mxu1 %v3447_v41 }
 0x145   :  { %2416 = vmatprep.subr.bf16.mxu1 %v3452_v40  ;;  %v3469_v40 = vld [vmem:[%s3885_s5 + $0x8] sm:$0xff]  }
 0x147   :  { %2376 = vmatpush2.bf16.msra.mxu0 %v3402_v33 }
 0x148   :  { %2377 = vmatprep.subr.bf16.mxu0 %v3407_v38  ;;  %2417 = vmatpush2.bf16.msra.mxu1 %v3450_v32  ;;  %v3470_v32 = vld [vmem:[%s3885_s5 + $0x40] sm:$0xff]  }
 0x149   :  { %2418 = vmatprep.subr.bf16.mxu1 %v3455_v54 }
 0x14b   :  { %2378 = vmatpush2.bf16.msra.mxu0 %v3405_v21 }
 0x14c   :  { %2419 = vmatpush2.bf16.msra.mxu1 %v3453_v56  ;;  %2951 = vmatprep.subr.bf16.mxu0 %v3456_v3 }
 0x14e   :  { %v1731_v42 = vpop.f32.mrf.mxu0 }
 0x14f   :  { %v1772_v43 = vpop.f32.mrf.mxu1  ;;  %v1732_v37 = vadd.f32 %v1731_v42, %v1691_v52 }
 0x150   :  { %v1733_v31 = vpop.f32.mrf.mxu0 }
 0x151   :  { %v1774_v34 = vpop.f32.mrf.mxu1  ;;  %v1773_v45 = vadd.f32 %v1772_v43, %v1732_v37  ;;  %v1734_v46 = vadd.f32 %v1733_v31, %v1693_v44 }
 0x152   :  { %v1735_v47 = vpop.f32.mrf.mxu0 }
 0x153   :  { %v1776_v48 = vpop.f32.mrf.mxu1  ;;  %v1775_v50 = vadd.f32 %v1774_v34, %v1734_v46  ;;  %v1943_v35 = vmax.f32 %v1773_v45, 0.0  ;;  %v3468_v34 = vld [vmem:[%s3885_s5 + $0x48] sm:$0xff]   ;;  %v3471_v47 = vld [vmem:[%s3885_s5] sm:$0xff]  }
 0x154   :  { %v1736_v51 = vpop.f32.mrf.mxu0 }
 0x155   :  { %v1777_v53 = vpop.f32.mrf.mxu1  ;;  %v1944_v55 = vmax.f32 %v1775_v50, 0.0  ;;  %v1947_v58 = vpack.c.bf16 %v1943_v35, %v1943_v35  ;;  %v2015_v50 = vld [vmem:[%s3884_s4] sm:$0x3] }
 0x156   :  { %v2020_v35 = vrot.slane %v2015_v50, %v317_v28  ;;  %v2024_v51 = vrot.slane %v2015_v50, %v321_v30 }
 0x157   :  { %v1948_v57 = vpack.c.bf16 %v1944_v55, %v1944_v55 }
 0x159   :  { %2379 = vmatprep.mubr.bf16.mxu0 %v1948_v57 }
 0x15a   :  { %2380 = vmatmul.mubr.bf16.vlgmr.msra.gmra.mxu0 %v1947_v58 }
 0x15b   :  { %2952 = vmatpush3.bf16.msra.mxu0 %v3457_v4 }
 0x15c   :  { %2953 = vmatprep.subr.bf16.mxu0 %v3458_v5 }
 0x15f   :  { %2954 = vmatpush3.bf16.msra.mxu0 %v3459_v6 }
 0x160   :  { %2955 = vmatprep.subr.bf16.mxu0 %v3460_v7 }
 0x163   :  { %2956 = vmatpush3.bf16.msra.mxu0 %v3461_v10 }
 0x164   :  { %2957 = vmatprep.subr.bf16.mxu0 %v3462_v11 }
 0x167   :  { %2958 = vmatpush3.bf16.msra.mxu0 %v3463_v12 }
 0x168   :  { %2959 = vmatprep.subr.bf16.mxu0 %v3464_v13 }
 0x16b   :  { %2960 = vmatpush3.bf16.msra.mxu0 %v3465_v14 }
 0x16c   :  { %2961 = vmatprep.subr.bf16.mxu0 %v3466_v15 }
 0x16f   :  { %2962 = vmatpush3.bf16.msra.mxu0 %v3467_v16 }
 0x170   :  { %2963 = vmatprep.subr.bf16.mxu0 %v3468_v34 }
 0x173   :  { %2964 = vmatpush3.bf16.msra.mxu0 %v3469_v40 }
 0x174   :  { %2965 = vmatprep.subr.bf16.mxu0 %v3470_v32 }
 0x177   :  { %2966 = vmatpush3.bf16.msra.mxu0 %v3471_v47 }
 0x18e   :  { %v1813_v59 = vpop.f32.mrf.mxu0 }
 0x18f   :  { %v1854_v60 = vpop.f32.mrf.mxu1  ;;  %v1814_v24 = vadd.f32 %v1813_v59, %v326_v19 }
 0x190   :  { %v1815_v61 = vpop.f32.mrf.mxu0 }
 0x191   :  { %v1856_v62 = vpop.f32.mrf.mxu1  ;;  %v1816_v25 = vadd.f32 %v1815_v61, %v330_v22  ;;  %v1855_v26 = vadd.f32 %v1854_v60, %v1814_v24 }
 0x192   :  { %v1817_v63 = vpop.f32.mrf.mxu0 }
 0x193   :  { %v1858_v0 = vpop.f32.mrf.mxu1  ;;  %v1857_v36 = vadd.f32 %v1856_v62, %v1816_v25 }
 0x194   :  { %v1818_v1 = vpop.f32.mrf.mxu0 }
 0x195   :  { %v1859_v2 = vpop.f32.mrf.mxu1 }
 0x1ce   :  { %v1895_v27 = vpop.f32.mrf.mxu0 }
 0x1cf   :  { %v1936_v33 = vpop.f32.mrf.mxu1  ;;  %v1896_v38 = vadd.f32 %v1895_v27, %v1855_v26 }
 0x1d0   :  { %v1897_v39 = vpop.f32.mrf.mxu0 }
 0x1d1   :  { %v1938_v20 = vpop.f32.mrf.mxu1  ;;  %v1937_v21 = vadd.f32 %v1936_v33, %v1896_v38  ;;  %v1898_v8 = vadd.f32 %v1897_v39, %v1857_v36 }
 0x1d2   :  { %v1899_v49 = vpop.f32.mrf.mxu0 }
 0x1d3   :  { %v1940_v9 = vpop.f32.mrf.mxu1  ;;  %v1939_v52 = vadd.f32 %v1938_v20, %v1898_v8  ;;  %v1945_v41 = vmax.f32 %v1937_v21, 0.0 }
 0x1d4   :  { %v1900_v42 = vpop.f32.mrf.mxu0 }
 0x1d5   :  { %v1941_v43 = vpop.f32.mrf.mxu1  ;;  %v1946_v44 = vmax.f32 %v1939_v52, 0.0  ;;  %v1949_v29 = vpack.c.bf16 %v1945_v41, %v1945_v41 }
 0x1d7   :  { %v1950_v37 = vpack.c.bf16 %v1946_v44, %v1946_v44 }
 0x1d9   :  { %2420 = vmatprep.mubr.bf16.mxu1 %v1950_v37 }
 0x1da   :  { %2421 = vmatmul.mubr.bf16.vlgmr.msra.gmra.mxu1 %v1949_v29 }
 0x21a   :  { %v2381_v31 = vpop.f32.mrf.mxu0 }
 0x21b   :  { %v2382_v53 = vadd.f32 %v2381_v31, %v2020_v35 }
 0x21c   :  { %v2383_v45 = vpop.f32.mrf.mxu0 }
 0x21d   :  { %v2384_v55 = vadd.f32 %v2383_v45, %v2024_v51 }
 0x21e   :  { %v2385_v46 = vpop.f32.mrf.mxu0 }
 0x220   :  { %v2386_v48 = vpop.f32.mrf.mxu0 }
 0x29a   :  { %v2422_v54 = vpop.f32.mrf.mxu1 }
 0x29b   :  { %v2423_v56 = vadd.f32 %v2422_v54, %v2382_v53 }
 0x29c   :  { %v2424_v57 = vpop.f32.mrf.mxu1 }
 0x29d   :  { %v2425_v58 = vadd.f32 %v2424_v57, %v2384_v55  ;;  %v2429_v59 = vmax.f32 %v2423_v56, 0.0 }
 0x29e   :  { %v2426_v60 = vpop.f32.mrf.mxu1 }
 0x29f   :  { %v2430_v61 = vmax.f32 %v2425_v58, 0.0  ;;  %v2431_v0 = vpack.c.bf16 %v2429_v59, %v2429_v59 }
 0x2a0   :  { %v2427_v62 = vpop.f32.mrf.mxu1 }
 0x2a1   :  { %v2432_v63 = vpack.c.bf16 %v2430_v61, %v2430_v61 }
 0x2a3   :  { %2600 = vmatprep.mubr.bf16.mxu0 %v2432_v63 }
 0x2a4   :  { %2601 = vmatmul.mubr.bf16.vlgmr.msra.gmra.mxu0 %v2431_v0 }
 0x364   :  { %v2967_v1 = vpop.f32.mrf.mxu0 }
 0x366   :  { %v2968_v28 = vpop.f32.mrf.mxu0 }
 0x367   :  { %v2969_v30 = vadd.f32 %v2968_v28, %v2967_v1 }
 0x368   :  { %v2970_v2 = vpop.f32.mrf.mxu0 }
 0x369   :  { %v2603_v3 = vadd.f32 %v2969_v30, %v2934_v23 }
 0x36a   :  { %v2971_v4 = vpop.f32.mrf.mxu0 }
 0x36b   :  { %2608 = vst [vmem:[%s3887_s7] sm:$0xff] %v2603_v3 }
 0x36c   :  { %2613 = vsyncpa [#allocation3], 1 }

</bundles_post_ra>
